<compile_context>
chip_gen: v5e
topology: v5e:2x2
jax: 0.10.0
libtpu: 0.0.40
codegen_flags: <defaults>
</compile_context>

<pallas_src>
import jax
import jax.numpy as jnp
from jax.experimental import pallas as pl
from jax.experimental.pallas import tpu as pltpu

F32 = jnp.float32

# Cast MXU operands to bf16 (2-4x MXU throughput, half the operand traffic on all
# generations); elementwise math stays f32 so v5e's f32-only VPU/EUP is unaffected.
MXU_BF16 = True

MAX_ROW_TILE = 2048          # big tiles amortize the ~0.35us per-grid-step overhead
SCATTER_EDGE_TILE = 256      # edge-reduction tile for the in-kernel one-hot scatter
VMEM_LIMIT_BYTES = 32 * 1024 * 1024   # raise v5e's 16 MiB scoped-VMEM default


def _mm(a, b):
    if MXU_BF16:
        a = a.astype(jnp.bfloat16)
        b = b.astype(jnp.bfloat16)
    return jnp.dot(a, b, preferred_element_type=F32)


def _round_up(x, m):
    return ((x + m - 1) // m) * m


def _row_tile(rows, max_tile=MAX_ROW_TILE):
    """Return (padded_rows, tile). Tiles are 128*2^k; >=2 grid steps when rows>=256
    so the 'parallel' row axis can shard across v7x's two TensorCores."""
    rows = max(int(rows), 1)
    rp128 = _round_up(rows, 128)
    t = 128
    min_steps = 2 if rows >= 256 else 1
    while t * 2 <= max_tile and t * 2 * min_steps <= rp128:
        t *= 2
    return _round_up(rows, t), t


def _pad_last(x, rp):
    pad = rp - x.shape[-1]
    if pad == 0:
        return x
    return jnp.pad(x, [(0, 0)] * (x.ndim - 1) + [(0, pad)])


# ----------------------------------------------------------------------------
# Weight packing: many tiny (r, c) f32 arrays -> one lane-padded VMEM resident
# array, sliced with static views in-kernel (cuts DMA descriptors / buffers).
# ----------------------------------------------------------------------------
class WeightPack:
    def __init__(self):
        self._arrays = []
        self._slices = []      # (row_offset, rows, cols) -- static python ints
        self._rows = 0

    def add(self, a):
        a = jnp.asarray(a, F32)
        r, c = a.shape
        idx = len(self._slices)
        self._slices.append((self._rows, r, c))
        self._arrays.append(a)
        self._rows += _round_up(r, 8)
        return idx

    def finalize(self):
        width = _round_up(max(c for _, _, c in self._slices), 128)
        buf = jnp.zeros((_round_up(max(self._rows, 8), 8), width), F32)
        for (o, r, c), a in zip(self._slices, self._arrays):
            buf = buf.at[o:o + r, 0:c].set(a)
        return buf

    def read(self, ref, idx):
        o, r, c = self._slices[idx]
        return ref[o:o + r, 0:c]


def _prep_gbp(pack, p):
    """Register one GBP layer's weights (merged block-diagonal form) into `pack`.

    Vector layout everywhere is component-major flattened: (3*V, rows).  The down /
    up projections become single matmuls with kron(I3, W^T)-style block-diagonal
    weights; the hidden dim is padded to a multiple of 8 so in-kernel slices of the
    hidden representation are sublane-tile aligned.
    """
    vin, h = p["wdown"].shape
    hp = _round_up(h, 8)
    s_in = p["wso"].shape[0] - h
    s_out = p["wso"].shape[1]
    v_out = p["wup"].shape[1]

    wd_t = p["wdown"].T                                   # (h, vin)
    wu_t = p["wup"].T                                     # (v_out, h)
    wd_bd = jnp.zeros((3 * hp, 3 * vin), F32)
    wu_bd = jnp.zeros((3 * v_out, 3 * hp), F32)
    for k in range(3):
        wd_bd = wd_bd.at[k * hp:k * hp + h, k * vin:(k + 1) * vin].set(wd_t)
        wu_bd = wu_bd.at[k * v_out:(k + 1) * v_out, k * hp:k * hp + h].set(wu_t)

    wso_s_t = p["wso"][:s_in, :].T                        # (s_out, s_in)
    wso_v_t = jnp.zeros((s_out, hp), F32).at[:, :h].set(p["wso"][s_in:, :].T)

    return dict(
        hp=hp,
        wd=pack.add(wd_bd),
        wso_s=pack.add(wso_s_t),
        wso_v=pack.add(wso_v_t),
        bso=pack.add(p["bso"].reshape(-1, 1)),
        wu=pack.add(wu_bd),
        wvos=pack.add(p["wvos"].T),
        bvos=pack.add(p["bvos"].reshape(-1, 1)),
    )


# ----------------------------------------------------------------------------
# In-kernel math helpers (lane-dense transposed layout, merged vector matmuls)
# ----------------------------------------------------------------------------
def _gbp_apply(pack, w_ref, lyr, s, v_all, use_relu, use_sig):
    """One GBP layer (vector_gate=True, vector_residual=False, bottleneck=1).

    s: (Sin, T); v_all: (3*Vin, T) component-major.
    """
    hp = lyr["hp"]
    vh = _mm(pack.read(w_ref, lyr["wd"]), v_all)                     # (3*hp, T)
    v0, v1, v2 = vh[0:hp], vh[hp:2 * hp], vh[2 * hp:3 * hp]
    vnorm = jnp.sqrt(v0 * v0 + v1 * v1 + v2 * v2) + 1e-8             # (hp, T)
    # scalar_out on cat([scalar, vnorm]) == split matmul (weights split at wrapper).
    # TODO(synk): optionally rejoin via an in-kernel sublane concat (v6e micro-opt).
    so = (_mm(pack.read(w_ref, lyr["wso_s"]), s)
          + _mm(pack.read(w_ref, lyr["wso_v"]), vnorm)
          + pack.read(w_ref, lyr["bso"]))                            # (Sout, T)
    vu = _mm(pack.read(w_ref, lyr["wu"]), vh)                        # (3*Vout, T)
    gate_in = jax.nn.sigmoid(so) if use_sig else so
    gate = jax.nn.sigmoid(_mm(pack.read(w_ref, lyr["wvos"]), gate_in)
                          + pack.read(w_ref, lyr["bvos"]))           # (Vout, T)
    gate3 = jnp.concatenate([gate, gate, gate], axis=0)              # (3*Vout, T)
    v_out = vu * gate3
    s_out = jnp.maximum(so, 0.0) if use_relu else so
    return s_out, v_out


def _sv_layernorm(s, v_all, vdim, gamma, beta):
    """ScalarVector LayerNorm.  s: (S, T); v_all: (3*V, T); gamma/beta: (S, 1)."""
    mu = jnp.mean(s, axis=0, keepdims=True)
    d = s - mu
    var = jnp.mean(d * d, axis=0, keepdims=True)
    s_out = d * jax.lax.rsqrt(var + 1e-5) * gamma + beta
    v0, v1, v2 = v_all[0:vdim], v_all[vdim:2 * vdim], v_all[2 * vdim:3 * vdim]
    sq = jnp.maximum(v0 * v0 + v1 * v1 + v2 * v2, 1e-8)              # (V, T)
    inv = jax.lax.rsqrt(jnp.mean(sq, axis=0, keepdims=True))         # (1, T)
    return s_out, v_all * inv


# ----------------------------------------------------------------------------
# Full forward pass
# ----------------------------------------------------------------------------
def gbp_atomwise_interaction(s, v, edge_index, edge_s, edge_v, params):
    n_nodes, s_dim = s.shape
    v_dim = v.shape[1]
    n_edges = edge_s.shape[0]
    e_sdim = edge_s.shape[1]
    e_vdim = edge_v.shape[1]

    # Lane-dense layout: channels on sublanes, rows (nodes / edges) on the 128-lane
    # axis.  Vectors are flattened component-major: (3*V, rows).
    sT = s.T                                                          # (S, N)
    vT = jnp.transpose(v, (2, 1, 0)).reshape(3 * v_dim, n_nodes)      # (3V, N)
    esT = edge_s.T                                                    # (Es, E)
    evT3 = jnp.transpose(edge_v, (2, 1, 0))                           # (3, Ev, E)

    np_, trn = _row_tile(n_nodes)
    ep_, tre = _row_tile(n_edges)
    te2 = min(tre, SCATTER_EDGE_TILE)      # divides tre (both 128*2^k), hence ep_

    gamma0 = params["g0"].reshape(-1, 1)
    beta0 = params["b0"].reshape(-1, 1)
    gamma1 = params["g1"].reshape(-1, 1)
    beta1 = params["b1"].reshape(-1, 1)

    # --- weight packs: one VMEM-resident array per kernel -------------------
    msg_pack = WeightPack()
    mp1 = _prep_gbp(msg_pack, params["mp1"])
    mp2 = _prep_gbp(msg_pack, params["mp2"])
    msg_w = msg_pack.finalize()

    upd_pack = WeightPack()
    g1_idx = upd_pack.add(gamma1)
    b1_idx = upd_pack.add(beta1)
    ff1 = _prep_gbp(upd_pack, params["ff1"])
    ff2 = _prep_gbp(upd_pack, params["ff2"])
    upd_w = upd_pack.finalize()

    # ---------------------------------------------------------------- kernel 1
    # pre-norm ScalarVector LayerNorm (node-tiled)
    def _prenorm_kernel(s_ref, v_ref, g_ref, b_ref, s_out_ref, v_out_ref):
        s_out, v_out = _sv_layernorm(s_ref[...], v_ref[...], v_dim,
                                     g_ref[...], b_ref[...])
        s_out_ref[...] = s_out
        v_out_ref[...] = v_out

    s1, v1 = pl.pallas_call(
        _prenorm_kernel,
        out_shape=(jax.ShapeDtypeStruct((s_dim, np_), F32),
                   jax.ShapeDtypeStruct((3 * v_dim, np_), F32)),
        grid=(np_ // trn,),
        in_specs=[pl.BlockSpec((s_dim, trn), lambda i: (0, i)),
                  pl.BlockSpec((3 * v_dim, trn), lambda i: (0, i)),
                  pl.BlockSpec(gamma0.shape, lambda i: (0, 0)),
                  pl.BlockSpec(beta0.shape, lambda i: (0, 0))],
        out_specs=(pl.BlockSpec((s_dim, trn), lambda i: (0, i)),
                   pl.BlockSpec((3 * v_dim, trn), lambda i: (0, i))),
        compiler_params=pltpu.CompilerParams(dimension_semantics=("parallel",)),
    )(_pad_last(sT, np_), _pad_last(vT, np_), gamma0, beta0)

    # ---------------------------------------------------------- JAX glue: gather
    # TODO(synk): fold this minor-axis gather into the message kernel (one-hot
    # matmul over node tiles, like the scatter below, or sorted-edge DMA).
    j, i = edge_index[0], edge_index[1]
    v1_3 = v1.reshape(3, v_dim, np_)
    msg_s = jnp.concatenate([s1[:, j], esT, s1[:, i]], axis=0)        # (2S+Es, E)
    msg_v = jnp.concatenate([v1_3[:, :, j], evT3, v1_3[:, :, i]],
                            axis=1).reshape(3 * (2 * v_dim + e_vdim), n_edges)

    in_s1 = 2 * s_dim + e_sdim
    in_v1 = 2 * v_dim + e_vdim

    # ---------------------------------------------------------------- kernel 2
    # fused 2-layer GBP message fusion (edge-tiled; intermediates stay in VMEM)
    def _message_kernel(ms_ref, mv_ref, w_ref, s_out_ref, v_out_ref):
        s_, v_ = _gbp_apply(msg_pack, w_ref, mp1, ms_ref[...], mv_ref[...],
                            use_relu=True, use_sig=True)
        s_, v_ = _gbp_apply(msg_pack, w_ref, mp2, s_, v_,
                            use_relu=False, use_sig=False)
        s_out_ref[...] = s_
        v_out_ref[...] = v_

    ms, mv = pl.pallas_call(
        _message_kernel,
        out_shape=(jax.ShapeDtypeStruct((s_dim, ep_), F32),
                   jax.ShapeDtypeStruct((3 * v_dim, ep_), F32)),
        grid=(ep_ // tre,),
        in_specs=[pl.BlockSpec((in_s1, tre), lambda e: (0, e)),
                  pl.BlockSpec((3 * in_v1, tre), lambda e: (0, e)),
                  pl.BlockSpec(msg_w.shape, lambda e: (0, 0))],
        out_specs=(pl.BlockSpec((s_dim, tre), lambda e: (0, e)),
                   pl.BlockSpec((3 * v_dim, tre), lambda e: (0, e))),
        compiler_params=pltpu.CompilerParams(
            dimension_semantics=("parallel",),
            vmem_limit_bytes=VMEM_LIMIT_BYTES),
    )(_pad_last(msg_s, ep_), _pad_last(msg_v, ep_), msg_w)

    # destination index per (padded) edge; padded edges get -1 -> never match.
    dst = jnp.full((ep_, 1), -1, jnp.int32).at[:n_edges, 0].set(i.astype(jnp.int32))
    cnt = jnp.maximum(jnp.zeros((np_,), F32).at[i].add(1.0), 1.0).reshape(1, np_)

    # ---------------------------------------------------------------- kernel 3
    # fused: scatter-mean (one-hot MXU matmul over edge tiles) + residual +
    # LayerNorm + 2-layer FF GBP + final residual (node-tiled, edge reduction)
    def _node_update_kernel(s1_ref, v1_ref, ms_ref, mv_ref, dst_ref, cnt_ref,
                            w_ref, s_out_ref, v_out_ref, acc_s, acc_v):
        e_step = pl.program_id(1)

        @pl.when(e_step == 0)
        def _():
            acc_s[...] = jnp.zeros_like(acc_s)
            acc_v[...] = jnp.zeros_like(acc_v)

        # one-hot block: onehot[e, n] = (dst[e] == node_base + n)
        node_base = pl.program_id(0) * trn
        col = jax.lax.broadcasted_iota(jnp.int32, (te2, trn), 1) + node_base
        onehot = (dst_ref[...] == col).astype(F32)                    # (te2, trn)
        acc_s[...] += _mm(ms_ref[...], onehot)
        acc_v[...] += _mm(mv_ref[...], onehot)

        @pl.when(e_step == pl.num_programs(1) - 1)
        def _():
            inv = pl.reciprocal(cnt_ref[...], approx=True)            # mean aggr
            s2 = s1_ref[...] + acc_s[...] * inv
            v2 = v1_ref[...] + acc_v[...] * inv
            s3, v3 = _sv_layernorm(s2, v2, v_dim,
                                   upd_pack.read(w_ref, g1_idx),
                                   upd_pack.read(w_ref, b1_idx))
            fs, fv = _gbp_apply(upd_pack, w_ref, ff1, s3, v3,
                                use_relu=True, use_sig=True)
            fs, fv = _gbp_apply(upd_pack, w_ref, ff2, fs, fv,
                                use_relu=False, use_sig=False)
            s_out_ref[...] = s3 + fs
            v_out_ref[...] = v3 + fv

    s4, v4 = pl.pallas_call(
        _node_update_kernel,
        out_shape=(jax.ShapeDtypeStruct((s_dim, np_), F32),
                   jax.ShapeDtypeStruct((3 * v_dim, np_), F32)),
        grid=(np_ // trn, ep_ // te2),
        in_specs=[pl.BlockSpec((s_dim, trn), lambda n, e: (0, n)),
                  pl.BlockSpec((3 * v_dim, trn), lambda n, e: (0, n)),
                  pl.BlockSpec((s_dim, te2), lambda n, e: (0, e)),
                  pl.BlockSpec((3 * v_dim, te2), lambda n, e: (0, e)),
                  pl.BlockSpec((te2, 1), lambda n, e: (e, 0)),
                  pl.BlockSpec((1, trn), lambda n, e: (0, n)),
                  pl.BlockSpec(upd_w.shape, lambda n, e: (0, 0))],
        out_specs=(pl.BlockSpec((s_dim, trn), lambda n, e: (0, n)),
                   pl.BlockSpec((3 * v_dim, trn), lambda n, e: (0, n))),
        scratch_shapes=[pltpu.VMEM((s_dim, trn), F32),
                        pltpu.VMEM((3 * v_dim, trn), F32)],
        compiler_params=pltpu.CompilerParams(
            dimension_semantics=("parallel", "arbitrary"),
            vmem_limit_bytes=VMEM_LIMIT_BYTES),
    )(s1, v1, ms, mv, dst, cnt, upd_w)

    s_out = s4[:, :n_nodes].T                                         # (N, S)
    v_out = jnp.transpose(v4.reshape(3, v_dim, np_)[:, :, :n_nodes], (2, 1, 0))
    return s_out, v_out


# ----------------------------------------------------------------------------
# Pure-JAX reference (mirrors the PyTorch code, torch (R, V, 3) layout)
# ----------------------------------------------------------------------------
def ref_gbp(s, v, p, use_relu, use_sig):
    v_pre = jnp.swapaxes(v, -1, -2)                                   # (R, 3, Vin)
    vh = jnp.einsum("rci,ih->rch", v_pre, p["wdown"])
    vnorm = jnp.sqrt(jnp.sum(vh ** 2, axis=-2)) + 1e-8
    merged = jnp.concatenate([s, vnorm], axis=-1)
    so = merged @ p["wso"] + p["bso"][0]
    vu = jnp.einsum("rch,ho->rco", vh, p["wup"])
    vrep = jnp.swapaxes(vu, -1, -2)                                   # (R, Vout, 3)
    gin = jax.nn.sigmoid(so) if use_sig else so
    gate = jax.nn.sigmoid(gin @ p["wvos"] + p["bvos"][0])
    vrep = vrep * gate[..., None]
    if use_relu:
        so = jnp.maximum(so, 0.0)
    return so, vrep


def ref_ln(s, v, g, b):
    mu = jnp.mean(s, -1, keepdims=True)
    var = jnp.mean((s - mu) ** 2, -1, keepdims=True)
    s_out = (s - mu) / jnp.sqrt(var + 1e-5) * g[0] + b[0]
    vn = jnp.maximum(jnp.sum(v ** 2, -1, keepdims=True), 1e-8)
    vn = jnp.sqrt(jnp.mean(vn, axis=-2, keepdims=True))
    return s_out, v / vn


def ref_forward(s, v, edge_index, es, ev, params):
    n = s.shape[0]
    s1, v1 = ref_ln(s, v, params["g0"], params["b0"])
    j, i = edge_index[0], edge_index[1]
    ms = jnp.concatenate([s1[j], es, s1[i]], axis=-1)
    mv = jnp.concatenate([v1[j], ev, v1[i]], axis=1)
    ms, mv = ref_gbp(ms, mv, params["mp1"], True, True)
    ms, mv = ref_gbp(ms, mv, params["mp2"], False, False)
    cnt = jnp.maximum(
        jax.ops.segment_sum(jnp.ones(i.shape, F32), i, num_segments=n), 1.0)
    agg_s = jax.ops.segment_sum(ms, i, num_segments=n) / cnt[:, None]
    agg_v = jax.ops.segment_sum(mv, i, num_segments=n) / cnt[:, None, None]
    s2, v2 = s1 + agg_s, v1 + agg_v
    s3, v3 = ref_ln(s2, v2, params["g1"], params["b1"])
    fs, fv = ref_gbp(s3, v3, params["ff1"], True, True)
    fs, fv = ref_gbp(fs, fv, params["ff2"], False, False)
    return s3 + fs, v3 + fv


# ----------------------------------------------------------------------------
# Parameter initialization
# ----------------------------------------------------------------------------
def init_gbp_params(key, s_in, v_in, s_out, v_out):
    h = max(v_in, v_out)      # bottleneck = 1
    ks = jax.random.split(key, 6)
    sc = 0.1
    return dict(
        wdown=(jax.random.normal(ks[0], (v_in, h)) * sc).astype(F32),
        wso=(jax.random.normal(ks[1], (s_in + h, s_out)) * sc).astype(F32),
        bso=(jax.random.normal(ks[2], (1, s_out)) * sc).astype(F32),
        wup=(jax.random.normal(ks[3], (h, v_out)) * sc).astype(F32),
        wvos=(jax.random.normal(ks[4], (s_out, v_out)) * sc).astype(F32),
        bvos=(jax.random.normal(ks[5], (1, v_out)) * sc).astype(F32),
    )


if __name__ == "__main__":
    # sizes: node_dims=(16, 8), edge_dims=(8, 4); N=200 nodes, E=600 edges so the
    # edge-reduction grid of the node-update kernel has multiple steps and padded
    # edges/nodes are exercised.
    N, E = 200, 600
    NS, NV = 16, 8
    ES, EV = 8, 4

    key = jax.random.PRNGKey(0)
    (k_s, k_v, k_es, k_ev, k_src, k_dst,
     k_p1, k_p2, k_p3, k_p4) = jax.random.split(key, 10)

    s = jax.random.normal(k_s, (N, NS), dtype=F32)
    v = jax.random.normal(k_v, (N, NV, 3), dtype=F32)
    edge_s = jax.random.normal(k_es, (E, ES), dtype=F32)
    edge_v = jax.random.normal(k_ev, (E, EV, 3), dtype=F32)

    src = jax.random.randint(k_src, (E,), 0, N, dtype=jnp.int32)
    dst = jax.random.randint(k_dst, (E,), 0, N, dtype=jnp.int32)
    edge_index = jnp.stack([src, dst])        # row0 = j (source), row1 = i (target)

    params = {
        # message fusion: (2S+Es, 2V+Ev) -> (S, V) -> (S, V)
        "mp1": init_gbp_params(k_p1, 2 * NS + ES, 2 * NV + EV, NS, NV),
        "mp2": init_gbp_params(k_p2, NS, NV, NS, NV),
        # feedforward: (S, V) -> (4S, 2V) -> (S, V)
        "ff1": init_gbp_params(k_p3, NS, NV, 4 * NS, 2 * NV),
        "ff2": init_gbp_params(k_p4, 4 * NS, 2 * NV, NS, NV),
        # ScalarVector LayerNorms (elementwise affine defaults)
        "g0": jnp.ones((1, NS), F32), "b0": jnp.zeros((1, NS), F32),
        "g1": jnp.ones((1, NS), F32), "b1": jnp.zeros((1, NS), F32),
    }

    fwd = jax.jit(gbp_atomwise_interaction)
    s_out, v_out = fwd(s, v, edge_index, edge_s, edge_v, params)
    jax.block_until_ready((s_out, v_out))

    s_ref, v_ref = ref_forward(s, v, edge_index, edge_s, edge_v, params)
    assert s_out.shape == (N, NS) and v_out.shape == (N, NV, 3)
    # bf16 MXU operands + approx reciprocal -> tolerance loosened vs f32 reference
    # (set MXU_BF16=False for a bit-tight f32 check at ~5e-3).
    assert jnp.allclose(s_out, s_ref, atol=5e-2, rtol=5e-2), "scalar mismatch"
    assert jnp.allclose(v_out, v_ref, atol=5e-2, rtol=5e-2), "vector mismatch"

    print("KERNEL_OK")
</pallas_src>

<mosaic_0001>
module attributes {stable_mosaic.version = 11 : i64} {
  func.func @_prenorm_kernel(%arg0: i32, %arg1: memref<16x256xf32, #tpu.memory_space<vmem>>, %arg2: memref<24x256xf32, #tpu.memory_space<vmem>>, %arg3: memref<16x1xf32, #tpu.memory_space<vmem>>, %arg4: memref<16x1xf32, #tpu.memory_space<vmem>>, %arg5: memref<16x256xf32, #tpu.memory_space<vmem>>, %arg6: memref<24x256xf32, #tpu.memory_space<vmem>>) attributes {dimension_semantics = [#tpu.dimension_semantics<parallel>], iteration_bounds = array<i64: 1>, scalar_prefetch = 0 : i64, scratch_operands = 0 : i64, tpu.core_type = #tpu.core_type<tc>, window_params = [{transform_indices = @transform_0, window_bounds = array<i64: 16, 256>}, {transform_indices = @transform_1, window_bounds = array<i64: 24, 256>}, {pipeline_mode = #tpu.pipeline_mode<synchronous>, transform_indices = @transform_2, window_bounds = array<i64: 16, 1>}, {pipeline_mode = #tpu.pipeline_mode<synchronous>, transform_indices = @transform_3, window_bounds = array<i64: 16, 1>}, {transform_indices = @transform_4, window_bounds = array<i64: 16, 256>}, {transform_indices = @transform_5, window_bounds = array<i64: 24, 256>}]} {
    %c0 = arith.constant 0 : index
    %c0_0 = arith.constant 0 : index
    %0 = vector.load %arg1[%c0, %c0_0] : memref<16x256xf32, #tpu.memory_space<vmem>>, vector<16x256xf32>
    %c0_1 = arith.constant 0 : index
    %c0_2 = arith.constant 0 : index
    %1 = vector.load %arg2[%c0_1, %c0_2] : memref<24x256xf32, #tpu.memory_space<vmem>>, vector<24x256xf32>
    %c0_3 = arith.constant 0 : index
    %c0_4 = arith.constant 0 : index
    %2 = vector.load %arg3[%c0_3, %c0_4] : memref<16x1xf32, #tpu.memory_space<vmem>>, vector<16x1xf32>
    %c0_5 = arith.constant 0 : index
    %c0_6 = arith.constant 0 : index
    %3 = vector.load %arg4[%c0_5, %c0_6] : memref<16x1xf32, #tpu.memory_space<vmem>>, vector<16x1xf32>
    %cst = arith.constant dense<0.000000e+00> : vector<256xf32>
    %4 = vector.multi_reduction <add>, %0, %cst [0] : vector<16x256xf32> to vector<256xf32>
    %5 = vector.shape_cast %4 : vector<256xf32> to vector<1x256xf32>
    %cst_7 = arith.constant 1.600000e+01 : f32
    %6 = vector.broadcast %cst_7 : f32 to vector<1x256xf32>
    %7 = arith.divf %5, %6 : vector<1x256xf32>
    %8 = vector.broadcast %7 : vector<1x256xf32> to vector<16x256xf32>
    %9 = arith.subf %0, %8 : vector<16x256xf32>
    %10 = arith.mulf %9, %9 : vector<16x256xf32>
    %cst_8 = arith.constant dense<0.000000e+00> : vector<256xf32>
    %11 = vector.multi_reduction <add>, %10, %cst_8 [0] : vector<16x256xf32> to vector<256xf32>
    %12 = vector.shape_cast %11 : vector<256xf32> to vector<1x256xf32>
    %cst_9 = arith.constant 1.600000e+01 : f32
    %13 = vector.broadcast %cst_9 : f32 to vector<1x256xf32>
    %14 = arith.divf %12, %13 : vector<1x256xf32>
    %cst_10 = arith.constant 9.99999974E-6 : f32
    %15 = vector.broadcast %cst_10 : f32 to vector<1x256xf32>
    %16 = arith.addf %14, %15 : vector<1x256xf32>
    %17 = math.rsqrt %16 : vector<1x256xf32>
    %18 = vector.broadcast %17 : vector<1x256xf32> to vector<16x256xf32>
    %19 = arith.mulf %9, %18 : vector<16x256xf32>
    %20 = vector.broadcast %2 : vector<16x1xf32> to vector<16x256xf32>
    %21 = arith.mulf %19, %20 : vector<16x256xf32>
    %22 = vector.broadcast %3 : vector<16x1xf32> to vector<16x256xf32>
    %23 = arith.addf %21, %22 : vector<16x256xf32>
    %24 = vector.extract_strided_slice %1 {offsets = [0, 0], sizes = [8, 256], strides = [1, 1]} : vector<24x256xf32> to vector<8x256xf32>
    %25 = vector.extract_strided_slice %1 {offsets = [8, 0], sizes = [8, 256], strides = [1, 1]} : vector<24x256xf32> to vector<8x256xf32>
    %26 = vector.extract_strided_slice %1 {offsets = [16, 0], sizes = [8, 256], strides = [1, 1]} : vector<24x256xf32> to vector<8x256xf32>
    %27 = arith.mulf %24, %24 : vector<8x256xf32>
    %28 = arith.mulf %25, %25 : vector<8x256xf32>
    %29 = arith.addf %27, %28 : vector<8x256xf32>
    %30 = arith.mulf %26, %26 : vector<8x256xf32>
    %31 = arith.addf %29, %30 : vector<8x256xf32>
    %cst_11 = arith.constant 9.99999993E-9 : f32
    %32 = vector.broadcast %cst_11 : f32 to vector<8x256xf32>
    %33 = arith.maximumf %31, %32 : vector<8x256xf32>
    %cst_12 = arith.constant dense<0.000000e+00> : vector<256xf32>
    %34 = vector.multi_reduction <add>, %33, %cst_12 [0] : vector<8x256xf32> to vector<256xf32>
    %35 = vector.shape_cast %34 : vector<256xf32> to vector<1x256xf32>
    %cst_13 = arith.constant 8.000000e+00 : f32
    %36 = vector.broadcast %cst_13 : f32 to vector<1x256xf32>
    %37 = arith.divf %35, %36 : vector<1x256xf32>
    %38 = math.rsqrt %37 : vector<1x256xf32>
    %39 = vector.broadcast %38 : vector<1x256xf32> to vector<24x256xf32>
    %40 = arith.mulf %1, %39 : vector<24x256xf32>
    %c0_14 = arith.constant 0 : index
    %c0_15 = arith.constant 0 : index
    %41 = vector.load %arg5[%c0_14, %c0_15] : memref<16x256xf32, #tpu.memory_space<vmem>>, vector<16x256xf32>
    tpu.vector_store %arg5[%c0_14, %c0_15], %23 {strides = array<i32>} : memref<16x256xf32, #tpu.memory_space<vmem>>, vector<16x256xf32>,
    %c0_16 = arith.constant 0 : index
    %c0_17 = arith.constant 0 : index
    %42 = vector.load %arg6[%c0_16, %c0_17] : memref<24x256xf32, #tpu.memory_space<vmem>>, vector<24x256xf32>
    tpu.vector_store %arg6[%c0_16, %c0_17], %40 {strides = array<i32>} : memref<24x256xf32, #tpu.memory_space<vmem>>, vector<24x256xf32>,
    return
  }
  func.func @transform_0(%arg0: i32) -> (i32, i32) {
    %c0_i32 = arith.constant 0 : i32
    %c0_i32_0 = arith.constant 0 : i32
    return %c0_i32, %arg0 : i32, i32
  }
  func.func @transform_1(%arg0: i32) -> (i32, i32) {
    %c0_i32 = arith.constant 0 : i32
    %c0_i32_0 = arith.constant 0 : i32
    return %c0_i32, %arg0 : i32, i32
  }
  func.func @transform_2(%arg0: i32) -> (i32, i32) {
    %c0_i32 = arith.constant 0 : i32
    %c0_i32_0 = arith.constant 0 : i32
    %c0_i32_1 = arith.constant 0 : i32
    return %c0_i32, %c0_i32_0 : i32, i32
  }
  func.func @transform_3(%arg0: i32) -> (i32, i32) {
    %c0_i32 = arith.constant 0 : i32
    %c0_i32_0 = arith.constant 0 : i32
    %c0_i32_1 = arith.constant 0 : i32
    return %c0_i32, %c0_i32_0 : i32, i32
  }
  func.func @transform_4(%arg0: i32) -> (i32, i32) {
    %c0_i32 = arith.constant 0 : i32
    %c0_i32_0 = arith.constant 0 : i32
    return %c0_i32, %arg0 : i32, i32
  }
  func.func @transform_5(%arg0: i32) -> (i32, i32) {
    %c0_i32 = arith.constant 0 : i32
    %c0_i32_0 = arith.constant 0 : i32
    return %c0_i32, %arg0 : i32, i32
  }
}

module attributes {stable_mosaic.version = 11 : i64} {
  func.func @_message_kernel(%arg0: i32, %arg1: memref<40x256xf32, #tpu.memory_space<vmem>>, %arg2: memref<60x256xf32, #tpu.memory_space<vmem>>, %arg3: memref<272x128xf32, #tpu.memory_space<vmem>>, %arg4: memref<16x256xf32, #tpu.memory_space<vmem>>, %arg5: memref<24x256xf32, #tpu.memory_space<vmem>>) attributes {dimension_semantics = [#tpu.dimension_semantics<parallel>], iteration_bounds = array<i64: 3>, scalar_prefetch = 0 : i64, scratch_operands = 0 : i64, tpu.core_type = #tpu.core_type<tc>, window_params = [{transform_indices = @transform_0, window_bounds = array<i64: 40, 256>}, {transform_indices = @transform_1, window_bounds = array<i64: 60, 256>}, {pipeline_mode = #tpu.pipeline_mode<synchronous>, transform_indices = @transform_2, window_bounds = array<i64: 272, 128>}, {transform_indices = @transform_3, window_bounds = array<i64: 16, 256>}, {transform_indices = @transform_4, window_bounds = array<i64: 24, 256>}]} {
    %c0 = arith.constant 0 : index
    %c0_0 = arith.constant 0 : index
    %0 = vector.load %arg1[%c0, %c0_0] : memref<40x256xf32, #tpu.memory_space<vmem>>, vector<40x256xf32>
    %c0_1 = arith.constant 0 : index
    %c0_2 = arith.constant 0 : index
    %1 = vector.load %arg2[%c0_1, %c0_2] : memref<60x256xf32, #tpu.memory_space<vmem>>, vector<60x256xf32>
    %c0_3 = arith.constant 0 : index
    %c0_4 = arith.constant 0 : index
    %2 = vector.load %arg3[%c0_3, %c0_4] : memref<272x128xf32, #tpu.memory_space<vmem>>, vector<72x60xf32>
    %3 = arith.truncf %2 : vector<72x60xf32> to vector<72x60xbf16>
    %4 = arith.truncf %1 : vector<60x256xf32> to vector<60x256xbf16>
    %cst = arith.constant dense<0.000000e+00> : vector<72x256xf32>
    %5 = tpu.matmul %3, %4, %cst {dimension_numbers = #tpu.dot_dimension_numbers<[1], [0], [0], [1], [0, 0, 1, 1], [], []>} : vector<72x60xbf16>, vector<60x256xbf16>, vector<72x256xf32> -> vector<72x256xf32>
    %6 = vector.extract_strided_slice %5 {offsets = [0, 0], sizes = [24, 256], strides = [1, 1]} : vector<72x256xf32> to vector<24x256xf32>
    %7 = vector.extract_strided_slice %5 {offsets = [24, 0], sizes = [24, 256], strides = [1, 1]} : vector<72x256xf32> to vector<24x256xf32>
    %8 = vector.extract_strided_slice %5 {offsets = [48, 0], sizes = [24, 256], strides = [1, 1]} : vector<72x256xf32> to vector<24x256xf32>
    %9 = arith.mulf %6, %6 : vector<24x256xf32>
    %10 = arith.mulf %7, %7 : vector<24x256xf32>
    %11 = arith.addf %9, %10 : vector<24x256xf32>
    %12 = arith.mulf %8, %8 : vector<24x256xf32>
    %13 = arith.addf %11, %12 : vector<24x256xf32>
    %14 = math.sqrt %13 : vector<24x256xf32>
    %cst_5 = arith.constant 9.99999993E-9 : f32
    %15 = vector.broadcast %cst_5 : f32 to vector<24x256xf32>
    %16 = arith.addf %14, %15 : vector<24x256xf32>
    %c72 = arith.constant 72 : index
    %c0_6 = arith.constant 0 : index
    %17 = vector.load %arg3[%c72, %c0_6] : memref<272x128xf32, #tpu.memory_space<vmem>>, vector<16x40xf32>
    %18 = arith.truncf %17 : vector<16x40xf32> to vector<16x40xbf16>
    %19 = arith.truncf %0 : vector<40x256xf32> to vector<40x256xbf16>
    %cst_7 = arith.constant dense<0.000000e+00> : vector<16x256xf32>
    %20 = tpu.matmul %18, %19, %cst_7 {dimension_numbers = #tpu.dot_dimension_numbers<[1], [0], [0], [1], [0, 0, 1, 1], [], []>} : vector<16x40xbf16>, vector<40x256xbf16>, vector<16x256xf32> -> vector<16x256xf32>
    %c88 = arith.constant 88 : index
    %c0_8 = arith.constant 0 : index
    %21 = vector.load %arg3[%c88, %c0_8] : memref<272x128xf32, #tpu.memory_space<vmem>>, vector<16x24xf32>
    %22 = arith.truncf %21 : vector<16x24xf32> to vector<16x24xbf16>
    %23 = arith.truncf %16 : vector<24x256xf32> to vector<24x256xbf16>
    %cst_9 = arith.constant dense<0.000000e+00> : vector<16x256xf32>
    %24 = tpu.matmul %22, %23, %cst_9 {dimension_numbers = #tpu.dot_dimension_numbers<[1], [0], [0], [1], [0, 0, 1, 1], [], []>} : vector<16x24xbf16>, vector<24x256xbf16>, vector<16x256xf32> -> vector<16x256xf32>
    %25 = arith.addf %20, %24 : vector<16x256xf32>
    %c104 = arith.constant 104 : index
    %c0_10 = arith.constant 0 : index
    %26 = vector.load %arg3[%c104, %c0_10] : memref<272x128xf32, #tpu.memory_space<vmem>>, vector<16x1xf32>
    %27 = vector.broadcast %26 : vector<16x1xf32> to vector<16x256xf32>
    %28 = arith.addf %25, %27 : vector<16x256xf32>
    %c120 = arith.constant 120 : index
    %c0_11 = arith.constant 0 : index
    %29 = vector.load %arg3[%c120, %c0_11] : memref<272x128xf32, #tpu.memory_space<vmem>>, vector<24x72xf32>
    %30 = arith.truncf %29 : vector<24x72xf32> to vector<24x72xbf16>
    %31 = arith.truncf %5 : vector<72x256xf32> to vector<72x256xbf16>
    %cst_12 = arith.constant dense<0.000000e+00> : vector<24x256xf32>
    %32 = tpu.matmul %30, %31, %cst_12 {dimension_numbers = #tpu.dot_dimension_numbers<[1], [0], [0], [1], [0, 0, 1, 1], [], []>} : vector<24x72xbf16>, vector<72x256xbf16>, vector<24x256xf32> -> vector<24x256xf32>
    %33 = arith.negf %28 : vector<16x256xf32>
    %34 = math.exp %33 : vector<16x256xf32>
    %cst_13 = arith.constant 1.000000e+00 : f32
    %35 = vector.broadcast %cst_13 : f32 to vector<16x256xf32>
    %36 = arith.addf %35, %34 : vector<16x256xf32>
    %37 = arith.divf %35, %36 : vector<16x256xf32>
    %c144 = arith.constant 144 : index
    %c0_14 = arith.constant 0 : index
    %38 = vector.load %arg3[%c144, %c0_14] : memref<272x128xf32, #tpu.memory_space<vmem>>, vector<8x16xf32>
    %39 = arith.truncf %38 : vector<8x16xf32> to vector<8x16xbf16>
    %40 = arith.truncf %37 : vector<16x256xf32> to vector<16x256xbf16>
    %cst_15 = arith.constant dense<0.000000e+00> : vector<8x256xf32>
    %41 = tpu.matmul %39, %40, %cst_15 {dimension_numbers = #tpu.dot_dimension_numbers<[1], [0], [0], [1], [0, 0, 1, 1], [], []>} : vector<8x16xbf16>, vector<16x256xbf16>, vector<8x256xf32> -> vector<8x256xf32>
    %c152 = arith.constant 152 : index
    %c0_16 = arith.constant 0 : index
    %42 = vector.load %arg3[%c152, %c0_16] : memref<272x128xf32, #tpu.memory_space<vmem>>, vector<8x1xf32>
    %43 = vector.broadcast %42 : vector<8x1xf32> to vector<8x256xf32>
    %44 = arith.addf %41, %43 : vector<8x256xf32>
    %45 = arith.negf %44 : vector<8x256xf32>
    %46 = math.exp %45 : vector<8x256xf32>
    %cst_17 = arith.constant 1.000000e+00 : f32
    %47 = vector.broadcast %cst_17 : f32 to vector<8x256xf32>
    %48 = arith.addf %47, %46 : vector<8x256xf32>
    %49 = arith.divf %47, %48 : vector<8x256xf32>
    %50 = tpu.concatenate %49, %49, %49 in 0 : vector<8x256xf32>, vector<8x256xf32>, vector<8x256xf32> -> vector<24x256xf32>
    %51 = arith.mulf %32, %50 : vector<24x256xf32>
    %cst_18 = arith.constant 0.000000e+00 : f32
    %52 = vector.broadcast %cst_18 : f32 to vector<16x256xf32>
    %53 = arith.maximumf %28, %52 : vector<16x256xf32>
    %c160 = arith.constant 160 : index
    %c0_19 = arith.constant 0 : index
    %54 = vector.load %arg3[%c160, %c0_19] : memref<272x128xf32, #tpu.memory_space<vmem>>, vector<24x24xf32>
    %55 = arith.truncf %54 : vector<24x24xf32> to vector<24x24xbf16>
    %56 = arith.truncf %51 : vector<24x256xf32> to vector<24x256xbf16>
    %cst_20 = arith.constant dense<0.000000e+00> : vector<24x256xf32>
    %57 = tpu.matmul %55, %56, %cst_20 {dimension_numbers = #tpu.dot_dimension_numbers<[1], [0], [0], [1], [0, 0, 1, 1], [], []>} : vector<24x24xbf16>, vector<24x256xbf16>, vector<24x256xf32> -> vector<24x256xf32>
    %58 = vector.extract_strided_slice %57 {offsets = [0, 0], sizes = [8, 256], strides = [1, 1]} : vector<24x256xf32> to vector<8x256xf32>
    %59 = vector.extract_strided_slice %57 {offsets = [8, 0], sizes = [8, 256], strides = [1, 1]} : vector<24x256xf32> to vector<8x256xf32>
    %60 = vector.extract_strided_slice %57 {offsets = [16, 0], sizes = [8, 256], strides = [1, 1]} : vector<24x256xf32> to vector<8x256xf32>
    %61 = arith.mulf %58, %58 : vector<8x256xf32>
    %62 = arith.mulf %59, %59 : vector<8x256xf32>
    %63 = arith.addf %61, %62 : vector<8x256xf32>
    %64 = arith.mulf %60, %60 : vector<8x256xf32>
    %65 = arith.addf %63, %64 : vector<8x256xf32>
    %66 = math.sqrt %65 : vector<8x256xf32>
    %cst_21 = arith.constant 9.99999993E-9 : f32
    %67 = vector.broadcast %cst_21 : f32 to vector<8x256xf32>
    %68 = arith.addf %66, %67 : vector<8x256xf32>
    %c184 = arith.constant 184 : index
    %c0_22 = arith.constant 0 : index
    %69 = vector.load %arg3[%c184, %c0_22] : memref<272x128xf32, #tpu.memory_space<vmem>>, vector<16x16xf32>
    %70 = arith.truncf %69 : vector<16x16xf32> to vector<16x16xbf16>
    %71 = arith.truncf %53 : vector<16x256xf32> to vector<16x256xbf16>
    %cst_23 = arith.constant dense<0.000000e+00> : vector<16x256xf32>
    %72 = tpu.matmul %70, %71, %cst_23 {dimension_numbers = #tpu.dot_dimension_numbers<[1], [0], [0], [1], [0, 0, 1, 1], [], []>} : vector<16x16xbf16>, vector<16x256xbf16>, vector<16x256xf32> -> vector<16x256xf32>
    %c200 = arith.constant 200 : index
    %c0_24 = arith.constant 0 : index
    %73 = vector.load %arg3[%c200, %c0_24] : memref<272x128xf32, #tpu.memory_space<vmem>>, vector<16x8xf32>
    %74 = arith.truncf %73 : vector<16x8xf32> to vector<16x8xbf16>
    %75 = arith.truncf %68 : vector<8x256xf32> to vector<8x256xbf16>
    %cst_25 = arith.constant dense<0.000000e+00> : vector<16x256xf32>
    %76 = tpu.matmul %74, %75, %cst_25 {dimension_numbers = #tpu.dot_dimension_numbers<[1], [0], [0], [1], [0, 0, 1, 1], [], []>} : vector<16x8xbf16>, vector<8x256xbf16>, vector<16x256xf32> -> vector<16x256xf32>
    %77 = arith.addf %72, %76 : vector<16x256xf32>
    %c216 = arith.constant 216 : index
    %c0_26 = arith.constant 0 : index
    %78 = vector.load %arg3[%c216, %c0_26] : memref<272x128xf32, #tpu.memory_space<vmem>>, vector<16x1xf32>
    %79 = vector.broadcast %78 : vector<16x1xf32> to vector<16x256xf32>
    %80 = arith.addf %77, %79 : vector<16x256xf32>
    %c232 = arith.constant 232 : index
    %c0_27 = arith.constant 0 : index
    %81 = vector.load %arg3[%c232, %c0_27] : memref<272x128xf32, #tpu.memory_space<vmem>>, vector<24x24xf32>
    %82 = arith.truncf %81 : vector<24x24xf32> to vector<24x24xbf16>
    %83 = arith.truncf %57 : vector<24x256xf32> to vector<24x256xbf16>
    %cst_28 = arith.constant dense<0.000000e+00> : vector<24x256xf32>
    %84 = tpu.matmul %82, %83, %cst_28 {dimension_numbers = #tpu.dot_dimension_numbers<[1], [0], [0], [1], [0, 0, 1, 1], [], []>} : vector<24x24xbf16>, vector<24x256xbf16>, vector<24x256xf32> -> vector<24x256xf32>
    %c256 = arith.constant 256 : index
    %c0_29 = arith.constant 0 : index
    %85 = vector.load %arg3[%c256, %c0_29] : memref<272x128xf32, #tpu.memory_space<vmem>>, vector<8x16xf32>
    %86 = arith.truncf %85 : vector<8x16xf32> to vector<8x16xbf16>
    %87 = arith.truncf %80 : vector<16x256xf32> to vector<16x256xbf16>
    %cst_30 = arith.constant dense<0.000000e+00> : vector<8x256xf32>
    %88 = tpu.matmul %86, %87, %cst_30 {dimension_numbers = #tpu.dot_dimension_numbers<[1], [0], [0], [1], [0, 0, 1, 1], [], []>} : vector<8x16xbf16>, vector<16x256xbf16>, vector<8x256xf32> -> vector<8x256xf32>
    %c264 = arith.constant 264 : index
    %c0_31 = arith.constant 0 : index
    %89 = vector.load %arg3[%c264, %c0_31] : memref<272x128xf32, #tpu.memory_space<vmem>>, vector<8x1xf32>
    %90 = vector.broadcast %89 : vector<8x1xf32> to vector<8x256xf32>
    %91 = arith.addf %88, %90 : vector<8x256xf32>
    %92 = arith.negf %91 : vector<8x256xf32>
    %93 = math.exp %92 : vector<8x256xf32>
    %cst_32 = arith.constant 1.000000e+00 : f32
    %94 = vector.broadcast %cst_32 : f32 to vector<8x256xf32>
    %95 = arith.addf %94, %93 : vector<8x256xf32>
    %96 = arith.divf %94, %95 : vector<8x256xf32>
    %97 = tpu.concatenate %96, %96, %96 in 0 : vector<8x256xf32>, vector<8x256xf32>, vector<8x256xf32> -> vector<24x256xf32>
    %98 = arith.mulf %84, %97 : vector<24x256xf32>
    %c0_33 = arith.constant 0 : index
    %c0_34 = arith.constant 0 : index
    %99 = vector.load %arg4[%c0_33, %c0_34] : memref<16x256xf32, #tpu.memory_space<vmem>>, vector<16x256xf32>
    tpu.vector_store %arg4[%c0_33, %c0_34], %80 {strides = array<i32>} : memref<16x256xf32, #tpu.memory_space<vmem>>, vector<16x256xf32>,
    %c0_35 = arith.constant 0 : index
    %c0_36 = arith.constant 0 : index
    %100 = vector.load %arg5[%c0_35, %c0_36] : memref<24x256xf32, #tpu.memory_space<vmem>>, vector<24x256xf32>
    tpu.vector_store %arg5[%c0_35, %c0_36], %98 {strides = array<i32>} : memref<24x256xf32, #tpu.memory_space<vmem>>, vector<24x256xf32>,
    return
  }
  func.func @transform_0(%arg0: i32) -> (i32, i32) {
    %c0_i32 = arith.constant 0 : i32
    %c0_i32_0 = arith.constant 0 : i32
    return %c0_i32, %arg0 : i32, i32
  }
  func.func @transform_1(%arg0: i32) -> (i32, i32) {
    %c0_i32 = arith.constant 0 : i32
    %c0_i32_0 = arith.constant 0 : i32
    return %c0_i32, %arg0 : i32, i32
  }
  func.func @transform_2(%arg0: i32) -> (i32, i32) {
    %c0_i32 = arith.constant 0 : i32
    %c0_i32_0 = arith.constant 0 : i32
    %c0_i32_1 = arith.constant 0 : i32
    return %c0_i32, %c0_i32_0 : i32, i32
  }
  func.func @transform_3(%arg0: i32) -> (i32, i32) {
    %c0_i32 = arith.constant 0 : i32
    %c0_i32_0 = arith.constant 0 : i32
    return %c0_i32, %arg0 : i32, i32
  }
  func.func @transform_4(%arg0: i32) -> (i32, i32) {
    %c0_i32 = arith.constant 0 : i32
    %c0_i32_0 = arith.constant 0 : i32
    return %c0_i32, %arg0 : i32, i32
  }
}

module attributes {stable_mosaic.version = 11 : i64} {
  func.func @_node_update_kernel(%arg0: i32, %arg1: i32, %arg2: memref<16x256xf32, #tpu.memory_space<vmem>>, %arg3: memref<24x256xf32, #tpu.memory_space<vmem>>, %arg4: memref<16x256xf32, #tpu.memory_space<vmem>>, %arg5: memref<24x256xf32, #tpu.memory_space<vmem>>, %arg6: memref<256x1xi32, #tpu.memory_space<vmem>>, %arg7: memref<1x256xf32, #tpu.memory_space<vmem>>, %arg8: memref<488x128xf32, #tpu.memory_space<vmem>>, %arg9: memref<16x256xf32, #tpu.memory_space<vmem>>, %arg10: memref<24x256xf32, #tpu.memory_space<vmem>>, %arg11: memref<16x256xf32, #tpu.memory_space<vmem>>, %arg12: memref<24x256xf32, #tpu.memory_space<vmem>>) attributes {dimension_semantics = [#tpu.dimension_semantics<parallel>, #tpu.dimension_semantics<arbitrary>], iteration_bounds = array<i64: 1, 3>, scalar_prefetch = 0 : i64, scratch_operands = 2 : i64, tpu.core_type = #tpu.core_type<tc>, window_params = [{transform_indices = @transform_0, window_bounds = array<i64: 16, 256>}, {transform_indices = @transform_1, window_bounds = array<i64: 24, 256>}, {transform_indices = @transform_2, window_bounds = array<i64: 16, 256>}, {transform_indices = @transform_3, window_bounds = array<i64: 24, 256>}, {transform_indices = @transform_4, window_bounds = array<i64: 256, 1>}, {transform_indices = @transform_5, window_bounds = array<i64: 1, 256>}, {pipeline_mode = #tpu.pipeline_mode<synchronous>, transform_indices = @transform_6, window_bounds = array<i64: 488, 128>}, {transform_indices = @transform_7, window_bounds = array<i64: 16, 256>}, {transform_indices = @transform_8, window_bounds = array<i64: 24, 256>}]} {
    %c0_i32 = arith.constant 0 : i32
    %0 = arith.cmpi eq, %arg1, %c0_i32 : i32
    %1 = arith.extui %0 : i1 to i32
    %c0_i32_0 = arith.constant 0 : i32
    %2 = arith.cmpi ne, %1, %c0_i32_0 : i32
    scf.if %2 {
      %cst_16 = arith.constant 0.000000e+00 : f32
      %29 = vector.broadcast %cst_16 : f32 to vector<16x256xf32>
      %c0_17 = arith.constant 0 : index
      %c0_18 = arith.constant 0 : index
      %30 = vector.load %arg11[%c0_17, %c0_18] : memref<16x256xf32, #tpu.memory_space<vmem>>, vector<16x256xf32>
      tpu.vector_store %arg11[%c0_17, %c0_18], %29 {strides = array<i32>} : memref<16x256xf32, #tpu.memory_space<vmem>>, vector<16x256xf32>,
      %cst_19 = arith.constant 0.000000e+00 : f32
      %31 = vector.broadcast %cst_19 : f32 to vector<24x256xf32>
      %c0_20 = arith.constant 0 : index
      %c0_21 = arith.constant 0 : index
      %32 = vector.load %arg12[%c0_20, %c0_21] : memref<24x256xf32, #tpu.memory_space<vmem>>, vector<24x256xf32>
      tpu.vector_store %arg12[%c0_20, %c0_21], %31 {strides = array<i32>} : memref<24x256xf32, #tpu.memory_space<vmem>>, vector<24x256xf32>,
    } else {
    }
    %c256_i32 = arith.constant 256 : i32
    %3 = arith.muli %arg0, %c256_i32 : i32
    %4 = tpu.iota {dimensions = array<i32: 1>} : vector<256x256xi32>
    %5 = vector.broadcast %3 : i32 to vector<256x256xi32>
    %6 = arith.addi %4, %5 : vector<256x256xi32>
    %c0 = arith.constant 0 : index
    %c0_1 = arith.constant 0 : index
    %7 = vector.load %arg6[%c0, %c0_1] : memref<256x1xi32, #tpu.memory_space<vmem>>, vector<256x1xi32>
    %8 = vector.broadcast %7 : vector<256x1xi32> to vector<256x256xi32>
    %9 = arith.cmpi eq, %8, %6 : vector<256x256xi32>
    %10 = arith.extui %9 : vector<256x256xi1> to vector<256x256xi32>
    %11 = arith.sitofp %10 : vector<256x256xi32> to vector<256x256xf32>
    %c0_2 = arith.constant 0 : index
    %c0_3 = arith.constant 0 : index
    %12 = vector.load %arg11[%c0_2, %c0_3] : memref<16x256xf32, #tpu.memory_space<vmem>>, vector<16x256xf32>
    %c0_4 = arith.constant 0 : index
    %c0_5 = arith.constant 0 : index
    %13 = vector.load %arg4[%c0_4, %c0_5] : memref<16x256xf32, #tpu.memory_space<vmem>>, vector<16x256xf32>
    %14 = arith.truncf %13 : vector<16x256xf32> to vector<16x256xbf16>
    %15 = arith.truncf %11 : vector<256x256xf32> to vector<256x256xbf16>
    %cst = arith.constant dense<0.000000e+00> : vector<16x256xf32>
    %16 = tpu.matmul %14, %15, %cst {dimension_numbers = #tpu.dot_dimension_numbers<[1], [0], [0], [1], [0, 0, 1, 1], [], []>} : vector<16x256xbf16>, vector<256x256xbf16>, vector<16x256xf32> -> vector<16x256xf32>
    %17 = arith.addf %12, %16 : vector<16x256xf32>
    %c0_6 = arith.constant 0 : index
    %c0_7 = arith.constant 0 : index
    %18 = vector.load %arg11[%c0_6, %c0_7] : memref<16x256xf32, #tpu.memory_space<vmem>>, vector<16x256xf32>
    tpu.vector_store %arg11[%c0_6, %c0_7], %17 {strides = array<i32>} : memref<16x256xf32, #tpu.memory_space<vmem>>, vector<16x256xf32>,
    %c0_8 = arith.constant 0 : index
    %c0_9 = arith.constant 0 : index
    %19 = vector.load %arg12[%c0_8, %c0_9] : memref<24x256xf32, #tpu.memory_space<vmem>>, vector<24x256xf32>
    %c0_10 = arith.constant 0 : index
    %c0_11 = arith.constant 0 : index
    %20 = vector.load %arg5[%c0_10, %c0_11] : memref<24x256xf32, #tpu.memory_space<vmem>>, vector<24x256xf32>
    %21 = arith.truncf %20 : vector<24x256xf32> to vector<24x256xbf16>
    %22 = arith.truncf %11 : vector<256x256xf32> to vector<256x256xbf16>
    %cst_12 = arith.constant dense<0.000000e+00> : vector<24x256xf32>
    %23 = tpu.matmul %21, %22, %cst_12 {dimension_numbers = #tpu.dot_dimension_numbers<[1], [0], [0], [1], [0, 0, 1, 1], [], []>} : vector<24x256xbf16>, vector<256x256xbf16>, vector<24x256xf32> -> vector<24x256xf32>
    %24 = arith.addf %19, %23 : vector<24x256xf32>
    %c0_13 = arith.constant 0 : index
    %c0_14 = arith.constant 0 : index
    %25 = vector.load %arg12[%c0_13, %c0_14] : memref<24x256xf32, #tpu.memory_space<vmem>>, vector<24x256xf32>
    tpu.vector_store %arg12[%c0_13, %c0_14], %24 {strides = array<i32>} : memref<24x256xf32, #tpu.memory_space<vmem>>, vector<24x256xf32>,
    %c2_i32 = arith.constant 2 : i32
    %26 = arith.cmpi eq, %arg1, %c2_i32 : i32
    %27 = arith.extui %26 : i1 to i32
    %c0_i32_15 = arith.constant 0 : i32
    %28 = arith.cmpi ne, %27, %c0_i32_15 : i32
    scf.if %28 {
      %c0_16 = arith.constant 0 : index
      %c0_17 = arith.constant 0 : index
      %29 = vector.load %arg7[%c0_16, %c0_17] : memref<1x256xf32, #tpu.memory_space<vmem>>, vector<1x256xf32>
      %30 = tpu.reciprocal %29 {approx = true} : vector<1x256xf32> -> vector<1x256xf32>
      %c0_18 = arith.constant 0 : index
      %c0_19 = arith.constant 0 : index
      %31 = vector.load %arg2[%c0_18, %c0_19] : memref<16x256xf32, #tpu.memory_space<vmem>>, vector<16x256xf32>
      %c0_20 = arith.constant 0 : index
      %c0_21 = arith.constant 0 : index
      %32 = vector.load %arg11[%c0_20, %c0_21] : memref<16x256xf32, #tpu.memory_space<vmem>>, vector<16x256xf32>
      %33 = vector.broadcast %30 : vector<1x256xf32> to vector<16x256xf32>
      %34 = arith.mulf %32, %33 : vector<16x256xf32>
      %35 = arith.addf %31, %34 : vector<16x256xf32>
      %c0_22 = arith.constant 0 : index
      %c0_23 = arith.constant 0 : index
      %36 = vector.load %arg3[%c0_22, %c0_23] : memref<24x256xf32, #tpu.memory_space<vmem>>, vector<24x256xf32>
      %c0_24 = arith.constant 0 : index
      %c0_25 = arith.constant 0 : index
      %37 = vector.load %arg12[%c0_24, %c0_25] : memref<24x256xf32, #tpu.memory_space<vmem>>, vector<24x256xf32>
      %38 = vector.broadcast %30 : vector<1x256xf32> to vector<24x256xf32>
      %39 = arith.mulf %37, %38 : vector<24x256xf32>
      %40 = arith.addf %36, %39 : vector<24x256xf32>
      %c0_26 = arith.constant 0 : index
      %c0_27 = arith.constant 0 : index
      %41 = vector.load %arg8[%c0_26, %c0_27] : memref<488x128xf32, #tpu.memory_space<vmem>>, vector<16x1xf32>
      %c16 = arith.constant 16 : index
      %c0_28 = arith.constant 0 : index
      %42 = vector.load %arg8[%c16, %c0_28] : memref<488x128xf32, #tpu.memory_space<vmem>>, vector<16x1xf32>
      %cst_29 = arith.constant dense<0.000000e+00> : vector<256xf32>
      %43 = vector.multi_reduction <add>, %35, %cst_29 [0] : vector<16x256xf32> to vector<256xf32>
      %44 = vector.shape_cast %43 : vector<256xf32> to vector<1x256xf32>
      %cst_30 = arith.constant 1.600000e+01 : f32
      %45 = vector.broadcast %cst_30 : f32 to vector<1x256xf32>
      %46 = arith.divf %44, %45 : vector<1x256xf32>
      %47 = vector.broadcast %46 : vector<1x256xf32> to vector<16x256xf32>
      %48 = arith.subf %35, %47 : vector<16x256xf32>
      %49 = arith.mulf %48, %48 : vector<16x256xf32>
      %cst_31 = arith.constant dense<0.000000e+00> : vector<256xf32>
      %50 = vector.multi_reduction <add>, %49, %cst_31 [0] : vector<16x256xf32> to vector<256xf32>
      %51 = vector.shape_cast %50 : vector<256xf32> to vector<1x256xf32>
      %cst_32 = arith.constant 1.600000e+01 : f32
      %52 = vector.broadcast %cst_32 : f32 to vector<1x256xf32>
      %53 = arith.divf %51, %52 : vector<1x256xf32>
      %cst_33 = arith.constant 9.99999974E-6 : f32
      %54 = vector.broadcast %cst_33 : f32 to vector<1x256xf32>
      %55 = arith.addf %53, %54 : vector<1x256xf32>
      %56 = math.rsqrt %55 : vector<1x256xf32>
      %57 = vector.broadcast %56 : vector<1x256xf32> to vector<16x256xf32>
      %58 = arith.mulf %48, %57 : vector<16x256xf32>
      %59 = vector.broadcast %41 : vector<16x1xf32> to vector<16x256xf32>
      %60 = arith.mulf %58, %59 : vector<16x256xf32>
      %61 = vector.broadcast %42 : vector<16x1xf32> to vector<16x256xf32>
      %62 = arith.addf %60, %61 : vector<16x256xf32>
      %63 = vector.extract_strided_slice %40 {offsets = [0, 0], sizes = [8, 256], strides = [1, 1]} : vector<24x256xf32> to vector<8x256xf32>
      %64 = vector.extract_strided_slice %40 {offsets = [8, 0], sizes = [8, 256], strides = [1, 1]} : vector<24x256xf32> to vector<8x256xf32>
      %65 = vector.extract_strided_slice %40 {offsets = [16, 0], sizes = [8, 256], strides = [1, 1]} : vector<24x256xf32> to vector<8x256xf32>
      %66 = arith.mulf %63, %63 : vector<8x256xf32>
      %67 = arith.mulf %64, %64 : vector<8x256xf32>
      %68 = arith.addf %66, %67 : vector<8x256xf32>
      %69 = arith.mulf %65, %65 : vector<8x256xf32>
      %70 = arith.addf %68, %69 : vector<8x256xf32>
      %cst_34 = arith.constant 9.99999993E-9 : f32
      %71 = vector.broadcast %cst_34 : f32 to vector<8x256xf32>
      %72 = arith.maximumf %70, %71 : vector<8x256xf32>
      %cst_35 = arith.constant dense<0.000000e+00> : vector<256xf32>
      %73 = vector.multi_reduction <add>, %72, %cst_35 [0] : vector<8x256xf32> to vector<256xf32>
      %74 = vector.shape_cast %73 : vector<256xf32> to vector<1x256xf32>
      %cst_36 = arith.constant 8.000000e+00 : f32
      %75 = vector.broadcast %cst_36 : f32 to vector<1x256xf32>
      %76 = arith.divf %74, %75 : vector<1x256xf32>
      %77 = math.rsqrt %76 : vector<1x256xf32>
      %78 = vector.broadcast %77 : vector<1x256xf32> to vector<24x256xf32>
      %79 = arith.mulf %40, %78 : vector<24x256xf32>
      %c32 = arith.constant 32 : index
      %c0_37 = arith.constant 0 : index
      %80 = vector.load %arg8[%c32, %c0_37] : memref<488x128xf32, #tpu.memory_space<vmem>>, vector<48x24xf32>
      %81 = arith.truncf %80 : vector<48x24xf32> to vector<48x24xbf16>
      %82 = arith.truncf %79 : vector<24x256xf32> to vector<24x256xbf16>
      %cst_38 = arith.constant dense<0.000000e+00> : vector<48x256xf32>
      %83 = tpu.matmul %81, %82, %cst_38 {dimension_numbers = #tpu.dot_dimension_numbers<[1], [0], [0], [1], [0, 0, 1, 1], [], []>} : vector<48x24xbf16>, vector<24x256xbf16>, vector<48x256xf32> -> vector<48x256xf32>
      %84 = vector.extract_strided_slice %83 {offsets = [0, 0], sizes = [16, 256], strides = [1, 1]} : vector<48x256xf32> to vector<16x256xf32>
      %85 = vector.extract_strided_slice %83 {offsets = [16, 0], sizes = [16, 256], strides = [1, 1]} : vector<48x256xf32> to vector<16x256xf32>
      %86 = vector.extract_strided_slice %83 {offsets = [32, 0], sizes = [16, 256], strides = [1, 1]} : vector<48x256xf32> to vector<16x256xf32>
      %87 = arith.mulf %84, %84 : vector<16x256xf32>
      %88 = arith.mulf %85, %85 : vector<16x256xf32>
      %89 = arith.addf %87, %88 : vector<16x256xf32>
      %90 = arith.mulf %86, %86 : vector<16x256xf32>
      %91 = arith.addf %89, %90 : vector<16x256xf32>
      %92 = math.sqrt %91 : vector<16x256xf32>
      %cst_39 = arith.constant 9.99999993E-9 : f32
      %93 = vector.broadcast %cst_39 : f32 to vector<16x256xf32>
      %94 = arith.addf %92, %93 : vector<16x256xf32>
      %c80 = arith.constant 80 : index
      %c0_40 = arith.constant 0 : index
      %95 = vector.load %arg8[%c80, %c0_40] : memref<488x128xf32, #tpu.memory_space<vmem>>, vector<64x16xf32>
      %96 = arith.truncf %95 : vector<64x16xf32> to vector<64x16xbf16>
      %97 = arith.truncf %62 : vector<16x256xf32> to vector<16x256xbf16>
      %cst_41 = arith.constant dense<0.000000e+00> : vector<64x256xf32>
      %98 = tpu.matmul %96, %97, %cst_41 {dimension_numbers = #tpu.dot_dimension_numbers<[1], [0], [0], [1], [0, 0, 1, 1], [], []>} : vector<64x16xbf16>, vector<16x256xbf16>, vector<64x256xf32> -> vector<64x256xf32>
      %c144 = arith.constant 144 : index
      %c0_42 = arith.constant 0 : index
      %99 = vector.load %arg8[%c144, %c0_42] : memref<488x128xf32, #tpu.memory_space<vmem>>, vector<64x16xf32>
      %100 = arith.truncf %99 : vector<64x16xf32> to vector<64x16xbf16>
      %101 = arith.truncf %94 : vector<16x256xf32> to vector<16x256xbf16>
      %cst_43 = arith.constant dense<0.000000e+00> : vector<64x256xf32>
      %102 = tpu.matmul %100, %101, %cst_43 {dimension_numbers = #tpu.dot_dimension_numbers<[1], [0], [0], [1], [0, 0, 1, 1], [], []>} : vector<64x16xbf16>, vector<16x256xbf16>, vector<64x256xf32> -> vector<64x256xf32>
      %103 = arith.addf %98, %102 : vector<64x256xf32>
      %c208 = arith.constant 208 : index
      %c0_44 = arith.constant 0 : index
      %104 = vector.load %arg8[%c208, %c0_44] : memref<488x128xf32, #tpu.memory_space<vmem>>, vector<64x1xf32>
      %105 = vector.broadcast %104 : vector<64x1xf32> to vector<64x256xf32>
      %106 = arith.addf %103, %105 : vector<64x256xf32>
      %c272 = arith.constant 272 : index
      %c0_45 = arith.constant 0 : index
      %107 = vector.load %arg8[%c272, %c0_45] : memref<488x128xf32, #tpu.memory_space<vmem>>, vector<48x48xf32>
      %108 = arith.truncf %107 : vector<48x48xf32> to vector<48x48xbf16>
      %109 = arith.truncf %83 : vector<48x256xf32> to vector<48x256xbf16>
      %cst_46 = arith.constant dense<0.000000e+00> : vector<48x256xf32>
      %110 = tpu.matmul %108, %109, %cst_46 {dimension_numbers = #tpu.dot_dimension_numbers<[1], [0], [0], [1], [0, 0, 1, 1], [], []>} : vector<48x48xbf16>, vector<48x256xbf16>, vector<48x256xf32> -> vector<48x256xf32>
      %111 = arith.negf %106 : vector<64x256xf32>
      %112 = math.exp %111 : vector<64x256xf32>
      %cst_47 = arith.constant 1.000000e+00 : f32
      %113 = vector.broadcast %cst_47 : f32 to vector<64x256xf32>
      %114 = arith.addf %113, %112 : vector<64x256xf32>
      %115 = arith.divf %113, %114 : vector<64x256xf32>
      %c320 = arith.constant 320 : index
      %c0_48 = arith.constant 0 : index
      %116 = vector.load %arg8[%c320, %c0_48] : memref<488x128xf32, #tpu.memory_space<vmem>>, vector<16x64xf32>
      %117 = arith.truncf %116 : vector<16x64xf32> to vector<16x64xbf16>
      %118 = arith.truncf %115 : vector<64x256xf32> to vector<64x256xbf16>
      %cst_49 = arith.constant dense<0.000000e+00> : vector<16x256xf32>
      %119 = tpu.matmul %117, %118, %cst_49 {dimension_numbers = #tpu.dot_dimension_numbers<[1], [0], [0], [1], [0, 0, 1, 1], [], []>} : vector<16x64xbf16>, vector<64x256xbf16>, vector<16x256xf32> -> vector<16x256xf32>
      %c336 = arith.constant 336 : index
      %c0_50 = arith.constant 0 : index
      %120 = vector.load %arg8[%c336, %c0_50] : memref<488x128xf32, #tpu.memory_space<vmem>>, vector<16x1xf32>
      %121 = vector.broadcast %120 : vector<16x1xf32> to vector<16x256xf32>
      %122 = arith.addf %119, %121 : vector<16x256xf32>
      %123 = arith.negf %122 : vector<16x256xf32>
      %124 = math.exp %123 : vector<16x256xf32>
      %cst_51 = arith.constant 1.000000e+00 : f32
      %125 = vector.broadcast %cst_51 : f32 to vector<16x256xf32>
      %126 = arith.addf %125, %124 : vector<16x256xf32>
      %127 = arith.divf %125, %126 : vector<16x256xf32>
      %128 = tpu.concatenate %127, %127, %127 in 0 : vector<16x256xf32>, vector<16x256xf32>, vector<16x256xf32> -> vector<48x256xf32>
      %129 = arith.mulf %110, %128 : vector<48x256xf32>
      %cst_52 = arith.constant 0.000000e+00 : f32
      %130 = vector.broadcast %cst_52 : f32 to vector<64x256xf32>
      %131 = arith.maximumf %106, %130 : vector<64x256xf32>
      %c352 = arith.constant 352 : index
      %c0_53 = arith.constant 0 : index
      %132 = vector.load %arg8[%c352, %c0_53] : memref<488x128xf32, #tpu.memory_space<vmem>>, vector<48x48xf32>
      %133 = arith.truncf %132 : vector<48x48xf32> to vector<48x48xbf16>
      %134 = arith.truncf %129 : vector<48x256xf32> to vector<48x256xbf16>
      %cst_54 = arith.constant dense<0.000000e+00> : vector<48x256xf32>
      %135 = tpu.matmul %133, %134, %cst_54 {dimension_numbers = #tpu.dot_dimension_numbers<[1], [0], [0], [1], [0, 0, 1, 1], [], []>} : vector<48x48xbf16>, vector<48x256xbf16>, vector<48x256xf32> -> vector<48x256xf32>
      %136 = vector.extract_strided_slice %135 {offsets = [0, 0], sizes = [16, 256], strides = [1, 1]} : vector<48x256xf32> to vector<16x256xf32>
      %137 = vector.extract_strided_slice %135 {offsets = [16, 0], sizes = [16, 256], strides = [1, 1]} : vector<48x256xf32> to vector<16x256xf32>
      %138 = vector.extract_strided_slice %135 {offsets = [32, 0], sizes = [16, 256], strides = [1, 1]} : vector<48x256xf32> to vector<16x256xf32>
      %139 = arith.mulf %136, %136 : vector<16x256xf32>
      %140 = arith.mulf %137, %137 : vector<16x256xf32>
      %141 = arith.addf %139, %140 : vector<16x256xf32>
      %142 = arith.mulf %138, %138 : vector<16x256xf32>
      %143 = arith.addf %141, %142 : vector<16x256xf32>
      %144 = math.sqrt %143 : vector<16x256xf32>
      %cst_55 = arith.constant 9.99999993E-9 : f32
      %145 = vector.broadcast %cst_55 : f32 to vector<16x256xf32>
      %146 = arith.addf %144, %145 : vector<16x256xf32>
      %c400 = arith.constant 400 : index
      %c0_56 = arith.constant 0 : index
      %147 = vector.load %arg8[%c400, %c0_56] : memref<488x128xf32, #tpu.memory_space<vmem>>, vector<16x64xf32>
      %148 = arith.truncf %147 : vector<16x64xf32> to vector<16x64xbf16>
      %149 = arith.truncf %131 : vector<64x256xf32> to vector<64x256xbf16>
      %cst_57 = arith.constant dense<0.000000e+00> : vector<16x256xf32>
      %150 = tpu.matmul %148, %149, %cst_57 {dimension_numbers = #tpu.dot_dimension_numbers<[1], [0], [0], [1], [0, 0, 1, 1], [], []>} : vector<16x64xbf16>, vector<64x256xbf16>, vector<16x256xf32> -> vector<16x256xf32>
      %c416 = arith.constant 416 : index
      %c0_58 = arith.constant 0 : index
      %151 = vector.load %arg8[%c416, %c0_58] : memref<488x128xf32, #tpu.memory_space<vmem>>, vector<16x16xf32>
      %152 = arith.truncf %151 : vector<16x16xf32> to vector<16x16xbf16>
      %153 = arith.truncf %146 : vector<16x256xf32> to vector<16x256xbf16>
      %cst_59 = arith.constant dense<0.000000e+00> : vector<16x256xf32>
      %154 = tpu.matmul %152, %153, %cst_59 {dimension_numbers = #tpu.dot_dimension_numbers<[1], [0], [0], [1], [0, 0, 1, 1], [], []>} : vector<16x16xbf16>, vector<16x256xbf16>, vector<16x256xf32> -> vector<16x256xf32>
      %155 = arith.addf %150, %154 : vector<16x256xf32>
      %c432 = arith.constant 432 : index
      %c0_60 = arith.constant 0 : index
      %156 = vector.load %arg8[%c432, %c0_60] : memref<488x128xf32, #tpu.memory_space<vmem>>, vector<16x1xf32>
      %157 = vector.broadcast %156 : vector<16x1xf32> to vector<16x256xf32>
      %158 = arith.addf %155, %157 : vector<16x256xf32>
      %c448 = arith.constant 448 : index
      %c0_61 = arith.constant 0 : index
      %159 = vector.load %arg8[%c448, %c0_61] : memref<488x128xf32, #tpu.memory_space<vmem>>, vector<24x48xf32>
      %160 = arith.truncf %159 : vector<24x48xf32> to vector<24x48xbf16>
      %161 = arith.truncf %135 : vector<48x256xf32> to vector<48x256xbf16>
      %cst_62 = arith.constant dense<0.000000e+00> : vector<24x256xf32>
      %162 = tpu.matmul %160, %161, %cst_62 {dimension_numbers = #tpu.dot_dimension_numbers<[1], [0], [0], [1], [0, 0, 1, 1], [], []>} : vector<24x48xbf16>, vector<48x256xbf16>, vector<24x256xf32> -> vector<24x256xf32>
      %c472 = arith.constant 472 : index
      %c0_63 = arith.constant 0 : index
      %163 = vector.load %arg8[%c472, %c0_63] : memref<488x128xf32, #tpu.memory_space<vmem>>, vector<8x16xf32>
      %164 = arith.truncf %163 : vector<8x16xf32> to vector<8x16xbf16>
      %165 = arith.truncf %158 : vector<16x256xf32> to vector<16x256xbf16>
      %cst_64 = arith.constant dense<0.000000e+00> : vector<8x256xf32>
      %166 = tpu.matmul %164, %165, %cst_64 {dimension_numbers = #tpu.dot_dimension_numbers<[1], [0], [0], [1], [0, 0, 1, 1], [], []>} : vector<8x16xbf16>, vector<16x256xbf16>, vector<8x256xf32> -> vector<8x256xf32>
      %c480 = arith.constant 480 : index
      %c0_65 = arith.constant 0 : index
      %167 = vector.load %arg8[%c480, %c0_65] : memref<488x128xf32, #tpu.memory_space<vmem>>, vector<8x1xf32>
      %168 = vector.broadcast %167 : vector<8x1xf32> to vector<8x256xf32>
      %169 = arith.addf %166, %168 : vector<8x256xf32>
      %170 = arith.negf %169 : vector<8x256xf32>
      %171 = math.exp %170 : vector<8x256xf32>
      %cst_66 = arith.constant 1.000000e+00 : f32
      %172 = vector.broadcast %cst_66 : f32 to vector<8x256xf32>
      %173 = arith.addf %172, %171 : vector<8x256xf32>
      %174 = arith.divf %172, %173 : vector<8x256xf32>
      %175 = tpu.concatenate %174, %174, %174 in 0 : vector<8x256xf32>, vector<8x256xf32>, vector<8x256xf32> -> vector<24x256xf32>
      %176 = arith.mulf %162, %175 : vector<24x256xf32>
      %177 = arith.addf %62, %158 : vector<16x256xf32>
      %c0_67 = arith.constant 0 : index
      %c0_68 = arith.constant 0 : index
      %178 = vector.load %arg9[%c0_67, %c0_68] : memref<16x256xf32, #tpu.memory_space<vmem>>, vector<16x256xf32>
      tpu.vector_store %arg9[%c0_67, %c0_68], %177 {strides = array<i32>} : memref<16x256xf32, #tpu.memory_space<vmem>>, vector<16x256xf32>,
      %179 = arith.addf %79, %176 : vector<24x256xf32>
      %c0_69 = arith.constant 0 : index
      %c0_70 = arith.constant 0 : index
      %180 = vector.load %arg10[%c0_69, %c0_70] : memref<24x256xf32, #tpu.memory_space<vmem>>, vector<24x256xf32>
      tpu.vector_store %arg10[%c0_69, %c0_70], %179 {strides = array<i32>} : memref<24x256xf32, #tpu.memory_space<vmem>>, vector<24x256xf32>,
    } else {
    }
    return
  }
  func.func @transform_0(%arg0: i32, %arg1: i32) -> (i32, i32) {
    %c0_i32 = arith.constant 0 : i32
    %c0_i32_0 = arith.constant 0 : i32
    return %c0_i32, %arg0 : i32, i32
  }
  func.func @transform_1(%arg0: i32, %arg1: i32) -> (i32, i32) {
    %c0_i32 = arith.constant 0 : i32
    %c0_i32_0 = arith.constant 0 : i32
    return %c0_i32, %arg0 : i32, i32
  }
  func.func @transform_2(%arg0: i32, %arg1: i32) -> (i32, i32) {
    %c0_i32 = arith.constant 0 : i32
    %c0_i32_0 = arith.constant 0 : i32
    return %c0_i32, %arg1 : i32, i32
  }
  func.func @transform_3(%arg0: i32, %arg1: i32) -> (i32, i32) {
    %c0_i32 = arith.constant 0 : i32
    %c0_i32_0 = arith.constant 0 : i32
    return %c0_i32, %arg1 : i32, i32
  }
  func.func @transform_4(%arg0: i32, %arg1: i32) -> (i32, i32) {
    %c0_i32 = arith.constant 0 : i32
    %c0_i32_0 = arith.constant 0 : i32
    return %arg1, %c0_i32 : i32, i32
  }
  func.func @transform_5(%arg0: i32, %arg1: i32) -> (i32, i32) {
    %c0_i32 = arith.constant 0 : i32
    %c0_i32_0 = arith.constant 0 : i32
    return %c0_i32, %arg0 : i32, i32
  }
  func.func @transform_6(%arg0: i32, %arg1: i32) -> (i32, i32) {
    %c0_i32 = arith.constant 0 : i32
    %c0_i32_0 = arith.constant 0 : i32
    %c0_i32_1 = arith.constant 0 : i32
    return %c0_i32, %c0_i32_0 : i32, i32
  }
  func.func @transform_7(%arg0: i32, %arg1: i32) -> (i32, i32) {
    %c0_i32 = arith.constant 0 : i32
    %c0_i32_0 = arith.constant 0 : i32
    return %c0_i32, %arg0 : i32, i32
  }
  func.func @transform_8(%arg0: i32, %arg1: i32) -> (i32, i32) {
    %c0_i32 = arith.constant 0 : i32
    %c0_i32_0 = arith.constant 0 : i32
    return %c0_i32, %arg0 : i32, i32
  }
}

</mosaic_0001>

<bundles_post_ra>
// kernel: gbp_atomwise_interaction.3
= control target key start
LH: loop header
LB: loop body
LE: loop exit
PB: predicated region body
PF: predicated region fallthrough
CT: control target
= control target key end

     0   :  { %v228_v0 = vmov 0   ;;  %v229_v5 = vmov 16.0   ;;  %s383_s3 = inlined_call_operand.vmem [shape: f32[16,1], index: 3, kind: input, shape index: {}]   ;;  %s384_s2 = inlined_call_operand.vmem [shape: f32[16,1], index: 2, kind: input, shape index: {}]   ;;  %s385_s0 = inlined_call_operand.vmem [shape: f32[16,256], index: 0, kind: input, shape index: {}]   ;;  %s386_s1 = inlined_call_operand.vmem [shape: f32[24,256], index: 1, kind: input, shape index: {}]   ;;  %s387_s5 = inlined_call_operand.vmem [shape: f32[24,256], index: 5, kind: output, shape index: {1}]   ;;  %s388_s4 = inlined_call_operand.vmem [shape: f32[16,256], index: 4, kind: output, shape index: {0}]  }
   0x1   :  { %215 = vset.pattern.permute.xlu1 %v228_v0  ;;  %214 = vset.pattern.permute.xlu0 %v228_v0  ;;  %v31_v1 = vld [vmem:[%s383_s3] sm:$0xff]  ;;  %v32_v3 = vld [vmem:[%s383_s3 + $0x8] sm:$0xff]  ;;  %216 = vrcp.f32 %v229_v5  ;;  %v21_v8 = vld [vmem:[%s385_s0 + $0x10] sm:$0xff]  ;;  %v230_v0 = vmov 8.0  }
   0x2   :  { %v29_v2 = vld [vmem:[%s384_s2] sm:$0xff]  ;;  %122 = vperm.xlu1 %215, %v31_v1   ;;  %v30_v4 = vld [vmem:[%s384_s2 + $0x8] sm:$0xff]  ;;  %v22_v9 = vld [vmem:[%s385_s0 + $0x18] sm:$0xff]  ;;  %218 = vrcp.f32 %v230_v0 }
   0x3   :  { %108 = vperm.xlu0 %214, %v29_v2   ;;  %v19_v6 = vld [vmem:[%s385_s0] sm:$0xff]  ;;  %v20_v7 = vld [vmem:[%s385_s0 + $0x8] sm:$0xff]  ;;  %v314_v48 = vld [vmem:[%s386_s1 + $0x10] sm:$0xff] }
   0x4   :  { %v33_v10 = vadd.f32 %v21_v8, %v19_v6  ;;  %v40_v11 = vadd.f32 %v22_v9, %v20_v7  ;;  %v304_v46 = vld [vmem:[%s386_s1] sm:$0xff]  ;;  %v309_v47 = vld [vmem:[%s386_s1 + $0x8] sm:$0xff]  ;;  %v319_v50 = vld [vmem:[%s386_s1 + $0x18] sm:$0xff]  ;;  %v136_v53 = vmul.f32 %v314_v48, %v314_v48 }
   0x5   :  { %v134_v51 = vmul.f32 %v304_v46, %v304_v46  ;;  %v135_v52 = vmul.f32 %v309_v47, %v309_v47  ;;  %v330_v55 = vld [vmem:[%s386_s1 + $0x20] sm:$0xff]  ;;  %v335_v56 = vld [vmem:[%s386_s1 + $0x28] sm:$0xff]  ;;  %v137_v57 = vmul.f32 %v319_v50, %v319_v50 }
   0x6   :  { %v34_v12 = vrot.slane %v33_v10, 4  ;;  %v41_v13 = vrot.slane %v40_v11, 4  ;;  %v140_v59 = vmul.f32 %v330_v55, %v330_v55  ;;  %v141_v60 = vmul.f32 %v335_v56, %v335_v56 }
   0x7   :  { %v217_v14 = vpop.eup %216  ;;  %v138_v58 = vadd.f32 %v136_v53, %v134_v51  ;;  %v139_v61 = vadd.f32 %v137_v57, %v135_v52 }
   0x8   :  { %v35_v15 = vadd.f32 %v34_v12, %v33_v10  ;;  %v48_v16 = vmul.f32 16.0, %v217_v14  ;;  %v42_v17 = vadd.f32 %v41_v13, %v40_v11  ;;  %vm52_vm0 = vweird.f32 %v217_v14 }
   0x9   :  { %v142_v63 = vadd.f32 %v140_v59, %v138_v58  ;;  %v143_v2 = vadd.f32 %v141_v60, %v139_v61 }
   0xa   :  { %127 = vperm.xlu1 %215, %v32_v3   ;;  %v36_v18 = vrot.slane %v35_v15, 2  ;;  %v49_v19 = vsub.f32 1.0, %v48_v16  ;;  %v43_v20 = vrot.slane %v42_v17, 2 }
   0xb   :  { %113 = vperm.xlu0 %214, %v30_v4   ;;  %v144_v3 = vmax.f32 %v142_v63, 1e-08  ;;  %v145_v4 = vmax.f32 %v143_v2, 1e-08 }
   0xc   :  { %v37_v21 = vadd.f32 %v36_v18, %v35_v15  ;;  %v50_v22 = vmul.f32 %v217_v14, %v49_v19  ;;  %v44_v23 = vadd.f32 %v43_v20, %v42_v17 }
   0xe   :  { %v38_v24 = vrot.slane %v37_v21, 1  ;;  %v51_v25 = vadd.f32 %v217_v14, %v50_v22  ;;  %v45_v26 = vrot.slane %v44_v23, 1 }
  0x10   :  { %v39_v27 = vadd.f32 %v38_v24, %v37_v21  ;;  %v53_v28 = vsel %vm52_vm0, %v217_v14, %v51_v25  ;;  %v46_v29 = vadd.f32 %v45_v26, %v44_v23 }
  0x12   :  { %v54_v30 = vmul.f32 %v53_v28, %v39_v27  ;;  %v55_v31 = vmul.f32 %v53_v28, %v46_v29 }
  0x14   :  { %v285_v32 = vsub.f32 %v19_v6, %v54_v30  ;;  %v287_v33 = vsub.f32 %v21_v8, %v54_v30  ;;  %v289_v34 = vsub.f32 %v20_v7, %v55_v31  ;;  %v291_v35 = vsub.f32 %v22_v9, %v55_v31  ;;  %v219_v9 = vpop.eup %218 }
  0x15   :  { %v146_v6 = vrot.slane %v144_v3, 4  ;;  %v152_v8 = vrot.slane %v145_v4, 4  ;;  %v159_v12 = vmul.f32 8.0, %v219_v9  ;;  %vm163_vm1 = vweird.f32 %v219_v9 }
  0x16   :  { %v60_v36 = vmul.f32 %v285_v32, %v285_v32  ;;  %v62_v37 = vmul.f32 %v287_v33, %v287_v33  ;;  %v61_v38 = vmul.f32 %v289_v34, %v289_v34  ;;  %v63_v39 = vmul.f32 %v291_v35, %v291_v35 }
  0x17   :  { %v147_v10 = vadd.f32 %v146_v6, %v144_v3  ;;  %v153_v11 = vadd.f32 %v152_v8, %v145_v4  ;;  %v160_v17 = vsub.f32 1.0, %v159_v12 }
  0x18   :  { %v64_v40 = vadd.f32 %v62_v37, %v60_v36  ;;  %v71_v41 = vadd.f32 %v63_v39, %v61_v38 }
  0x19   :  { %v148_v14 = vrot.slane %v147_v10, 2  ;;  %v154_v16 = vrot.slane %v153_v11, 2  ;;  %v161_v20 = vmul.f32 %v219_v9, %v160_v17 }
  0x1a   :  { %v65_v42 = vrot.slane %v64_v40, 4  ;;  %v72_v43 = vrot.slane %v71_v41, 4 }
  0x1b   :  { %v149_v18 = vadd.f32 %v148_v14, %v147_v10  ;;  %v155_v19 = vadd.f32 %v154_v16, %v153_v11  ;;  %v162_v25 = vadd.f32 %v219_v9, %v161_v20 }
  0x1c   :  { %v66_v44 = vadd.f32 %v65_v42, %v64_v40  ;;  %v73_v45 = vadd.f32 %v72_v43, %v71_v41 }
  0x1d   :  { %v150_v22 = vrot.slane %v149_v18, 1  ;;  %v156_v24 = vrot.slane %v155_v19, 1  ;;  %v164_v29 = vsel %vm163_vm1, %v219_v9, %v162_v25 }
  0x1e   :  { %v67_v49 = vrot.slane %v66_v44, 2  ;;  %v74_v54 = vrot.slane %v73_v45, 2 }
  0x1f   :  { %v151_v26 = vadd.f32 %v150_v22, %v149_v18  ;;  %v157_v27 = vadd.f32 %v156_v24, %v155_v19 }
  0x20   :  { %v68_v62 = vadd.f32 %v67_v49, %v66_v44  ;;  %v75_v1 = vadd.f32 %v74_v54, %v73_v45 }
  0x21   :  { %v165_v31 = vmul.f32 %v164_v29, %v151_v26  ;;  %v166_v37 = vmul.f32 %v164_v29, %v157_v27 }
  0x22   :  { %v69_v5 = vrot.slane %v68_v62, 1  ;;  %v76_v7 = vrot.slane %v75_v1, 1 }
  0x23   :  { %220 = vrsqrt.f32 %v165_v31  ;;  %vm173_vm2 = vweird.f32 %v165_v31  ;;  %vm183_vm4 = vweird.f32 %v166_v37 }
  0x24   :  { %v70_v13 = vadd.f32 %v69_v5, %v68_v62  ;;  %v77_v15 = vadd.f32 %v76_v7, %v75_v1  ;;  %222 = vrsqrt.f32 %v166_v37 }
  0x26   :  { %v78_v21 = vmul.f32 %v70_v13, %v53_v28  ;;  %v79_v23 = vmul.f32 %v77_v15, %v53_v28 }
  0x28   :  { %v80_v30 = vadd.f32 1e-05, %v78_v21  ;;  %v81_v36 = vadd.f32 1e-05, %v79_v23 }
  0x29   :  { %v221_v38 = vpop.eup %220 }
  0x2a   :  { %224 = vrsqrt.f32 %v80_v30  ;;  %v223_v39 = vpop.eup %222  ;;  %v168_v40 = vmul.f32 %v221_v38, %v165_v31  ;;  %vm174_vm3 = vweird.f32 %v221_v38  ;;  %vm88_vm8 = vweird.f32 %v80_v30 }
  0x2b   :  { %226 = vrsqrt.f32 %v81_v36  ;;  %v178_v42 = vmul.f32 %v223_v39, %v166_v37  ;;  %vm175_vm5 = vmor %vm173_vm2, %vm174_vm3  ;;  %vm184_vm6 = vweird.f32 %v223_v39  ;;  %vm98_vm10 = vweird.f32 %v81_v36 }
  0x2c   :  { %v169_v43 = vmul.f32 %v221_v38, %v168_v40  ;;  %vm185_vm7 = vmor %vm183_vm4, %vm184_vm6 }
  0x2d   :  { %v179_v44 = vmul.f32 %v223_v39, %v178_v42 }
  0x2e   :  { %v170_v45 = vmul.f32 0.5, %v169_v43 }
  0x2f   :  { %v180_v52 = vmul.f32 0.5, %v179_v44 }
  0x30   :  { %v225_v41 = vpop.eup %224  ;;  %v171_v53 = vsub.f32 1.5, %v170_v45 }
  0x31   :  { %v227_v28 = vpop.eup %226  ;;  %v83_v49 = vmul.f32 %v225_v41, %v80_v30  ;;  %v181_v54 = vsub.f32 1.5, %v180_v52  ;;  %vm89_vm9 = vweird.f32 %v225_v41 }
  0x32   :  { %v93_v51 = vmul.f32 %v227_v28, %v81_v36  ;;  %v172_v57 = vmul.f32 %v221_v38, %v171_v53  ;;  %vm99_vm11 = vweird.f32 %v227_v28  ;;  %vm90_vm12 = vmor %vm88_vm8, %vm89_vm9 }
  0x33   :  { %v84_v58 = vmul.f32 %v225_v41, %v83_v49  ;;  %v182_v60 = vmul.f32 %v223_v39, %v181_v54  ;;  %vm100_vm13 = vmor %vm98_vm10, %vm99_vm11 }
  0x34   :  { %v94_v59 = vmul.f32 %v227_v28, %v93_v51  ;;  %v176_v61 = vsel %vm175_vm5, %v221_v38, %v172_v57 }
  0x35   :  { %v186_v62 = vsel %vm185_vm7, %v223_v39, %v182_v60  ;;  %v187_v63 = vmul.f32 %v176_v61, %v304_v46  ;;  %v189_v0 = vmul.f32 %v176_v61, %v314_v48  ;;  %v85_v3 = vmul.f32 0.5, %v84_v58 }
  0x36   :  { %v188_v1 = vmul.f32 %v186_v62, %v309_v47  ;;  %v190_v2 = vmul.f32 %v186_v62, %v319_v50  ;;  %v95_v4 = vmul.f32 0.5, %v94_v59  ;;  %v191_v5 = vmul.f32 %v176_v61, %v330_v55 }
  0x37   :  { %197 = vst [vmem:[%s387_s5] sm:$0xff] %v187_v63  ;;  %v192_v6 = vmul.f32 %v186_v62, %v335_v56  ;;  %v86_v46 = vsub.f32 1.5, %v85_v3 }
  0x38   :  { %198 = vst [vmem:[%s387_s5 + $0x8] sm:$0xff] %v188_v1  ;;  %v96_v47 = vsub.f32 1.5, %v95_v4 }
  0x39   :  { %199 = vst [vmem:[%s387_s5 + $0x10] sm:$0xff] %v189_v0  ;;  %v87_v48 = vmul.f32 %v225_v41, %v86_v46 }
  0x3a   :  { %200 = vst [vmem:[%s387_s5 + $0x18] sm:$0xff] %v190_v2  ;;  %v97_v50 = vmul.f32 %v227_v28, %v96_v47 }
  0x3b   :  { %201 = vst [vmem:[%s387_s5 + $0x20] sm:$0xff] %v191_v5  ;;  %v91_v55 = vsel %vm90_vm12, %v225_v41, %v87_v48 }
  0x3c   :  { %202 = vst [vmem:[%s387_s5 + $0x28] sm:$0xff] %v192_v6  ;;  %v101_v56 = vsel %vm100_vm13, %v227_v28, %v97_v50  ;;  %v102_v7 = vmul.f32 %v91_v55, %v285_v32  ;;  %v104_v15 = vmul.f32 %v91_v55, %v287_v33 }
  0x3d   :  { %v103_v8 = vmul.f32 %v101_v56, %v289_v34  ;;  %v105_v16 = vmul.f32 %v101_v56, %v291_v35 }
  0x74   :  { %v123_v9 = vpop.permute.xlu1 %122 }
  0x75   :  { %v109_v10 = vpop.permute.xlu0 %108 }
  0x76   :  { %v116_v11 = vmul.f32 %v109_v10, %v102_v7  ;;  %v117_v12 = vmul.f32 %v109_v10, %v103_v8 }
  0x78   :  { %v130_v13 = vadd.f32 %v123_v9, %v116_v11  ;;  %v131_v14 = vadd.f32 %v123_v9, %v117_v12 }
  0x7a   :  { %193 = vst [vmem:[%s388_s4] sm:$0xff] %v130_v13 }
  0x7b   :  { %194 = vst [vmem:[%s388_s4 + $0x8] sm:$0xff] %v131_v14 }
  0x7c   :  { %v128_v18 = vpop.permute.xlu1 %127 }
  0x7d   :  { %v114_v32 = vpop.permute.xlu0 %113 }
  0x7e   :  { %v118_v34 = vmul.f32 %v114_v32, %v104_v15  ;;  %v119_v17 = vmul.f32 %v114_v32, %v105_v16 }
  0x80   :  { %v132_v19 = vadd.f32 %v128_v18, %v118_v34  ;;  %v133_v20 = vadd.f32 %v128_v18, %v119_v17 }
  0x82   :  { %195 = vst [vmem:[%s388_s4 + $0x10] sm:$0xff] %v132_v19 }
  0x83   :  { %196 = vst [vmem:[%s388_s4 + $0x18] sm:$0xff] %v133_v20 }

// kernel: gbp_atomwise_interaction.4
= control target key start
LH: loop header
LB: loop body
LE: loop exit
PB: predicated region body
PF: predicated region fallthrough
CT: control target
= control target key end

     0   :  { %s1598_s15 = smov 0   ;;  %s1600_s16 = smov 0   ;;  %s2086_s0 = inlined_call_operand.vmem [shape: f32[40,768], index: 0, kind: input, shape index: {}]   ;;  %s2087_s1 = inlined_call_operand.vmem [shape: f32[60,768], index: 1, kind: input, shape index: {}]   ;;  %s2088_s2 = inlined_call_operand.vmem [shape: f32[272,128], index: 2, kind: input, shape index: {}]   ;;  %s2089_s3 = inlined_call_operand.vmem [shape: f32[16,768], index: 3, kind: output, shape index: {0}]   ;;  %s2090_s4 = inlined_call_operand.vmem [shape: f32[24,768], index: 4, kind: output, shape index: {1}]  }
   0x1   :  { %s1602_s17 = smov 0  }
   0x2 LB: > { %s1614_s18 = sadd.s32 4294967295, %s1570_s17   ;;  %s1617_s19 = sadd.s32 1, %s1570_s17   ;;  %s1570_s17 = sphi %s1602_s17, %s2099_s17   ;;  %s1566_s16 = sphi %s1600_s16, %s2098_s16   ;;  %s1562_s15 = sphi %s1598_s15, %s2097_s15  }
   0x3   : > { %s19_s20 = ssub.s32 %s1570_s17, %s1617_s19  ;;  %s22_s21 = sadd.s32 1, %s1566_s16 }
   0x4   : > { %p20_p0 = scmp.eq.s32.totalorder %s19_s20, 0  ;;  %p29_p1 = scmp.ne.s32.totalorder %s1566_s16, %s1562_s15 }
   0x5   : > { %p30_p2 = scmp.eq.s32.totalorder %s1570_s17, 0  ;;  %p106_p3 = scmp.eq.s32.totalorder %s1614_s18, 2 }
   0x6   : > { %s1627_s22 = scalar_select %p20_p0, %s1566_s16, %s22_s21  }
   0x7   : > { %p1629_p4 = por %p30_p2, %p29_p1  ;;  %p1633_p5 = por %p106_p3, %p29_p1 }
   0x8   : > { %p1407_p6 = scmp.ge.s32.totalorder %s1570_s17, 3 }
   0xa   : > { %157 = sbr.rel (%p1407_p6) target bundleno = 49 (0x31), region = 20 }
   0xf   : > { %160 = sbr.rel (!%p1629_p4) target bundleno = 29 (0x1d), region = 24  ;;  %s162_s25 = sand.u32 (%p1629_p4), 1, %s1566_s16  }
  0x10   : > { %s1465_s26 = sshll.u32 (%p1629_p4), %s1570_s17, 4  ;;  %s1469_s27 = smul.u32 (%p1629_p4), 80, %s162_s25 }
  0x11   : > { %s167_s30 = scalar_lea.vmem (%p1629_p4), %s2086_s0, %s1465_s26 }
  0x12   : > { %v180_v0 = vld [vmem:[%s167_s30] sm:$0xff] (%p1629_p4)  ;;  %v182_v1 = vld [vmem:[%s167_s30 + $0x8] sm:$0xff] (%p1629_p4)  ;;  %v184_v2 = vld [vmem:[%s167_s30 + $0x30] sm:$0xff] (%p1629_p4)  ;;  %s164_s5 = scalar_lea.vmem (%p1629_p4), [#allocation2], %s1469_s27 }
  0x13   : > { %181 = vst [vmem:[%s164_s5] sm:$0xff] (%p1629_p4), %v180_v0  ;;  %v186_v3 = vld [vmem:[%s167_s30 + $0x38] sm:$0xff] (%p1629_p4)  ;;  %v188_v4 = vld [vmem:[%s167_s30 + $0x60] sm:$0xff] (%p1629_p4)  ;;  %v190_v5 = vld [vmem:[%s167_s30 + $0x68] sm:$0xff] (%p1629_p4) }
  0x14   : > { %183 = vst [vmem:[%s164_s5 + $0x8] sm:$0xff] %v182_v1  ;;  %v192_v6 = vld [vmem:[%s167_s30 + $0x90] sm:$0xff]  ;;  %v194_v7 = vld [vmem:[%s167_s30 + $0x98] sm:$0xff]  ;;  %v196_v8 = vld [vmem:[%s167_s30 + $0xc0] sm:$0xff] }
  0x15   : > { %185 = vst [vmem:[%s164_s5 + $0x10] sm:$0xff] %v184_v2  ;;  %v198_v9 = vld [vmem:[%s167_s30 + $0xc8] sm:$0xff] }
  0x16   : > { %187 = vst [vmem:[%s164_s5 + $0x18] sm:$0xff] %v186_v3 }
  0x17   : > { %189 = vst [vmem:[%s164_s5 + $0x20] sm:$0xff] %v188_v4 }
  0x18   : > { %191 = vst [vmem:[%s164_s5 + $0x28] sm:$0xff] %v190_v5 }
  0x19   : > { %193 = vst [vmem:[%s164_s5 + $0x30] sm:$0xff] %v192_v6 }
  0x1a   : > { %195 = vst [vmem:[%s164_s5 + $0x38] sm:$0xff] %v194_v7 }
  0x1b   : > { %197 = vst [vmem:[%s164_s5 + $0x40] sm:$0xff] %v196_v8 }
  0x1c   : > { %199 = vst [vmem:[%s164_s5 + $0x48] sm:$0xff] %v198_v9 }
  0x1d PF: > { %205 = sbr.rel (!%p1629_p4) target bundleno = 49 (0x31), region = 47  ;;  %s207_s6 = sand.u32 (%p1629_p4), 1, %s1566_s16  }
  0x1e   : > { %s1466_s7 = sshll.u32 (%p1629_p4), %s1570_s17, 4  ;;  %s1410_s8 = sshll.u32 (%p1629_p4), %s207_s6, 7 }
  0x1f   : > { %s1652_s11 = scalar_lea.vmem (%p1629_p4), %s2087_s1, %s1466_s7  ;;  %s209_s12 = scalar_lea.vmem (%p1629_p4), [#allocation3], %s1410_s8 }
  0x20   : > { %v225_v10 = vld [vmem:[%s1652_s11] sm:$0xff] (%p1629_p4)  ;;  %v227_v11 = vld [vmem:[%s1652_s11 + $0x8] sm:$0xff] (%p1629_p4)  ;;  %v229_v12 = vld [vmem:[%s1652_s11 + $0x30] sm:$0xff] (%p1629_p4) }
  0x21   : > { %226 = vst [vmem:[%s209_s12] sm:$0xff] (%p1629_p4), %v225_v10  ;;  %v231_v13 = vld [vmem:[%s1652_s11 + $0x38] sm:$0xff] (%p1629_p4)  ;;  %v233_v14 = vld [vmem:[%s1652_s11 + $0x60] sm:$0xff] (%p1629_p4)  ;;  %v235_v15 = vld [vmem:[%s1652_s11 + $0x68] sm:$0xff] (%p1629_p4) }
  0x22   : > { %228 = vst [vmem:[%s209_s12 + $0x8] sm:$0xff] %v227_v11  ;;  %v237_v16 = vld [vmem:[%s1652_s11 + $0x90] sm:$0xff]  ;;  %v239_v17 = vld [vmem:[%s1652_s11 + $0x98] sm:$0xff]  ;;  %v241_v18 = vld [vmem:[%s1652_s11 + $0xc0] sm:$0xff] }
  0x23   : > { %230 = vst [vmem:[%s209_s12 + $0x10] sm:$0xff] %v229_v12  ;;  %v243_v19 = vld [vmem:[%s1652_s11 + $0xc8] sm:$0xff]  ;;  %v245_v20 = vld [vmem:[%s1652_s11 + $0xf0] sm:$0xff]  ;;  %v247_v21 = vld [vmem:[%s1652_s11 + $0xf8] sm:$0xff] }
  0x24   : > { %232 = vst [vmem:[%s209_s12 + $0x18] sm:$0xff] %v231_v13  ;;  %v249_v22 = vld [vmem:[%s1652_s11 + $0x120] sm:$0xff]  ;;  %v251_v23 = vld [vmem:[%s1652_s11 + $0x128] sm:$0xff]  ;;  %v253_v24 = vld [vmem:[%s1652_s11 + $0x150] sm:$0xff] }
  0x25   : > { %234 = vst [vmem:[%s209_s12 + $0x20] sm:$0xff] %v233_v14  ;;  %v255_v25 = vld [vmem:[%s1652_s11 + $0x158] sm:$0xff] }
  0x26   : > { %236 = vst [vmem:[%s209_s12 + $0x28] sm:$0xff] %v235_v15 }
  0x27   : > { %238 = vst [vmem:[%s209_s12 + $0x30] sm:$0xff] %v237_v16 }
  0x28   : > { %240 = vst [vmem:[%s209_s12 + $0x38] sm:$0xff] %v239_v17 }
  0x29   : > { %242 = vst [vmem:[%s209_s12 + $0x40] sm:$0xff] %v241_v18 }
  0x2a   : > { %244 = vst [vmem:[%s209_s12 + $0x48] sm:$0xff] %v243_v19 }
  0x2b   : > { %246 = vst [vmem:[%s209_s12 + $0x50] sm:$0xff] %v245_v20 }
  0x2c   : > { %248 = vst [vmem:[%s209_s12 + $0x58] sm:$0xff] %v247_v21 }
  0x2d   : > { %250 = vst [vmem:[%s209_s12 + $0x60] sm:$0xff] %v249_v22 }
  0x2e   : > { %252 = vst [vmem:[%s209_s12 + $0x68] sm:$0xff] %v251_v23 }
  0x2f   : > { %254 = vst [vmem:[%s209_s12 + $0x70] sm:$0xff] %v253_v24 }
  0x30   : > { %256 = vst [vmem:[%s209_s12 + $0x78] sm:$0xff] %v255_v25 }
  0x31 PF: > { %p1413_p7 = scmp.ge.s32.totalorder %s1570_s17, 1  ;;  %p261_p8 = scmp.lt.s32.totalorder %s1570_s17, 4 }
  0x33   : > { %p262_p9 = pnand %p1413_p7, %p261_p8 }
  0x34   : > { %s1673_s13 = sand.u32 (!%p262_p9), 1, %s1562_s15  }
  0x35   : > { %265 = sbr.rel (%p262_p9) target bundleno = 1183 (0x49f), region = 70  ;;  %s1414_s14 = sshll.u32 (!%p262_p9), %s1673_s13, 7 }
  0x36   : > { %s277_s20 = scalar_lea.vmem (!%p262_p9), [#allocation3], %s1414_s14  ;;  %s1470_s14 = smul.u32 (!%p262_p9), 80, %s1673_s13 }
  0x37   : > { %s1415_s27 = sshll.u32 (!%p262_p9), %s1673_s13, 5  ;;  %s1471_s7 = smul.u32 (!%p262_p9), 48, %s1673_s13 }
  0x38   : > { %s2032_s30 = scalar_lea.vmem (!%p262_p9), [#allocation4], %s1415_s27 }
  0x39   : > { %s2046_s13 = scalar_lea.vmem (!%p262_p9), [#allocation5], %s1471_s7 }
  0x3a   : > { %v334_v26 = vld [vmem:[%s277_s20 + $0x60] sm:$0xff]  ;;  %v336_v27 = vld [vmem:[%s277_s20 + $0x70] sm:$0xf]  ;;  %vm376_vm0 = vcmask 1045504   ;;  %v335_v28 = vld [vmem:[%s277_s20 + $0x68] sm:$0xff]  ;;  %vm360_vm1 = vcmask 490496  }
  0x3b   : > { %v358_v29 = vpack.c.bf16 %v336_v27, %v334_v26  ;;  %v337_v30 = vld [vmem:[%s277_s20 + $0x78] sm:$0xf]  ;;  %v330_v31 = vld [vmem:[%s277_s20 + $0x40] sm:$0xff]  ;;  %v332_v32 = vld [vmem:[%s277_s20 + $0x50] sm:$0xff]  ;;  %vm577_vm13 = vcmask 1043456   ;;  %vm573_vm15 = vcmask 195584  }
  0x3c   : > { %v359_v33 = vpack.c.bf16 %v337_v30, %v335_v28  ;;  %v331_v34 = vld [vmem:[%s277_s20 + $0x48] sm:$0xff]  ;;  %v333_v35 = vld [vmem:[%s277_s20 + $0x58] sm:$0xff]  ;;  %v356_v38 = vpack.c.bf16 %v332_v32, %v330_v31  ;;  %v326_v40 = vld [vmem:[%s277_s20 + $0x20] sm:$0xff]  ;;  %s1467_s8 = sshll.u32 (%p1633_p5), %s1614_s18, 4 }
  0x3d   : > { %v378_v36 = vsel %vm376_vm0, %v358_v29, 0  ;;  %v357_v39 = vpack.c.bf16 %v333_v35, %v331_v34  ;;  %v328_v41 = vld [vmem:[%s277_s20 + $0x30] sm:$0xff]  ;;  %v327_v42 = vld [vmem:[%s277_s20 + $0x28] sm:$0xff]  ;;  %v329_v43 = vld [vmem:[%s277_s20 + $0x38] sm:$0xff]  ;;  %s1245_s11 = scalar_lea.vmem (%p1633_p5), %s2089_s3, %s1467_s8 }
  0x3e   : > { %387 = vmatpush.bf16.msra.mxu0 %v378_v36  ;;  %v381_v37 = vsel %vm376_vm0, %v359_v33, 0  ;;  %v354_v44 = vpack.c.bf16 %v328_v41, %v326_v40  ;;  %v355_v45 = vpack.c.bf16 %v329_v43, %v327_v42  ;;  %v322_v46 = vld [vmem:[%s277_s20] sm:$0xff]  ;;  %v324_v47 = vld [vmem:[%s277_s20 + $0x10] sm:$0xff]  ;;  %v323_v48 = vld [vmem:[%s277_s20 + $0x8] sm:$0xff]  ;;  %vm612_vm0 = vcmask 326656  }
  0x3f   : > { %420 = vmatpush.bf16.msra.mxu1 %v381_v37  ;;  %v325_v49 = vld [vmem:[%s277_s20 + $0x18] sm:$0xff]  ;;  %v352_v50 = vpack.c.bf16 %v324_v47, %v322_v46  ;;  %v338_v51 = vld [vmem:[%s2088_s2] sm:$0xff]  ;;  %v339_v52 = vld [vmem:[%s2088_s2 + $0x8] sm:$0xff]  ;;  %s1857_s20 = scalar_lea.vmem [#allocation2], %s1470_s14 }
  0x40   : > { %v353_v53 = vpack.c.bf16 %v325_v49, %v323_v48  ;;  %v347_v54 = vpack.c.bf16 %v339_v52, %v338_v51  ;;  %v340_v55 = vld [vmem:[%s2088_s2 + $0x10] sm:$0xff]  ;;  %v341_v56 = vld [vmem:[%s2088_s2 + $0x18] sm:$0xff]  ;;  %v342_v58 = vld [vmem:[%s2088_s2 + $0x20] sm:$0xff] }
  0x41   : > { %v348_v57 = vpack.c.bf16 %v341_v56, %v340_v55  ;;  %v343_v59 = vld [vmem:[%s2088_s2 + $0x28] sm:$0xff]  ;;  %v344_v61 = vld [vmem:[%s2088_s2 + $0x30] sm:$0xff]  ;;  %v345_v62 = vld [vmem:[%s2088_s2 + $0x38] sm:$0xff] }
  0x42   : > { %388 = vmatpush.bf16.msra.mxu0 %v356_v38  ;;  %v349_v60 = vpack.c.bf16 %v343_v59, %v342_v58  ;;  %v350_v63 = vpack.c.bf16 %v345_v62, %v344_v61  ;;  %v346_v0 = vld [vmem:[%s2088_s2 + $0x40] sm:$0xff] }
  0x43   : > { %421 = vmatpush.bf16.msra.mxu1 %v357_v39  ;;  %v351_v1 = vpack.c.bf16 %v346_v0, %v346_v0 }
  0x46   : > { %389 = vmatpush.bf16.msra.mxu0 %v354_v44 }
  0x47   : > { %422 = vmatpush.bf16.msra.mxu1 %v355_v45 }
  0x4a   : > { %390 = vmatpush.bf16.msra.mxu0 %v352_v50 }
  0x4b   : > { %423 = vmatpush.bf16.msra.mxu1 %v353_v53 }
  0x4d   : > { %1416 = vmatmul.msk.bf16.vlgmr.msra.gmra.mxu0 %vm360_vm1, %v347_v54 }
  0x4e   : > { %1421 = vmatmul.msk.bf16.vlgmr.msra.gmra.mxu1 %vm360_vm1, %v347_v54 }
  0x5d   : > { %1417 = vmatmul.msk.bf16.gmra.mxu0 %vm360_vm1, %v348_v57 }
  0x5e   : > { %1422 = vmatmul.msk.bf16.gmra.mxu1 %vm360_vm1, %v348_v57 }
  0x6d   : > { %1418 = vmatmul.msk.bf16.gmra.mxu0 %vm360_vm1, %v349_v60 }
  0x6e   : > { %1423 = vmatmul.msk.bf16.gmra.mxu1 %vm360_vm1, %v349_v60 }
  0x7d   : > { %1419 = vmatmul.msk.bf16.gmra.mxu0 %vm360_vm1, %v350_v63 }
  0x7e   : > { %1424 = vmatmul.msk.bf16.gmra.mxu1 %vm360_vm1, %v350_v63 }
  0x8d   : > { %1420 = vmatmul.msk.bf16.gmra.mxu0 %vm360_vm1, %v351_v1 }
  0x8e   : > { %1425 = vmatmul.msk.bf16.gmra.mxu1 %vm360_vm1, %v351_v1  ;;  %vm681_vm1 = vcmask 588800  }
  0xca   : > { %v1713_v2 = vpop.f32.mrf.mxu0 }
  0xcb   : > { %v1715_v3 = vpop.f32.mrf.mxu1  ;;  %v449_v22 = vmul.f32 %v1713_v2, %v1713_v2 }
  0xcc   : > { %v450_v24 = vmul.f32 %v1715_v3, %v1715_v3 }
  0xd2   : > { %v1717_v4 = vpop.f32.mrf.mxu0 }
  0xd3   : > { %v671_v5 = vpack.c.bf16 %v1717_v4, %v1713_v2  ;;  %v1721_v6 = vpop.f32.mrf.mxu1  ;;  %v451_v34 = vmul.f32 %v1717_v4, %v1717_v4 }
  0xd4   : > { %v672_v7 = vpack.c.bf16 %v1721_v6, %v1715_v3  ;;  %v452_v35 = vmul.f32 %v1721_v6, %v1721_v6  ;;  %v668_v3 = vld [vmem:[%s2088_s2 + $0x88] sm:$0xff] }
  0xda   : > { %v1725_v8 = vpop.f32.mrf.mxu0 }
  0xdb   : > { %v1727_v9 = vpop.f32.mrf.mxu1  ;;  %v453_v48 = vmul.f32 %v1725_v8, %v1725_v8 }
  0xdc   : > { %v454_v49 = vmul.f32 %v1727_v9, %v1727_v9 }
  0xe2   : > { %v1729_v10 = vpop.f32.mrf.mxu0 }
  0xe3   : > { %v673_v11 = vpack.c.bf16 %v1729_v10, %v1725_v8  ;;  %v1733_v12 = vpop.f32.mrf.mxu1  ;;  %v455_v20 = vmul.f32 %v1729_v10, %v1729_v10  ;;  %v667_v8 = vld [vmem:[%s2088_s2 + $0x80] sm:$0xff] }
  0xe4   : > { %v674_v13 = vpack.c.bf16 %v1733_v12, %v1727_v9  ;;  %v456_v21 = vmul.f32 %v1733_v12, %v1733_v12 }
  0xe5   : > { %v461_v27 = vadd.f32 %v455_v20, %v449_v22 }
  0xe6   : > { %v462_v29 = vadd.f32 %v456_v21, %v450_v24 }
  0xea   : > { %v1737_v14 = vpop.f32.mrf.mxu0 }
  0xeb   : > { %v1739_v15 = vpop.f32.mrf.mxu1  ;;  %v457_v31 = vmul.f32 %v1737_v14, %v1737_v14 }
  0xec   : > { %v458_v33 = vmul.f32 %v1739_v15, %v1739_v15 }
  0xed   : > { %v463_v37 = vadd.f32 %v457_v31, %v451_v34 }
  0xee   : > { %v464_v40 = vadd.f32 %v458_v33, %v452_v35 }
  0xf2   : > { %v1741_v16 = vpop.f32.mrf.mxu0 }
  0xf3   : > { %v675_v17 = vpack.c.bf16 %v1741_v16, %v1737_v14  ;;  %v1745_v18 = vpop.f32.mrf.mxu1  ;;  %v459_v44 = vmul.f32 %v1741_v16, %v1741_v16  ;;  %v666_v14 = vld [vmem:[%s2088_s2 + $0x78] sm:$0xff] }
  0xf4   : > { %v676_v19 = vpack.c.bf16 %v1745_v18, %v1739_v15  ;;  %v460_v46 = vmul.f32 %v1745_v18, %v1745_v18  ;;  %v669_v10 = vpack.c.bf16 %v667_v8, %v666_v14 }
  0xf5   : > { %v465_v51 = vadd.f32 %v459_v44, %v453_v48 }
  0xf6   : > { %v466_v55 = vadd.f32 %v460_v46, %v454_v49 }
  0xfa   : > { %v1755_v23 = vpop.f32.mrf.mxu0 }
  0xfb   : > { %v467_v25 = vmul.f32 %v1755_v23, %v1755_v23  ;;  %v1761_v26 = vpop.f32.mrf.mxu1 }
  0xfc   : > { %v468_v28 = vmul.f32 %v1761_v26, %v1761_v26 }
  0xfd   : > { %v1765_v30 = vadd.f32 %v467_v25, %v461_v27 }
  0xfe   : > { %v1769_v32 = vadd.f32 %v468_v28, %v462_v29 }
  0xff   : > { %1500 = vrsqrt.f32 %v1765_v30  ;;  %vm486_vm2 = vcmp.eq.f32.partialorder %v1765_v30, inf  ;;  %vm488_vm12 = vcmp.eq.f32.partialorder %v1765_v30, 0.0 }
 0x100   : > { %1502 = vrsqrt.f32 %v1769_v32  ;;  %vm498_vm4 = vcmp.eq.f32.partialorder %v1769_v32, inf  ;;  %vm500_vm14 = vcmp.eq.f32.partialorder %v1769_v32, 0.0 }
 0x102   : > { %v1777_v36 = vpop.f32.mrf.mxu0 }
 0x103   : > { %v469_v38 = vmul.f32 %v1777_v36, %v1777_v36  ;;  %v1782_v39 = vpop.f32.mrf.mxu1 }
 0x104   : > { %v470_v41 = vmul.f32 %v1782_v39, %v1782_v39 }
 0x105   : > { %v1787_v42 = vadd.f32 %v469_v38, %v463_v37  ;;  %v1501_v45 = vpop.eup %1500 }
 0x106   : > { %v1789_v43 = vadd.f32 %v470_v41, %v464_v40  ;;  %v1503_v47 = vpop.eup %1502  ;;  %v480_v54 = vmul.f32 %v1501_v45, %v1765_v30 }
 0x107   : > { %1504 = vrsqrt.f32 %v1787_v42  ;;  %v492_v57 = vmul.f32 %v1503_v47, %v1769_v32  ;;  %vm510_vm3 = vcmp.eq.f32.partialorder %v1787_v42, inf  ;;  %vm512_vm5 = vcmp.eq.f32.partialorder %v1787_v42, 0.0 }
 0x108   : > { %1506 = vrsqrt.f32 %v1789_v43  ;;  %v481_v63 = vmul.f32 %v1501_v45, %v480_v54  ;;  %vm522_vm6 = vcmp.eq.f32.partialorder %v1789_v43, inf  ;;  %vm524_vm7 = vcmp.eq.f32.partialorder %v1789_v43, 0.0 }
 0x109   : > { %v493_v0 = vmul.f32 %v1503_v47, %v492_v57 }
 0x10a   : > { %v1801_v50 = vpop.f32.mrf.mxu0  ;;  %v482_v24 = vmul.f32 0.5, %v481_v63 }
 0x10b   : > { %v471_v52 = vmul.f32 %v1801_v50, %v1801_v50  ;;  %v1805_v53 = vpop.f32.mrf.mxu1  ;;  %v494_v28 = vmul.f32 0.5, %v493_v0 }
 0x10c   : > { %v472_v56 = vmul.f32 %v1805_v53, %v1805_v53  ;;  %v483_v38 = vsub.f32 1.5, %v482_v24 }
 0x10d   : > { %v1505_v58 = vpop.eup %1504  ;;  %v1811_v59 = vadd.f32 %v471_v52, %v465_v51  ;;  %v495_v44 = vsub.f32 1.5, %v494_v28 }
 0x10e   : > { %v1507_v60 = vpop.eup %1506  ;;  %v1813_v61 = vadd.f32 %v472_v56, %v466_v55  ;;  %v504_v62 = vmul.f32 %v1505_v58, %v1787_v42  ;;  %v484_v54 = vmul.f32 %v1501_v45, %v483_v38  ;;  %v489_v56 = vand.u32 2147483648, %v1765_v30 }
 0x10f   : > { %1508 = vrsqrt.f32 %v1811_v59  ;;  %v516_v20 = vmul.f32 %v1507_v60, %v1789_v43  ;;  %v496_v57 = vmul.f32 %v1503_v47, %v495_v44  ;;  %vm534_vm8 = vcmp.eq.f32.partialorder %v1811_v59, inf }
 0x110   : > { %1510 = vrsqrt.f32 %v1813_v61  ;;  %v505_v1 = vmul.f32 %v1505_v58, %v504_v62  ;;  %vm536_vm9 = vcmp.eq.f32.partialorder %v1811_v59, 0.0  ;;  %vm546_vm10 = vcmp.eq.f32.partialorder %v1813_v61, inf }
 0x111   : > { %v517_v27 = vmul.f32 %v1507_v60, %v516_v20  ;;  %v497_v20 = vmul.f32 %v496_v57, %v1769_v32  ;;  %v549_v28 = vand.u32 2147483648, %v1813_v61  ;;  %vm548_vm11 = vcmp.eq.f32.partialorder %v1813_v61, 0.0 }
 0x112   : > { %v414_v21 = vpop.f32.mrf.mxu0  ;;  %v506_v25 = vmul.f32 0.5, %v505_v1  ;;  %v485_v1 = vmul.f32 %v484_v54, %v1765_v30 }
 0x113   : > { %v447_v22 = vpop.f32.mrf.mxu1  ;;  %v518_v33 = vmul.f32 0.5, %v517_v27  ;;  %v525_v21 = vand.u32 2147483648, %v1789_v43  ;;  %v499_v38 = vsel %vm498_vm4, %v1769_v32, %v497_v20 }
 0x114   : > { %v507_v31 = vsub.f32 1.5, %v506_v25  ;;  %v537_v22 = vand.u32 2147483648, %v1811_v59 }
 0x115   : > { %v1509_v29 = vpop.eup %1508  ;;  %v519_v40 = vsub.f32 1.5, %v518_v33 }
 0x116   : > { %v1511_v34 = vpop.eup %1510  ;;  %v528_v35 = vmul.f32 %v1509_v29, %v1811_v59  ;;  %v508_v48 = vmul.f32 %v1505_v58, %v507_v31  ;;  %v513_v58 = vand.u32 2147483648, %v1787_v42 }
 0x117   : > { %v540_v37 = vmul.f32 %v1511_v34, %v1813_v61  ;;  %v520_v51 = vmul.f32 %v1507_v60, %v519_v40  ;;  %v320_v40 = vld [vmem:[%s1857_s20 + $0x40] sm:$0xff] }
 0x118   : > { %v529_v41 = vmul.f32 %v1509_v29, %v528_v35  ;;  %v509_v63 = vmul.f32 %v508_v48, %v1787_v42  ;;  %v564_v54 = vpack.c.bf16 %v320_v40, %v320_v40 }
 0x119   : > { %v541_v46 = vmul.f32 %v1511_v34, %v540_v37  ;;  %v521_v45 = vmul.f32 %v520_v51, %v1789_v43 }
 0x11a   : > { %v530_v49 = vmul.f32 0.5, %v529_v41  ;;  %v511_v25 = vsel %vm510_vm3, %v1787_v42, %v509_v63  ;;  %v567_v63 = vld [vmem:[%s2088_s2 + $0x60] sm:$0xff] }
 0x11b   : > { %v542_v52 = vmul.f32 0.5, %v541_v46  ;;  %v321_v46 = vld [vmem:[%s1857_s20 + $0x48] sm:$0xff] }
 0x11c   : > { %v531_v55 = vsub.f32 1.5, %v530_v49 }
 0x11d   : > { %v543_v62 = vsub.f32 1.5, %v542_v52 }
 0x11e   : > { %v532_v0 = vmul.f32 %v1509_v29, %v531_v55  ;;  %v523_v29 = vsel %vm522_vm6, %v1789_v43, %v521_v45  ;;  %v650_v43 = vld [vmem:[%s2088_s2 + $0x68] sm:$0xff] }
 0x11f   : > { %v544_v60 = vmul.f32 %v1511_v34, %v543_v62  ;;  %v487_v34 = vsel %vm486_vm2, %v1765_v30, %v485_v1  ;;  %v526_v44 = vsel %vm524_vm7, %v525_v21, %v523_v29  ;;  %v565_v30 = vpack.c.bf16 %v321_v46, %v321_v46  ;;  %v316_v1 = vld [vmem:[%s1857_s20 + $0x20] sm:$0xff] }
 0x120   : > { %v533_v47 = vmul.f32 %v532_v0, %v1811_v59  ;;  %v490_v48 = vsel %vm488_vm12, %v489_v56, %v487_v34  ;;  %v554_v57 = vadd.f32 1e-08, %v526_v44  ;;  %v1572_v0 = vmov 0   ;;  %v312_v29 = vld [vmem:[%s1857_s20] sm:$0xff]  ;;  %v313_v34 = vld [vmem:[%s1857_s20 + $0x8] sm:$0xff] }
 0x121   : > { %v545_v24 = vmul.f32 %v544_v60, %v1813_v61  ;;  %v551_v56 = vadd.f32 1e-08, %v490_v48  ;;  %1497 = vset.pattern.permute.xlu0 %v1572_v0  ;;  %v617_v60 = vsel %vm577_vm13, %v564_v54, 0  ;;  %1498 = vset.pattern.permute.xlu1 %v1572_v0  ;;  %v620_v21 = vsel %vm577_vm13, %v565_v30, 0 }
 0x122   : > { %v535_v27 = vsel %vm534_vm8, %v1811_v59, %v533_v47  ;;  %v514_v59 = vsel %vm512_vm5, %v513_v58, %v511_v25  ;;  %654 = vperm.xlu0 %1497, %v650_v43   ;;  %v318_v47 = vld [vmem:[%s1857_s20 + $0x30] sm:$0xff]  ;;  %1499 = vset.pattern.permute.xlu2 %v1572_v0  ;;  %v319_v25 = vld [vmem:[%s1857_s20 + $0x38] sm:$0xff]  ;;  %v677_v44 = vpack.c.bf16 %v1777_v36, %v1755_v23 }
 0x123   : > { %v538_v31 = vsel %vm536_vm9, %v537_v22, %v535_v27  ;;  %v547_v33 = vsel %vm546_vm10, %v1813_v61, %v545_v24  ;;  %v501_v61 = vand.u32 2147483648, %v1769_v32  ;;  %v553_v51 = vadd.f32 1e-08, %v514_v59  ;;  %v566_v32 = vld [vmem:[%s2088_s2 + $0x58] sm:$0xff] }
 0x124   : > { %v555_v35 = vadd.f32 1e-08, %v538_v31  ;;  %v550_v37 = vsel %vm548_vm11, %v549_v28, %v547_v33  ;;  %v568_v22 = vpack.c.bf16 %v567_v63, %v566_v32  ;;  %v317_v24 = vld [vmem:[%s1857_s20 + $0x28] sm:$0xff]  ;;  %v562_v27 = vpack.c.bf16 %v318_v47, %v316_v1  ;;  %v314_v31 = vld [vmem:[%s1857_s20 + $0x10] sm:$0xff] }
 0x125   : > { %v556_v41 = vadd.f32 1e-08, %v550_v37  ;;  %v502_v52 = vsel %vm500_vm14, %v501_v61, %v499_v38  ;;  %v569_v45 = vpack.c.bf16 %v553_v51, %v551_v56  ;;  %v563_v28 = vpack.c.bf16 %v319_v25, %v317_v24  ;;  %v651_v33 = vld [vmem:[%s2088_s2 + $0x70] sm:$0xff] }
 0x126   : > { %v571_v42 = vpack.c.bf16 %v555_v35, %v555_v35  ;;  %v552_v58 = vadd.f32 1e-08, %v502_v52  ;;  %v315_v35 = vld [vmem:[%s1857_s20 + $0x18] sm:$0xff]  ;;  %v679_v37 = vpack.c.bf16 %v1801_v50, %v1801_v50  ;;  %v560_v59 = vpack.c.bf16 %v314_v31, %v312_v29 }
 0x127   : > { %v572_v49 = vpack.c.bf16 %v556_v41, %v556_v41  ;;  %v680_v38 = vpack.c.bf16 %v1805_v53, %v1805_v53  ;;  %v561_v40 = vpack.c.bf16 %v315_v35, %v313_v34  ;;  %v557_v50 = vld [vmem:[%s2088_s2 + $0x48] sm:$0xff]  ;;  %v558_v53 = vld [vmem:[%s2088_s2 + $0x50] sm:$0xff]  ;;  %v678_v46 = vpack.c.bf16 %v1782_v39, %v1761_v26 }
 0x128   : > { %v579_v55 = vsel %vm577_vm13, %v571_v42, 0  ;;  %v570_v20 = vpack.c.bf16 %v554_v57, %v552_v58  ;;  %v689_v41 = vsel %vm577_vm13, %v679_v37, 0  ;;  %v559_v42 = vpack.c.bf16 %v558_v53, %v557_v50 }
 0x129   : > { %590 = vmatpush.bf16.msra.mxu2 %v579_v55  ;;  %v582_v62 = vsel %vm577_vm13, %v572_v49, 0  ;;  %v692_v61 = vsel %vm577_vm13, %v680_v38, 0 }
 0x12a   : > { %604 = vmatpush.bf16.msra.mxu3 %v582_v62  ;;  %659 = vperm.xlu0 %1497, %v651_v33  }
 0x12d   : > { %591 = vmatpush.bf16.msra.mxu2 %v569_v45  ;;  %v810_v45 = vld [vmem:[%s2088_s2 + $0x98] sm:$0xff] }
 0x12e   : > { %605 = vmatpush.bf16.msra.mxu3 %v570_v20  ;;  %813 = vperm.xlu1 %1498, %v810_v45  }
 0x130   : > { %1426 = vmatmul.msk.bf16.vlgmr.msra.gmra.mxu2 %vm573_vm15, %v568_v22 }
 0x131   : > { %627 = vmatpush.bf16.msrb.mxu2 %v617_v60  ;;  %1427 = vmatmul.msk.bf16.vlgmr.msra.gmra.mxu3 %vm573_vm15, %v568_v22  ;;  %v1066_v22 = vld [vmem:[%s2088_s2 + $0xd8] sm:$0xff] }
 0x132   : > { %641 = vmatpush.bf16.msrb.mxu3 %v620_v21 }
 0x135   : > { %628 = vmatpush.bf16.msrb.mxu2 %v562_v27 }
 0x136   : > { %642 = vmatpush.bf16.msrb.mxu3 %v563_v28  ;;  %1070 = vperm.xlu1 %1498, %v1066_v22  }
 0x139   : > { %629 = vmatpush.bf16.msrb.mxu2 %v560_v59 }
 0x13a   : > { %643 = vmatpush.bf16.msrb.mxu3 %v561_v40 }
 0x13d   : > { %697 = vmatpush.bf16.msra.mxu2 %v689_v41 }
 0x13e   : > { %715 = vmatpush.bf16.msra.mxu3 %v692_v61 }
 0x140   : > { %1428 = vmatmul.msk.bf16.vlgmr.msrb.gmra.mxu2 %vm612_vm0, %v559_v42 }
 0x141   : > { %698 = vmatpush.bf16.msra.mxu2 %v677_v44  ;;  %1429 = vmatmul.msk.bf16.vlgmr.msrb.gmra.mxu3 %vm612_vm0, %v559_v42 }
 0x142   : > { %716 = vmatpush.bf16.msra.mxu3 %v678_v46 }
 0x145   : > { %699 = vmatpush.bf16.msra.mxu2 %v675_v17 }
 0x146   : > { %717 = vmatpush.bf16.msra.mxu3 %v676_v19 }
 0x149   : > { %700 = vmatpush.bf16.msra.mxu2 %v673_v11 }
 0x14a   : > { %718 = vmatpush.bf16.msra.mxu3 %v674_v13 }
 0x14d   : > { %701 = vmatpush.bf16.msra.mxu2 %v671_v5  ;;  %v670_v5 = vpack.c.bf16 %v668_v3, %v668_v3 }
 0x14e   : > { %719 = vmatpush.bf16.msra.mxu3 %v672_v7 }
 0x150   : > { %1430 = vmatmul.msk.bf16.vlgmr.msra.gmra.mxu2 %vm681_vm1, %v669_v10 }
 0x151   : > { %1432 = vmatmul.msk.bf16.vlgmr.msra.gmra.mxu3 %vm681_vm1, %v669_v10 }
 0x160   : > { %1431 = vmatmul.msk.bf16.gmra.mxu2 %vm681_vm1, %v670_v5 }
 0x161   : > { %1433 = vmatmul.msk.bf16.gmra.mxu3 %vm681_vm1, %v670_v5 }
 0x194   : > { %v655_v6 = vpop.permute.xlu0 %654 }
 0x19c   : > { %v660_v39 = vpop.permute.xlu0 %659 }
 0x1b3   : > { %v593_v11 = vpop.f32.mrf.mxu2 }
 0x1b4   : > { %v607_v9 = vpop.f32.mrf.mxu3 }
 0x1bb   : > { %v595_v2 = vpop.f32.mrf.mxu2 }
 0x1bc   : > { %v609_v4 = vpop.f32.mrf.mxu3 }
 0x1c3   : > { %v631_v7 = vpop.f32.mrf.mxu2 }
 0x1c4   : > { %v632_v12 = vadd.f32 %v631_v7, %v593_v11  ;;  %v645_v13 = vpop.f32.mrf.mxu3 }
 0x1c5   : > { %v646_v15 = vadd.f32 %v645_v13, %v607_v9  ;;  %v806_v13 = vld [vmem:[%s2088_s2 + $0x90] sm:$0xff] }
 0x1c6   : > { %v662_v16 = vadd.f32 %v655_v6, %v632_v12  ;;  %v894_v12 = vld [vmem:[%s2088_s2 + $0xa0] sm:$0xff] }
 0x1c7   : > { %v663_v17 = vadd.f32 %v655_v6, %v646_v15 }
 0x1c8   : > { %v1434_v18 = vmul.f32 -1.442695, %v662_v16  ;;  %v890_v54 = vmax.f32 %v662_v16, 0.0 }
 0x1c9   : > { %v1435_v19 = vmul.f32 -1.442695, %v663_v17  ;;  %v891_v62 = vmax.f32 %v663_v17, 0.0 }
 0x1ca   : > { %1512 = vpow2.f32 %v1434_v18 }
 0x1cb   : > { %1514 = vpow2.f32 %v1435_v19  ;;  %v633_v23 = vpop.f32.mrf.mxu2 }
 0x1cc   : > { %v634_v26 = vadd.f32 %v633_v23, %v595_v2  ;;  %v647_v36 = vpop.f32.mrf.mxu3 }
 0x1cd   : > { %v648_v48 = vadd.f32 %v647_v36, %v609_v4 }
 0x1ce   : > { %v664_v49 = vadd.f32 %v660_v39, %v634_v26 }
 0x1cf   : > { %v665_v51 = vadd.f32 %v660_v39, %v648_v48  ;;  %v807_v39 = vpack.c.bf16 %v806_v13, %v806_v13  ;;  %v895_v13 = vld [vmem:[%s2088_s2 + $0xa8] sm:$0xff] }
 0x1d0   : > { %v1513_v52 = vpop.eup %1512  ;;  %v1436_v55 = vmul.f32 -1.442695, %v664_v49  ;;  %v892_v57 = vmax.f32 %v664_v49, 0.0 }
 0x1d1   : > { %v1515_v30 = vpop.eup %1514  ;;  %v742_v43 = vadd.f32 1.0, %v1513_v52  ;;  %v1437_v56 = vmul.f32 -1.442695, %v665_v51  ;;  %v893_v32 = vmax.f32 %v665_v51, 0.0 }
 0x1d2   : > { %v1935_v63 = vadd.f32 1.0, %v1515_v30  ;;  %1516 = vpow2.f32 %v1436_v55  ;;  %v1937_v0 = vpack.c.bf16 %v892_v57, %v890_v54 }
 0x1d3   : > { %1518 = vrcp.f32 %v742_v43  ;;  %v1939_v58 = vpack.c.bf16 %v893_v32, %v891_v62  ;;  %vm751_vm2 = vweird.f32 %v742_v43  ;;  %v757_v35 = vand.u32 2147483648, %v742_v43  ;;  %v703_v52 = vpop.f32.mrf.mxu2  ;;  %v814_v32 = vpop.permute.xlu1 %813 }
 0x1d4   : > { %1520 = vrcp.f32 %v1935_v63  ;;  %v755_v40 = vand.u32 2147483647, %v742_v43  ;;  %vm766_vm4 = vweird.f32 %v1935_v63  ;;  %v770_v50 = vand.u32 2147483647, %v1935_v63  ;;  %v721_v54 = vpop.f32.mrf.mxu3 }
 0x1d5   : > { %1522 = vpow2.f32 %v1437_v56  ;;  %v772_v42 = vand.u32 2147483648, %v1935_v63  ;;  %v758_v8 = vor.u32 1.1754944e-38, %v757_v35 }
 0x1d6   : > { %vm756_vm11 = vcmp.eq.f32.partialorder %v755_v40, 8.507059e+37 }
 0x1d7   : > { %v773_v23 = vor.u32 1.1754944e-38, %v772_v42 }
 0x1d8   : > { %v1517_v60 = vpop.eup %1516 }
 0x1d9   : > { %v1519_v1 = vpop.eup %1518  ;;  %v744_v47 = vadd.f32 1.0, %v1517_v60 }
 0x1da   : > { %v1945_v20 = vpop.eup %1520  ;;  %v747_v21 = vmul.f32 %v1519_v1, %v742_v43  ;;  %vm752_vm3 = vweird.f32 %v1519_v1 }
 0x1db   : > { %v1523_v24 = vpop.eup %1522  ;;  %v762_v25 = vmul.f32 %v1945_v20, %v1935_v63  ;;  %1524 = vrcp.f32 %v744_v47  ;;  %v787_v44 = vand.u32 2147483648, %v744_v47  ;;  %v785_v46 = vand.u32 2147483647, %v744_v47  ;;  %vm1957_vm6 = vmor %vm751_vm2, %vm752_vm3  ;;  %v705_v55 = vpop.f32.mrf.mxu2 }
 0x1dc   : > { %v745_v27 = vadd.f32 1.0, %v1523_v24  ;;  %v748_v28 = vsub.f32 1.0, %v747_v21  ;;  %vm767_vm7 = vweird.f32 %v1945_v20  ;;  %vm781_vm8 = vweird.f32 %v744_v47  ;;  %v723_v57 = vpop.f32.mrf.mxu3 }
 0x1dd   : > { %v763_v29 = vsub.f32 1.0, %v762_v25  ;;  %v788_v3 = vor.u32 1.1754944e-38, %v787_v44  ;;  %vm786_vm12 = vcmp.eq.f32.partialorder %v785_v46, 8.507059e+37  ;;  %vm1967_vm14 = vmor %vm766_vm4, %vm767_vm7  ;;  %vm771_vm2 = vcmp.eq.f32.partialorder %v770_v50, 8.507059e+37 }
 0x1de   : > { %1526 = vrcp.f32 %v745_v27  ;;  %v749_v31 = vmul.f32 %v1519_v1, %v748_v28  ;;  %v802_v4 = vand.u32 2147483648, %v745_v27  ;;  %v800_v6 = vand.u32 2147483647, %v745_v27 }
 0x1df   : > { %v764_v37 = vmul.f32 %v1945_v20, %v763_v29  ;;  %vm796_vm0 = vweird.f32 %v745_v27  ;;  %vm816_vm4 = vcmask 130048  }
 0x1e0   : > { %v750_v38 = vadd.f32 %v1519_v1, %v749_v31  ;;  %v803_v26 = vor.u32 1.1754944e-38, %v802_v4  ;;  %vm801_vm3 = vcmp.eq.f32.partialorder %v800_v6, 8.507059e+37 }
 0x1e1   : > { %v1525_v33 = vpop.eup %1524  ;;  %v765_v10 = vadd.f32 %v1945_v20, %v764_v37 }
 0x1e2   : > { %v777_v34 = vmul.f32 %v1525_v33, %v744_v47  ;;  %vm782_vm5 = vweird.f32 %v1525_v33  ;;  %v754_v9 = vsel %vm1957_vm6, %v1519_v1, %v750_v38 }
 0x1e3   : > { %vm783_vm9 = vmor %vm781_vm8, %vm782_vm5  ;;  %v759_v15 = vsel %vm756_vm11, %v758_v8, %v754_v9  ;;  %v769_v17 = vsel %vm1967_vm14, %v1945_v20, %v765_v10  ;;  %v708_v30 = vpop.f32.mrf.mxu2 }
 0x1e4   : > { %v1527_v59 = vpop.eup %1526  ;;  %v778_v41 = vsub.f32 1.0, %v777_v34  ;;  %v774_v48 = vsel %vm771_vm2, %v773_v23, %v769_v17  ;;  %v726_v43 = vpop.f32.mrf.mxu3 }
 0x1e5   : > { %v792_v61 = vmul.f32 %v1527_v59, %v745_v27  ;;  %vm797_vm10 = vweird.f32 %v1527_v59 }
 0x1e6   : > { %v779_v53 = vmul.f32 %v1525_v33, %v778_v41  ;;  %vm798_vm1 = vmor %vm796_vm0, %vm797_vm10 }
 0x1e7   : > { %v793_v11 = vsub.f32 1.0, %v792_v61 }
 0x1e8   : > { %v780_v2 = vadd.f32 %v1525_v33, %v779_v53 }
 0x1e9   : > { %v794_v5 = vmul.f32 %v1527_v59, %v793_v11 }
 0x1ea   : > { %v784_v7 = vsel %vm783_vm9, %v1525_v33, %v780_v2 }
 0x1eb   : > { %v789_v16 = vsel %vm786_vm12, %v788_v3, %v784_v7  ;;  %v795_v18 = vadd.f32 %v1527_v59, %v794_v5  ;;  %v710_v62 = vpop.f32.mrf.mxu2 }
 0x1ec   : > { %v808_v19 = vpack.c.bf16 %v789_v16, %v759_v15  ;;  %v728_v56 = vpop.f32.mrf.mxu3 }
 0x1ed   : > { %v799_v36 = vsel %vm798_vm1, %v1527_v59, %v795_v18 }
 0x1ee   : > { %827 = vmatpush.bf16.msrb.mxu2 %v808_v19  ;;  %v804_v49 = vsel %vm801_vm3, %v803_v26, %v799_v36  ;;  %v897_v19 = vpack.c.bf16 %v895_v13, %v894_v12  ;;  %v896_v26 = vld [vmem:[%s2088_s2 + $0xb0] sm:$0xff]  ;;  %vm997_vm3 = vcmask 64512  }
 0x1ef   : > { %v809_v51 = vpack.c.bf16 %v804_v49, %v774_v48  ;;  %v898_v36 = vpack.c.bf16 %v896_v26, %v896_v26 }
 0x1f1   : > { %840 = vmatpush.bf16.msrb.mxu3 %v809_v51  ;;  %1438 = vmatmul.msk.bf16.vlgmr.msrb.gmra.mxu2 %vm816_vm4, %v807_v39 }
 0x1f4   : > { %1439 = vmatmul.msk.bf16.vlgmr.msrb.gmra.mxu3 %vm816_vm4, %v807_v39 }
 0x274   : > { %v829_v63 = vpop.f32.mrf.mxu2 }
 0x275   : > { %v830_v45 = vadd.f32 %v829_v63, %v814_v32 }
 0x277   : > { %v1440_v60 = vmul.f32 -1.442695, %v830_v45  ;;  %v842_v1 = vpop.f32.mrf.mxu3 }
 0x278   : > { %v843_v47 = vadd.f32 %v842_v1, %v814_v32 }
 0x279   : > { %1528 = vpow2.f32 %v1440_v60 }
 0x27a   : > { %v1441_v20 = vmul.f32 -1.442695, %v843_v47 }
 0x27c   : > { %1530 = vpow2.f32 %v1441_v20  ;;  %v831_v21 = vpop.f32.mrf.mxu2 }
 0x27f   : > { %v1529_v22 = vpop.eup %1528  ;;  %v844_v24 = vpop.f32.mrf.mxu3 }
 0x280   : > { %v852_v25 = vadd.f32 1.0, %v1529_v22 }
 0x282   : > { %v1531_v27 = vpop.eup %1530  ;;  %1532 = vrcp.f32 %v852_v25  ;;  %v865_v37 = vand.u32 2147483648, %v852_v25  ;;  %v863_v38 = vand.u32 2147483647, %v852_v25  ;;  %vm859_vm6 = vweird.f32 %v852_v25 }
 0x283   : > { %v853_v28 = vadd.f32 1.0, %v1531_v27 }
 0x284   : > { %v866_v44 = vor.u32 1.1754944e-38, %v865_v37  ;;  %vm864_vm9 = vcmp.eq.f32.partialorder %v863_v38, 8.507059e+37 }
 0x285   : > { %1534 = vrcp.f32 %v853_v28  ;;  %v880_v61 = vand.u32 2147483648, %v853_v28  ;;  %v878_v53 = vand.u32 2147483647, %v853_v28  ;;  %vm874_vm10 = vweird.f32 %v853_v28 }
 0x287   : > { %v881_v10 = vor.u32 1.1754944e-38, %v880_v61  ;;  %vm879_vm12 = vcmp.eq.f32.partialorder %v878_v53, 8.507059e+37  ;;  %v1067_v61 = vld [vmem:[%s2088_s2 + $0xe0] sm:$0xff] }
 0x288   : > { %v1533_v29 = vpop.eup %1532  ;;  %1075 = vperm.xlu2 %1499, %v1067_v61  }
 0x289   : > { %v855_v31 = vmul.f32 %v1533_v29, %v852_v25  ;;  %vm860_vm5 = vweird.f32 %v1533_v29 }
 0x28a   : > { %vm861_vm7 = vmor %vm859_vm6, %vm860_vm5 }
 0x28b   : > { %v1535_v33 = vpop.eup %1534  ;;  %v856_v34 = vsub.f32 1.0, %v855_v31 }
 0x28c   : > { %v870_v35 = vmul.f32 %v1535_v33, %v853_v28  ;;  %vm875_vm8 = vweird.f32 %v1535_v33 }
 0x28d   : > { %v857_v59 = vmul.f32 %v1533_v29, %v856_v34  ;;  %vm876_vm11 = vmor %vm874_vm10, %vm875_vm8 }
 0x28e   : > { %v871_v40 = vsub.f32 1.0, %v870_v35 }
 0x28f   : > { %v858_v41 = vadd.f32 %v1533_v29, %v857_v59 }
 0x290   : > { %v872_v50 = vmul.f32 %v1535_v33, %v871_v40 }
 0x291   : > { %v862_v46 = vsel %vm861_vm7, %v1533_v29, %v858_v41 }
 0x292   : > { %v867_v42 = vsel %vm864_vm9, %v866_v44, %v862_v46  ;;  %v873_v14 = vadd.f32 %v1535_v33, %v872_v50 }
 0x293   : > { %v888_v8 = vmul.f32 %v867_v42, %v708_v30  ;;  %v884_v3 = vmul.f32 %v867_v42, %v703_v52  ;;  %v886_v5 = vmul.f32 %v867_v42, %v705_v55 }
 0x294   : > { %v877_v11 = vsel %vm876_vm11, %v1535_v33, %v873_v14 }
 0x295   : > { %v901_v9 = vpack.c.bf16 %v888_v8, %v888_v8  ;;  %v882_v2 = vsel %vm879_vm12, %v881_v10, %v877_v11  ;;  %v899_v18 = vpack.c.bf16 %v886_v5, %v884_v3 }
 0x296   : > { %v889_v4 = vmul.f32 %v882_v2, %v726_v43  ;;  %v885_v15 = vmul.f32 %v882_v2, %v721_v54  ;;  %v887_v16 = vmul.f32 %v882_v2, %v723_v57  ;;  %v993_v2 = vld [vmem:[%s2088_s2 + $0xd0] sm:$0xff] }
 0x297   : > { %v910_v6 = vsel %vm577_vm13, %v901_v9, 0  ;;  %v992_v9 = vld [vmem:[%s2088_s2 + $0xc8] sm:$0xff] }
 0x298   : > { %921 = vmatpush.bf16.msra.mxu2 %v910_v6  ;;  %v902_v7 = vpack.c.bf16 %v889_v4, %v889_v4  ;;  %v900_v23 = vpack.c.bf16 %v887_v16, %v885_v15  ;;  %v1143_v4 = vld [vmem:[%s2088_s2 + $0x108] sm:$0xff]  ;;  %v994_v12 = vpack.c.bf16 %v993_v2, %v992_v9  ;;  %v987_v16 = vld [vmem:[%s2088_s2 + $0xb8] sm:$0xff] }
 0x299   : > { %1146 = vperm.xlu2 %1499, %v1143_v4  }
 0x29a   : > { %v913_v17 = vsel %vm577_vm13, %v902_v7, 0 }
 0x29b   : > { %939 = vmatpush.bf16.msra.mxu3 %v913_v17  ;;  %v988_v17 = vld [vmem:[%s2088_s2 + $0xc0] sm:$0xff] }
 0x29c   : > { %922 = vmatpush.bf16.msra.mxu2 %v899_v18  ;;  %v989_v18 = vpack.c.bf16 %v988_v17, %v987_v16 }
 0x29f   : > { %940 = vmatpush.bf16.msra.mxu3 %v900_v23  ;;  %1442 = vmatmul.msk.bf16.vlgmr.msra.gmra.mxu2 %vm573_vm15, %v897_v19  ;;  %v1083_v23 = vld [vmem:[%s2088_s2 + $0xf0] sm:$0xff] }
 0x2a2   : > { %1444 = vmatmul.msk.bf16.vlgmr.msra.gmra.mxu3 %vm573_vm15, %v897_v19 }
 0x2af   : > { %1443 = vmatmul.msk.bf16.gmra.mxu2 %vm573_vm15, %v898_v36 }
 0x2b2   : > { %1445 = vmatmul.msk.bf16.gmra.mxu3 %vm573_vm15, %v898_v36 }
 0x322   : > { %v924_v39 = vpop.f32.mrf.mxu2 }
 0x323   : > { %v951_v54 = vmul.f32 %v924_v39, %v924_v39 }
 0x325   : > { %v942_v48 = vpop.f32.mrf.mxu3 }
 0x326   : > { %v952_v56 = vmul.f32 %v942_v48, %v942_v48 }
 0x32a   : > { %v926_v49 = vpop.f32.mrf.mxu2 }
 0x32b   : > { %v953_v52 = vmul.f32 %v926_v49, %v926_v49  ;;  %v1087_v20 = vpack.c.bf16 %v926_v49, %v924_v39 }
 0x32d   : > { %v944_v51 = vpop.f32.mrf.mxu3  ;;  %v955_v30 = vadd.f32 %v953_v52, %v951_v54  ;;  %v1071_v52 = vpop.permute.xlu1 %1070 }
 0x32e   : > { %v954_v55 = vmul.f32 %v944_v51, %v944_v51  ;;  %v1088_v25 = vpack.c.bf16 %v944_v51, %v942_v48  ;;  %v1084_v51 = vld [vmem:[%s2088_s2 + $0xf8] sm:$0xff] }
 0x330   : > { %v956_v60 = vadd.f32 %v954_v55, %v952_v56 }
 0x332   : > { %v929_v57 = vpop.f32.mrf.mxu2 }
 0x333   : > { %v957_v43 = vmul.f32 %v929_v57, %v929_v57  ;;  %v1089_v62 = vpack.c.bf16 %v929_v57, %v929_v57 }
 0x335   : > { %v959_v32 = vadd.f32 %v957_v43, %v955_v30  ;;  %v947_v63 = vpop.f32.mrf.mxu3  ;;  %v1098_v45 = vsel %vm577_vm13, %v1089_v62, 0  ;;  %v1086_v30 = vpack.c.bf16 %v1084_v51, %v1084_v51 }
 0x336   : > { %v958_v1 = vmul.f32 %v947_v63, %v947_v63  ;;  %v1090_v47 = vpack.c.bf16 %v947_v63, %v947_v63  ;;  %1109 = vmatpush.bf16.msrb.mxu2 %v1098_v45 }
 0x337   : > { %1536 = vrsqrt.f32 %v959_v32  ;;  %vm968_vm14 = vcmp.eq.f32.partialorder %v959_v32, inf  ;;  %v971_v50 = vand.u32 2147483648, %v959_v32  ;;  %vm970_vm0 = vcmp.eq.f32.partialorder %v959_v32, 0.0 }
 0x338   : > { %v960_v21 = vadd.f32 %v958_v1, %v956_v60  ;;  %v1101_v22 = vsel %vm577_vm13, %v1090_v47, 0  ;;  %v1139_v60 = vld [vmem:[%s2088_s2 + $0x100] sm:$0xff] }
 0x339   : > { %1127 = vmatpush.bf16.msrb.mxu3 %v1101_v22 }
 0x33a   : > { %v931_v24 = vpop.f32.mrf.mxu2  ;;  %1110 = vmatpush.bf16.msrb.mxu2 %v1087_v20  ;;  %1538 = vrsqrt.f32 %v960_v21  ;;  %vm980_vm1 = vcmp.eq.f32.partialorder %v960_v21, inf  ;;  %v983_v10 = vand.u32 2147483648, %v960_v21  ;;  %vm982_vm2 = vcmp.eq.f32.partialorder %v960_v21, 0.0 }
 0x33d   : > { %v1537_v27 = vpop.eup %1536  ;;  %v949_v28 = vpop.f32.mrf.mxu3  ;;  %1128 = vmatpush.bf16.msrb.mxu3 %v1088_v25 }
 0x33e   : > { %v962_v29 = vmul.f32 %v1537_v27, %v959_v32 }
 0x340   : > { %v1539_v31 = vpop.eup %1538  ;;  %v963_v33 = vmul.f32 %v1537_v27, %v962_v29 }
 0x341   : > { %v974_v34 = vmul.f32 %v1539_v31, %v960_v21 }
 0x342   : > { %v964_v35 = vmul.f32 0.5, %v963_v33 }
 0x343   : > { %v975_v37 = vmul.f32 %v1539_v31, %v974_v34 }
 0x344   : > { %v965_v59 = vsub.f32 1.5, %v964_v35 }
 0x345   : > { %v976_v38 = vmul.f32 0.5, %v975_v37 }
 0x346   : > { %v966_v40 = vmul.f32 %v1537_v27, %v965_v59 }
 0x347   : > { %v977_v41 = vsub.f32 1.5, %v976_v38 }
 0x348   : > { %v967_v44 = vmul.f32 %v966_v40, %v959_v32 }
 0x349   : > { %v978_v53 = vmul.f32 %v1539_v31, %v977_v41 }
 0x34a   : > { %v969_v46 = vsel %vm968_vm14, %v959_v32, %v967_v44  ;;  %v1076_v32 = vpop.permute.xlu2 %1075 }
 0x34b   : > { %v972_v42 = vsel %vm970_vm0, %v971_v50, %v969_v46  ;;  %v979_v14 = vmul.f32 %v978_v53, %v960_v21 }
 0x34c   : > { %v985_v8 = vadd.f32 1e-08, %v972_v42 }
 0x34d   : > { %v981_v11 = vsel %vm980_vm1, %v960_v21, %v979_v14  ;;  %v1140_v21 = vpack.c.bf16 %v1139_v60, %v1139_v60 }
 0x34e   : > { %v995_v3 = vpack.c.bf16 %v985_v8, %v985_v8  ;;  %v984_v5 = vsel %vm982_vm2, %v983_v10, %v981_v11 }
 0x34f   : > { %v986_v6 = vadd.f32 1e-08, %v984_v5 }
 0x350   : > { %v1002_v7 = vsel %vm577_vm13, %v995_v3, 0 }
 0x351   : > { %1014 = vmatpush.bf16.msrb.mxu0 %v1002_v7  ;;  %v996_v13 = vpack.c.bf16 %v986_v6, %v986_v6 }
 0x352   : > { %v1147_v33 = vpop.permute.xlu2 %1146 }
 0x353   : > { %v1005_v15 = vsel %vm577_vm13, %v996_v13, 0 }
 0x354   : > { %1028 = vmatpush.bf16.msrb.mxu1 %v1005_v15  ;;  %1446 = vmatmul.msk.bf16.vlgmr.msrb.gmra.mxu0 %vm997_vm3, %v994_v12 }
 0x355   : > { %1045 = vmatpush.bf16.msra.mxu0 %v1937_v0 }
 0x357   : > { %1447 = vmatmul.msk.bf16.vlgmr.msrb.gmra.mxu1 %vm997_vm3, %v994_v12 }
 0x358   : > { %1059 = vmatpush.bf16.msra.mxu1 %v1939_v58  ;;  %v1082_v58 = vld [vmem:[%s2088_s2 + $0xe8] sm:$0xff] }
 0x359   : > { %v1085_v26 = vpack.c.bf16 %v1083_v23, %v1082_v58 }
 0x35b   : > { %1450 = vmatmul.msk.bf16.vlgmr.msrb.gmra.mxu2 %vm573_vm15, %v1085_v26  ;;  %1452 = vmatmul.msk.bf16.vlgmr.msrb.gmra.mxu3 %vm573_vm15, %v1085_v26 }
 0x364   : > { %1448 = vmatmul.msk.bf16.vlgmr.msra.gmra.mxu0 %vm816_vm4, %v989_v18 }
 0x367   : > { %1449 = vmatmul.msk.bf16.vlgmr.msra.gmra.mxu1 %vm816_vm4, %v989_v18 }
 0x36b   : > { %1451 = vmatmul.msk.bf16.gmra.mxu2 %vm573_vm15, %v1086_v30  ;;  %1453 = vmatmul.msk.bf16.gmra.mxu3 %vm573_vm15, %v1086_v30 }
 0x3d1   : > { %v1016_v0 = vpop.f32.mrf.mxu0 }
 0x3d4   : > { %v1030_v19 = vpop.f32.mrf.mxu1 }
 0x3d9   : > { %v1018_v36 = vpop.f32.mrf.mxu0 }
 0x3dc   : > { %v1032_v39 = vpop.f32.mrf.mxu1 }
 0x3de   : > { %v1112_v24 = vpop.f32.mrf.mxu2  ;;  %v1130_v25 = vpop.f32.mrf.mxu3 }
 0x3e1   : > { %v1047_v48 = vpop.f32.mrf.mxu0 }
 0x3e2   : > { %v1048_v49 = vadd.f32 %v1047_v48, %v1016_v0 }
 0x3e4   : > { %v1078_v54 = vadd.f32 %v1071_v52, %v1048_v49  ;;  %v1061_v55 = vpop.f32.mrf.mxu1 }
 0x3e5   : > { %v1062_v57 = vadd.f32 %v1061_v55, %v1030_v19 }
 0x3e6   : > { %1222 = vst [vmem:[%s2032_s30] sm:$0xff] %v1078_v54  ;;  %v1114_v27 = vpop.f32.mrf.mxu2  ;;  %v1132_v28 = vpop.f32.mrf.mxu3 }
 0x3e7   : > { %v1079_v43 = vadd.f32 %v1071_v52, %v1062_v57 }
 0x3e9   : > { %1223 = vst [vmem:[%s2032_s30 + $0x8] sm:$0xff] %v1079_v43  ;;  %v1049_v62 = vpop.f32.mrf.mxu0 }
 0x3ea   : > { %v1050_v56 = vadd.f32 %v1049_v62, %v1018_v36 }
 0x3ec   : > { %v1063_v63 = vpop.f32.mrf.mxu1  ;;  %v1080_v45 = vadd.f32 %v1076_v32, %v1050_v56 }
 0x3ed   : > { %v1064_v1 = vadd.f32 %v1063_v63, %v1032_v39  ;;  %v1258_v52 = vld [vmem:[%s2032_s30] sm:$0xff] (%p1633_p5) }
 0x3ee   : > { %v1141_v47 = vpack.c.bf16 %v1080_v45, %v1078_v54  ;;  %1224 = vst [vmem:[%s2032_s30 + $0x10] sm:$0xff] %v1080_v45  ;;  %v1117_v29 = vpop.f32.mrf.mxu2  ;;  %v1135_v31 = vpop.f32.mrf.mxu3 }
 0x3ef   : > { %v1081_v20 = vadd.f32 %v1076_v32, %v1064_v1  ;;  %1259 = vst [vmem:[%s1245_s11] sm:$0xff] (%p1633_p5), %v1258_v52 }
 0x3f0   : > { %1159 = vmatpush.bf16.msrb.mxu0 %v1141_v47  ;;  %v1260_v54 = vld [vmem:[%s2032_s30 + $0x8] sm:$0xff] (%p1633_p5) }
 0x3f1   : > { %v1142_v22 = vpack.c.bf16 %v1081_v20, %v1079_v43  ;;  %1225 = vst [vmem:[%s2032_s30 + $0x18] sm:$0xff] %v1081_v20 }
 0x3f2   : > { %1261 = vst [vmem:[%s1245_s11 + $0x8] sm:$0xff] (%p1633_p5), %v1260_v54 }
 0x3f3   : > { %1172 = vmatpush.bf16.msrb.mxu1 %v1142_v22  ;;  %1454 = vmatmul.msk.bf16.vlgmr.msrb.gmra.mxu0 %vm816_vm4, %v1140_v21 }
 0x3f5   : > { %v1262_v55 = vld [vmem:[%s2032_s30 + $0x10] sm:$0xff] (%p1633_p5) }
 0x3f6   : > { %1455 = vmatmul.msk.bf16.vlgmr.msrb.gmra.mxu1 %vm816_vm4, %v1140_v21  ;;  %v1119_v40 = vpop.f32.mrf.mxu2  ;;  %v1137_v41 = vpop.f32.mrf.mxu3  ;;  %1263 = vst [vmem:[%s1245_s11 + $0x30] sm:$0xff] (%p1633_p5), %v1262_v55 }
 0x3f8   : > { %v1264_v57 = vld [vmem:[%s2032_s30 + $0x18] sm:$0xff] (%p1633_p5) }
 0x3f9   : > { %1265 = vst [vmem:[%s1245_s11 + $0x38] sm:$0xff] (%p1633_p5), %v1264_v57 }
 0x470   : > { %v1161_v34 = vpop.f32.mrf.mxu0 }
 0x471   : > { %v1162_v35 = vadd.f32 %v1161_v34, %v1147_v33 }
 0x473   : > { %v1456_v37 = vmul.f32 -1.442695, %v1162_v35  ;;  %v1174_v59 = vpop.f32.mrf.mxu1 }
 0x474   : > { %v1175_v38 = vadd.f32 %v1174_v59, %v1147_v33 }
 0x475   : > { %1540 = vpow2.f32 %v1456_v37 }
 0x476   : > { %v1457_v61 = vmul.f32 -1.442695, %v1175_v38 }
 0x478   : > { %1542 = vpow2.f32 %v1457_v61  ;;  %v1163_v44 = vpop.f32.mrf.mxu0 }
 0x47b   : > { %v1541_v50 = vpop.eup %1540  ;;  %v1176_v53 = vpop.f32.mrf.mxu1 }
 0x47c   : > { %v1184_v46 = vadd.f32 1.0, %v1541_v50 }
 0x47e   : > { %v1543_v42 = vpop.eup %1542  ;;  %1544 = vrcp.f32 %v1184_v46  ;;  %v1197_v2 = vand.u32 2147483648, %v1184_v46  ;;  %v1195_v5 = vand.u32 2147483647, %v1184_v46  ;;  %vm1191_vm15 = vweird.f32 %v1184_v46 }
 0x47f   : > { %v1185_v14 = vadd.f32 1.0, %v1543_v42 }
 0x480   : > { %v1198_v13 = vor.u32 1.1754944e-38, %v1197_v2  ;;  %vm1196_vm6 = vcmp.eq.f32.partialorder %v1195_v5, 8.507059e+37 }
 0x481   : > { %1546 = vrcp.f32 %v1185_v14  ;;  %v1212_v12 = vand.u32 2147483648, %v1185_v14  ;;  %v1210_v16 = vand.u32 2147483647, %v1185_v14  ;;  %vm1206_vm7 = vweird.f32 %v1185_v14 }
 0x483   : > { %v1213_v58 = vor.u32 1.1754944e-38, %v1212_v12  ;;  %vm1211_vm9 = vcmp.eq.f32.partialorder %v1210_v16, 8.507059e+37 }
 0x484   : > { %v1545_v8 = vpop.eup %1544 }
 0x485   : > { %v1187_v10 = vmul.f32 %v1545_v8, %v1184_v46  ;;  %vm1192_vm13 = vweird.f32 %v1545_v8 }
 0x486   : > { %vm1193_vm4 = vmor %vm1191_vm15, %vm1192_vm13 }
 0x487   : > { %v1547_v11 = vpop.eup %1546  ;;  %v1188_v9 = vsub.f32 1.0, %v1187_v10 }
 0x488   : > { %v1202_v4 = vmul.f32 %v1547_v11, %v1185_v14  ;;  %vm1207_vm5 = vweird.f32 %v1547_v11 }
 0x489   : > { %v1189_v3 = vmul.f32 %v1545_v8, %v1188_v9  ;;  %vm1208_vm8 = vmor %vm1206_vm7, %vm1207_vm5 }
 0x48a   : > { %v1203_v6 = vsub.f32 1.0, %v1202_v4 }
 0x48b   : > { %v1190_v7 = vadd.f32 %v1545_v8, %v1189_v3 }
 0x48c   : > { %v1204_v15 = vmul.f32 %v1547_v11, %v1203_v6 }
 0x48d   : > { %v1194_v17 = vsel %vm1193_vm4, %v1545_v8, %v1190_v7 }
 0x48e   : > { %v1199_v18 = vsel %vm1196_vm6, %v1198_v13, %v1194_v17  ;;  %v1205_v0 = vadd.f32 %v1547_v11, %v1204_v15 }
 0x48f   : > { %v1216_v19 = vmul.f32 %v1199_v18, %v1112_v24  ;;  %v1218_v23 = vmul.f32 %v1199_v18, %v1114_v27  ;;  %v1220_v26 = vmul.f32 %v1199_v18, %v1117_v29 }
 0x490   : > { %v1209_v36 = vsel %vm1208_vm8, %v1547_v11, %v1205_v0 }
 0x491   : > { %1226 = vst [vmem:[%s2046_s13] sm:$0xff] %v1216_v19  ;;  %v1214_v39 = vsel %vm1211_vm9, %v1213_v58, %v1209_v36 }
 0x492   : > { %v1217_v48 = vmul.f32 %v1214_v39, %v1130_v25  ;;  %1228 = vst [vmem:[%s2046_s13 + $0x10] sm:$0xff] %v1218_v23  ;;  %v1219_v49 = vmul.f32 %v1214_v39, %v1132_v28  ;;  %v1221_v51 = vmul.f32 %v1214_v39, %v1135_v31  ;;  %1242 = sbr.rel (!%p1633_p5) target bundleno = 1175 (0x497), region = 82 }
 0x493   : > { %1230 = vst [vmem:[%s2046_s13 + $0x20] sm:$0xff] %v1220_v26 }
 0x494   : > { %1227 = vst [vmem:[%s2046_s13 + $0x8] sm:$0xff] %v1217_v48 }
 0x495   : > { %1229 = vst [vmem:[%s2046_s13 + $0x18] sm:$0xff] %v1219_v49 }
 0x496   : > { %1231 = vst [vmem:[%s2046_s13 + $0x28] sm:$0xff] %v1221_v51 }
 0x497 PF: > { %1271 = sbr.rel (!%p1633_p5) target bundleno = 1183 (0x49f), region = 105  ;;  %s1468_s12 = sshll.u32 (%p1633_p5), %s1614_s18, 4 }
 0x498   : > { %v1287_v30 = vld [vmem:[%s2046_s13] sm:$0xff] (%p1633_p5)  ;;  %s1274_s15 = scalar_lea.vmem (%p1633_p5), %s2090_s4, %s1468_s12 }
 0x499   : > { %v1291_v62 = vld [vmem:[%s2046_s13 + $0x10] sm:$0xff] (%p1633_p5)  ;;  %1288 = vst [vmem:[%s1274_s15] sm:$0xff] (%p1633_p5), %v1287_v30 }
 0x49a   : > { %v1295_v32 = vld [vmem:[%s2046_s13 + $0x20] sm:$0xff] (%p1633_p5)  ;;  %1292 = vst [vmem:[%s1274_s15 + $0x30] sm:$0xff] (%p1633_p5), %v1291_v62 }
 0x49b   : > { %v1289_v43 = vld [vmem:[%s2046_s13 + $0x8] sm:$0xff] (%p1633_p5)  ;;  %1296 = vst [vmem:[%s1274_s15 + $0x60] sm:$0xff] (%p1633_p5), %v1295_v32 }
 0x49c   : > { %v1293_v56 = vld [vmem:[%s2046_s13 + $0x18] sm:$0xff]  ;;  %1290 = vst [vmem:[%s1274_s15 + $0x8] sm:$0xff] %v1289_v43 }
 0x49d   : > { %v1297_v63 = vld [vmem:[%s2046_s13 + $0x28] sm:$0xff]  ;;  %1294 = vst [vmem:[%s1274_s15 + $0x38] sm:$0xff] %v1293_v56 }
 0x49e   : > { %1298 = vst [vmem:[%s1274_s15 + $0x68] sm:$0xff] %v1297_v63 }
 0x49f PF: > { %p12_p10 = scmp.ge.s32.totalorder %s1617_s19, 5   ;;  %s2097_s15 = smov %s1566_s16 }
 0x4a0   : > { %s2098_s16 = smov %s1627_s22  ;;  %s2099_s17 = smov %s1617_s19 }
 0x4a1   :  { %14 = sbr.rel (!%p12_p10) target bundleno = 2 (0x2), region = 179 }

// kernel: gbp_atomwise_interaction.5
= control target key start
LH: loop header
LB: loop body
LE: loop exit
PB: predicated region body
PF: predicated region fallthrough
CT: control target
= control target key end

     0   :  { %s3291_s27 = smov 0   ;;  %s3293_s28 = smov 0   ;;  %s4987_s0 = inlined_call_operand.vmem [shape: f32[16,256], index: 0, kind: input, shape index: {}]   ;;  %s4988_s1 = inlined_call_operand.vmem [shape: f32[24,256], index: 1, kind: input, shape index: {}]   ;;  %s4989_s2 = inlined_call_operand.vmem [shape: f32[16,768], index: 2, kind: input, shape index: {}]   ;;  %s4990_s3 = inlined_call_operand.vmem [shape: f32[24,768], index: 3, kind: input, shape index: {}]   ;;  %s4991_s4 = inlined_call_operand.vmem [shape: s32[768,1], index: 4, kind: input, shape index: {}]   ;;  %s4992_s5 = inlined_call_operand.vmem [shape: f32[1,256], index: 5, kind: input, shape index: {}]   ;;  %s4993_s6 = inlined_call_operand.vmem [shape: f32[488,128], index: 6, kind: input, shape index: {}]   ;;  %s4994_s7 = inlined_call_operand.vmem [shape: f32[16,256], index: 7, kind: output, shape index: {0}]   ;;  %s4995_s8 = inlined_call_operand.vmem [shape: f32[24,256], index: 8, kind: output, shape index: {1}]  }
   0x1   :  { %s3295_s29 = smov 0   ;;  %s3297_s30 = smov 0  }
   0x2   :  { %s3299_s9 = smov 0  }
   0x3 LB: > { %s28_s10 = sadd.s32 1, %s3234_s30  ;;  %p97_p1 = scmp.ne.s32.totalorder %s3226_s28, %s3222_s27  ;;  %s3238_s9 = sphi %s3299_s9, %s19_s9   ;;  %s3234_s30 = sphi %s3297_s30, %s5243_s30   ;;  %s3230_s29 = sphi %s3295_s29, %s5242_s29   ;;  %s3226_s28 = sphi %s3293_s28, %s5241_s28   ;;  %s3222_s27 = sphi %s3291_s27, %s5240_s27  }
   0x4   : > { %p29_p0 = scmp.ge.s32.totalorder %s28_s10, 3  ;;  %p98_p2 = scmp.eq.s32.totalorder %s3238_s9, 0 }
   0x5   : > { %s90_s13 = sadd.s32 1, %s3226_s28  ;;  %p2748_p5 = scmp.ge.s32.totalorder %s3238_s9, 3 }
   0x6   : > { %s5245_s10 = smov (%p29_p0, %s28_s10), 0  ;;  %p3322_p3 = por %p98_p2, %p97_p1 }
   0x7   : > { %s87_s12 = ssub.s32 %s3234_s30, %s5245_s10  ;;  %303 = sbr.rel (%p2748_p5) target bundleno = 30 (0x1e), region = 32 }
   0x8   : > { %p88_p4 = scmp.eq.s32.totalorder %s87_s12, 0 }
   0xa   : > { %s3330_s14 = scalar_select %p88_p4, %s3226_s28, %s90_s13  }
   0xc   : > { %306 = sbr.rel (!%p3322_p3) target bundleno = 20 (0x14), region = 36  ;;  %s308_s15 = sand.u32 (%p3322_p3), 1, %s3226_s28  }
   0xd   : > { %s3026_s16 = sshll.u32 (%p3322_p3), %s3234_s30, 4  ;;  %s2749_s17 = sshll.u32 (%p3322_p3), %s308_s15, 5 }
   0xe   : > { %s313_s20 = scalar_lea.vmem (%p3322_p3), %s4989_s2, %s3026_s16  ;;  %s310_s21 = scalar_lea.vmem (%p3322_p3), [#allocation4], %s2749_s17 }
   0xf   : > { %v326_v0 = vld [vmem:[%s313_s20] sm:$0xff] (%p3322_p3)  ;;  %v328_v1 = vld [vmem:[%s313_s20 + $0x8] sm:$0xff] (%p3322_p3)  ;;  %v330_v2 = vld [vmem:[%s313_s20 + $0x30] sm:$0xff] (%p3322_p3) }
  0x10   : > { %327 = vst [vmem:[%s310_s21] sm:$0xff] (%p3322_p3), %v326_v0  ;;  %v332_v3 = vld [vmem:[%s313_s20 + $0x38] sm:$0xff] (%p3322_p3) }
  0x11   : > { %329 = vst [vmem:[%s310_s21 + $0x8] sm:$0xff] %v328_v1 }
  0x12   : > { %331 = vst [vmem:[%s310_s21 + $0x10] sm:$0xff] %v330_v2 }
  0x13   : > { %333 = vst [vmem:[%s310_s21 + $0x18] sm:$0xff] %v332_v3 }
  0x14 PF: > { %339 = sbr.rel (!%p3322_p3) target bundleno = 30 (0x1e), region = 59  ;;  %s341_s22 = sand.u32 (%p3322_p3), 1, %s3226_s28  }
  0x15   : > { %s3027_s23 = sshll.u32 (%p3322_p3), %s3234_s30, 4  ;;  %s3028_s24 = smul.u32 (%p3322_p3), 48, %s341_s22 }
  0x16   : > { %s346_s12 = scalar_lea.vmem (%p3322_p3), %s4990_s3, %s3027_s23 }
  0x17   : > { %v359_v4 = vld [vmem:[%s346_s12] sm:$0xff] (%p3322_p3)  ;;  %v361_v5 = vld [vmem:[%s346_s12 + $0x8] sm:$0xff] (%p3322_p3)  ;;  %v363_v6 = vld [vmem:[%s346_s12 + $0x30] sm:$0xff] (%p3322_p3)  ;;  %s343_s13 = scalar_lea.vmem (%p3322_p3), [#allocation5], %s3028_s24 }
  0x18   : > { %360 = vst [vmem:[%s343_s13] sm:$0xff] (%p3322_p3), %v359_v4  ;;  %v365_v7 = vld [vmem:[%s346_s12 + $0x38] sm:$0xff] (%p3322_p3)  ;;  %v367_v8 = vld [vmem:[%s346_s12 + $0x60] sm:$0xff] (%p3322_p3)  ;;  %v369_v9 = vld [vmem:[%s346_s12 + $0x68] sm:$0xff] (%p3322_p3) }
  0x19   : > { %362 = vst [vmem:[%s343_s13 + $0x8] sm:$0xff] %v361_v5 }
  0x1a   : > { %364 = vst [vmem:[%s343_s13 + $0x10] sm:$0xff] %v363_v6 }
  0x1b   : > { %366 = vst [vmem:[%s343_s13 + $0x18] sm:$0xff] %v365_v7 }
  0x1c   : > { %368 = vst [vmem:[%s343_s13 + $0x20] sm:$0xff] %v367_v8 }
  0x1d   : > { %370 = vst [vmem:[%s343_s13 + $0x28] sm:$0xff] %v369_v9 }
  0x1e PF: > { %p2754_p6 = scmp.ge.s32.totalorder %s3238_s9, 1  ;;  %p384_p7 = scmp.lt.s32.totalorder %s3238_s9, 4 }
  0x20   : > { %p385_p8 = pnand %p2754_p6, %p384_p7 }
  0x21   : > { %s391_s11 = sand.u32 (!%p385_p8), 1, %s3222_s27   ;;  %s2756_s15 = sshll.u32 (!%p385_p8), %s3230_s29, 5 }
  0x22   : > { %388 = sbr.rel (%p385_p8) target bundleno = 1667 (0x683), region = 86  ;;  %s2755_s16 = sshll.u32 (!%p385_p8), %s391_s11, 5 }
  0x23   : > { %s3029_s17 = smul.u32 (!%p385_p8), 48, %s391_s11  ;;  %p474_p9 = scmp.lt.s32.totalorder (!%p385_p8), %s2756_s15, 95 }
  0x24   : > { %s3356_s22 = scalar_lea.vmem (!%p385_p8), [#allocation4], %s2755_s16  ;;  %p2758_p10 = scmp.ne.s32.totalorder (!%p385_p8), %s3230_s29, 0 }
  0x25   : > { %s3358_s23 = scalar_lea.vmem (!%p385_p8), [#allocation5], %s3029_s17 }
  0x27   : > { %s5247_s15 = smov (!%p474_p9, %s2756_s15), 95  ;;  %500 = sbr.rel (%p2758_p10) target bundleno = 55 (0x37), region = 98 }
  0x28   : > { %s2757_s18 = sshll.u32 %s5247_s15, 3 }
  0x29   : > { %s3354_s21 = scalar_lea.vmem %s4991_s4, %s2757_s18 }
  0x2c   : > { %v3240_v10 = vmov 0.0  }
  0x2d   : > { %501 = vst [vmem:[#allocation2 + $0x10] sm:$0xff] %v3240_v10 }
  0x2e   : > { %502 = vst [vmem:[#allocation2] sm:$0xff] %v3240_v10 }
  0x2f   : > { %503 = vst [vmem:[#allocation2 + $0x18] sm:$0xff] %v3240_v10 }
  0x30   : > { %504 = vst [vmem:[#allocation2 + $0x8] sm:$0xff] %v3240_v10 }
  0x31   : > { %505 = vst [vmem:[#allocation3] sm:$0xff] %v3240_v10 }
  0x32   : > { %506 = vst [vmem:[#allocation3 + $0x8] sm:$0xff] %v3240_v10 }
  0x33   : > { %507 = vst [vmem:[#allocation3 + $0x10] sm:$0xff] %v3240_v10 }
  0x34   : > { %508 = vst [vmem:[#allocation3 + $0x28] sm:$0xff] %v3240_v10 }
  0x35   : > { %509 = vst [vmem:[#allocation3 + $0x20] sm:$0xff] %v3240_v10 }
  0x36   : > { %510 = vst [vmem:[#allocation3 + $0x18] sm:$0xff] %v3240_v10 }
  0x37 PF: > { %v548_v11 = vld [vmem:[%s3354_s21 + $0xf0] sm:$0xff]  ;;  %v530_v13 = vld [vmem:[%s3354_s21 + $0x60] sm:$0xff]  ;;  %v3241_v14 = vmov 0   ;;  %v549_v15 = vld [vmem:[%s3354_s21 + $0xf8] sm:$0xff]  ;;  %v512_v46 = vlaneseq  ;;  %v3242_v57 = vmov 1.0|1.0  }
  0x38   : > { %v532_v12 = vld [vmem:[%s3354_s21 + $0x70] sm:$0xff]  ;;  %3078 = vset.pattern.permute.xlu2 %v3241_v14  ;;  %3077 = vset.pattern.permute.xlu1 %v3241_v14  ;;  %v533_v16 = vld [vmem:[%s3354_s21 + $0x78] sm:$0xff]  ;;  %v531_v17 = vld [vmem:[%s3354_s21 + $0x68] sm:$0xff]  ;;  %v5041_v59 = vmov 0  ;;  %v5047_v0 = vmov 0  ;;  %v5049_v2 = vmov 0 }
  0x39   : > { %3076 = vset.pattern.permute.xlu0 %v3241_v14  ;;  %641 = vperm.xlu1 %3077, %v548_v11   ;;  %v547_v18 = vld [vmem:[%s3354_s21 + $0xe8] sm:$0xff]  ;;  %v546_v19 = vld [vmem:[%s3354_s21 + $0xe0] sm:$0xff]  ;;  %v528_v20 = vld [vmem:[%s3354_s21 + $0x50] sm:$0xff]  ;;  %v3393_v50 = vand.u32 127, %v512_v46  ;;  %v5051_v5 = vmov 0  ;;  %v5055_v7 = vmov 0 }
  0x3a   : > { %593 = vperm.xlu0 %3076, %v532_v12   ;;  %587 = vperm.xlu2 %3078, %v530_v13   ;;  %v544_v21 = vld [vmem:[%s3354_s21 + $0xd0] sm:$0xff]  ;;  %v529_v22 = vld [vmem:[%s3354_s21 + $0x58] sm:$0xff]  ;;  %v527_v24 = vld [vmem:[%s3354_s21 + $0x48] sm:$0xff]  ;;  %v5057_v8 = vmov 0  ;;  %v5059_v12 = vmov 0  ;;  %v5061_v13 = vmov 0 }
  0x3b   : > { %v545_v23 = vld [vmem:[%s3354_s21 + $0xd8] sm:$0xff]  ;;  %v542_v25 = vld [vmem:[%s3354_s21 + $0xc0] sm:$0xff]  ;;  %v524_v27 = vld [vmem:[%s3354_s21 + $0x30] sm:$0xff]  ;;  %v3396_v51 = vadd.s32 128, %v3393_v50  ;;  %p2951_p11 = scmp.ne.s32.totalorder %s3230_s29, 2 }
  0x3c   : > { %v526_v26 = vld [vmem:[%s3354_s21 + $0x40] sm:$0xff]  ;;  %v543_v28 = vld [vmem:[%s3354_s21 + $0xc8] sm:$0xff]  ;;  %v525_v29 = vld [vmem:[%s3354_s21 + $0x38] sm:$0xff] }
  0x3d   : > { %v541_v30 = vld [vmem:[%s3354_s21 + $0xb8] sm:$0xff]  ;;  %v540_v31 = vld [vmem:[%s3354_s21 + $0xb0] sm:$0xff]  ;;  %v522_v32 = vld [vmem:[%s3354_s21 + $0x20] sm:$0xff] }
  0x3e   : > { %v538_v33 = vld [vmem:[%s3354_s21 + $0xa0] sm:$0xff]  ;;  %v523_v34 = vld [vmem:[%s3354_s21 + $0x28] sm:$0xff]  ;;  %v521_v36 = vld [vmem:[%s3354_s21 + $0x18] sm:$0xff] }
  0x3f   : > { %v539_v35 = vld [vmem:[%s3354_s21 + $0xa8] sm:$0xff]  ;;  %v536_v37 = vld [vmem:[%s3354_s21 + $0x90] sm:$0xff]  ;;  %v518_v39 = vld [vmem:[%s3354_s21] sm:$0xff] }
  0x40   : > { %v520_v38 = vld [vmem:[%s3354_s21 + $0x10] sm:$0xff]  ;;  %v537_v40 = vld [vmem:[%s3354_s21 + $0x98] sm:$0xff]  ;;  %v519_v41 = vld [vmem:[%s3354_s21 + $0x8] sm:$0xff] }
  0x41   : > { %644 = vperm.xlu1 %3077, %v549_v15   ;;  %v535_v42 = vld [vmem:[%s3354_s21 + $0x88] sm:$0xff]  ;;  %v534_v43 = vld [vmem:[%s3354_s21 + $0x80] sm:$0xff] }
  0x42   : > { %596 = vperm.xlu0 %3076, %v533_v16   ;;  %590 = vperm.xlu2 %3078, %v531_v17   ;;  %v5063_v17 = vmov 0  ;;  %v952_v55 = vld [vmem:[%s3358_s23 + $0x10] sm:$0xff]  ;;  %v951_v58 = vld [vmem:[%s3358_s23 + $0x8] sm:$0xff]  ;;  %v954_v61 = vld [vmem:[%s3358_s23 + $0x20] sm:$0xff] }
  0x49   : > { %638 = vperm.xlu1 %3077, %v547_v18   ;;  %v5065_v18 = vmov 0 }
  0x4a   : > { %635 = vperm.xlu0 %3076, %v546_v19   ;;  %581 = vperm.xlu2 %3078, %v528_v20   ;;  %v5067_v19 = vmov 0  ;;  %v5069_v20 = vmov 0 }
  0x51   : > { %629 = vperm.xlu1 %3077, %v544_v21  }
  0x52   : > { %584 = vperm.xlu0 %3076, %v529_v22   ;;  %632 = vperm.xlu2 %3078, %v545_v23  }
  0x59   : > { %578 = vperm.xlu1 %3077, %v527_v24   ;;  %v5071_v24 = vmov 0 }
  0x5a   : > { %623 = vperm.xlu2 %3078, %v542_v25   ;;  %575 = vperm.xlu0 %3076, %v526_v26   ;;  %v5073_v25 = vmov 0 }
  0x61   : > { %569 = vperm.xlu1 %3077, %v524_v27  }
  0x62   : > { %626 = vperm.xlu0 %3076, %v543_v28   ;;  %572 = vperm.xlu2 %3078, %v525_v29   ;;  %v5075_v28 = vmov 0  ;;  %v5077_v29 = vmov 0 }
  0x69   : > { %620 = vperm.xlu1 %3077, %v541_v30  }
  0x6a   : > { %617 = vperm.xlu0 %3076, %v540_v31   ;;  %563 = vperm.xlu2 %3078, %v522_v32   ;;  %v5079_v31 = vmov 0  ;;  %v5081_v32 = vmov 0 }
  0x71   : > { %611 = vperm.xlu1 %3077, %v538_v33  }
  0x72   : > { %566 = vperm.xlu0 %3076, %v523_v34   ;;  %614 = vperm.xlu2 %3078, %v539_v35   ;;  %v5083_v35 = vmov 0 }
  0x79   : > { %560 = vperm.xlu1 %3077, %v521_v36   ;;  %v5085_v36 = vmov 0 }
  0x7a   : > { %605 = vperm.xlu2 %3078, %v536_v37   ;;  %557 = vperm.xlu0 %3076, %v520_v38  }
  0x81   : > { %551 = vperm.xlu1 %3077, %v518_v39  }
  0x82   : > { %608 = vperm.xlu0 %3076, %v537_v40   ;;  %554 = vperm.xlu2 %3078, %v519_v41   ;;  %v714_v40 = vld [vmem:[%s3356_s22] sm:$0xff]  ;;  %v716_v41 = vld [vmem:[%s3356_s22 + $0x10] sm:$0xff] }
  0x89   : > { %602 = vperm.xlu1 %3077, %v535_v42  }
  0x8a   : > { %599 = vperm.xlu0 %3076, %v534_v43  }
  0x94   : > { %v588_v44 = vpop.permute.xlu2 %587 }
  0x95   : > { %vm670_vm9 = vcmp.eq.s32.totalorder %v588_v44, %v3393_v50  ;;  %vm671_vm13 = vcmp.eq.s32.totalorder %v588_v44, %v3396_v51 }
  0x9c   : > { %v591_v45 = vpop.permute.xlu2 %590 }
  0x9d   : > { %vm672_vm10 = vcmp.eq.s32.totalorder %v591_v45, %v3393_v50  ;;  %vm673_vm14 = vcmp.eq.s32.totalorder %v591_v45, %v3396_v51  ;;  %v718_v45 = vpack.c.bf16 %v716_v41, %v714_v40  ;;  %v948_v41 = vld [vmem:[#allocation3 + $0x20] sm:$0xff] }
  0xa4   : > { %v582_v47 = vpop.permute.xlu2 %581 }
  0xab   : > { %v642_v48 = vpop.permute.xlu1 %641 }
  0xac   : > { %v594_v49 = vpop.permute.xlu0 %593  ;;  %vm706_vm0 = vcmp.eq.s32.totalorder %v642_v48, %v3393_v50  ;;  %v633_v54 = vpop.permute.xlu2 %632  ;;  %vm707_vm12 = vcmp.eq.s32.totalorder %v642_v48, %v3396_v51 }
  0xad   : > { %vm674_vm2 = vcmp.eq.s32.totalorder %v594_v49, %v3393_v50  ;;  %vm675_vm8 = vcmp.eq.s32.totalorder %v594_v49, %v3396_v51  ;;  %v715_v49 = vld [vmem:[%s3356_s22 + $0x8] sm:$0xff] }
  0xb3   : > { %v645_v52 = vpop.permute.xlu1 %644 }
  0xb4   : > { %v597_v53 = vpop.permute.xlu0 %596  ;;  %vm708_vm1 = vcmp.eq.s32.totalorder %v645_v52, %v3393_v50  ;;  %vm709_vm6 = vcmp.eq.s32.totalorder %v645_v52, %v3396_v51  ;;  %v624_v1 = vpop.permute.xlu2 %623  ;;  %v717_v52 = vld [vmem:[%s3356_s22 + $0x18] sm:$0xff] }
  0xb5   : > { %vm676_vm3 = vcmp.eq.s32.totalorder %v597_v53, %v3393_v50  ;;  %vm3402_vm4 = vmpackc.low %vm708_vm1, %vm706_vm0  ;;  %vm677_vm5 = vcmp.eq.s32.totalorder %v597_v53, %v3396_v51 }
  0xb6   : > { %vm3408_vm7 = vmpackc.low %vm676_vm3, %vm674_vm2  ;;  %2840 = vmatpush.bf16.msk.msra.mxu1 %vm3402_vm4, %v3242_v57 }
  0xb7   : > { %2824 = vmatpush.bf16.msk.msra.mxu0 %vm3408_vm7, %v3242_v57  ;;  %vm3421_vm11 = vmpackc.low %vm677_vm5, %vm675_vm8 }
  0xb8   : > { %2856 = vmatpush.bf16.msk.msra.mxu2 %vm3421_vm11, %v3242_v57  ;;  %vm3431_vm15 = vmpackc.low %vm709_vm6, %vm707_vm12 }
  0xb9   : > { %v5042_v59 = vsel %vm3431_vm15, 4294967295, %v5041_v59  ;;  %2872 = vmatpush.bf16.msk.msra.mxu3 %vm3431_vm15, %v3242_v57  ;;  %vm3438_vm0 = vmpackc.low %vm672_vm10, %vm670_vm9  ;;  %vm700_vm10 = vcmp.eq.s32.totalorder %v633_v54, %v3393_v50 }
  0xba   : > { %vm3445_vm1 = vmpackc.low %vm673_vm14, %vm671_vm13  ;;  %vm666_vm13 = vcmp.eq.s32.totalorder %v582_v47, %v3393_v50 }
  0xbb   : > { %2826 = vmatpush.bf16.msk.msra.mxu0 %vm3438_vm0, %v3242_v57  ;;  %v639_v62 = vpop.permute.xlu1 %638 }
  0xbc   : > { %2858 = vmatpush.bf16.msk.msra.mxu2 %vm3445_vm1, %v3242_v57  ;;  %vm704_vm2 = vcmp.eq.s32.totalorder %v639_v62, %v3393_v50  ;;  %vm705_vm3 = vcmp.eq.s32.totalorder %v639_v62, %v3396_v51  ;;  %v636_v63 = vpop.permute.xlu0 %635  ;;  %v573_v9 = vpop.permute.xlu2 %572  ;;  %v958_v62 = vpack.c.bf16 %v954_v61, %v954_v61 }
  0xbd   : > { %vm702_vm5 = vcmp.eq.s32.totalorder %v636_v63, %v3393_v50  ;;  %vm703_vm6 = vcmp.eq.s32.totalorder %v636_v63, %v3396_v51  ;;  %v955_v63 = vld [vmem:[%s3358_s23 + $0x28] sm:$0xff] }
  0xbe   : > { %vm3456_vm8 = vmpackc.low %vm704_vm2, %vm702_vm5 }
  0xbf   : > { %v5048_v0 = vsel %vm3456_vm8, 4294967295, %v5047_v0  ;;  %2842 = vmatpush.bf16.msk.msra.mxu1 %vm3456_vm8, %v3242_v57  ;;  %vm3463_vm9 = vmpackc.low %vm705_vm3, %vm703_vm6  ;;  %vm667_vm6 = vcmp.eq.s32.totalorder %v582_v47, %v3396_v51  ;;  %vm701_vm8 = vcmp.eq.s32.totalorder %v633_v54, %v3396_v51 }
  0xc0   : > { %v5050_v2 = vsel %vm3463_vm9, 4294967295, %v5049_v2  ;;  %2874 = vmatpush.bf16.msk.msra.mxu3 %vm3463_vm9, %v3242_v57 }
  0xc3   : > { %v630_v3 = vpop.permute.xlu1 %629 }
  0xc4   : > { %vm698_vm12 = vcmp.eq.s32.totalorder %v630_v3, %v3393_v50  ;;  %v585_v4 = vpop.permute.xlu0 %584  ;;  %vm699_vm14 = vcmp.eq.s32.totalorder %v630_v3, %v3396_v51  ;;  %v564_v14 = vpop.permute.xlu2 %563 }
  0xc5   : > { %vm668_vm2 = vcmp.eq.s32.totalorder %v585_v4, %v3393_v50  ;;  %vm669_vm3 = vcmp.eq.s32.totalorder %v585_v4, %v3396_v51  ;;  %vm3476_vm5 = vmpackc.low %vm700_vm10, %vm698_vm12 }
  0xc6   : > { %v5052_v5 = vsel %vm3476_vm5, 4294967295, %v5051_v5  ;;  %vm3481_vm9 = vmpackc.low %vm668_vm2, %vm666_vm13  ;;  %2844 = vmatpush.bf16.msk.msra.mxu1 %vm3476_vm5, %v3242_v57 }
  0xc7   : > { %2828 = vmatpush.bf16.msk.msra.mxu0 %vm3481_vm9, %v3242_v57  ;;  %vm3492_vm10 = vmpackc.low %vm669_vm3, %vm667_vm6 }
  0xc8   : > { %v5056_v7 = vsel %vm3492_vm10, 4294967295, %v5055_v7  ;;  %2860 = vmatpush.bf16.msk.msra.mxu2 %vm3492_vm10, %v3242_v57  ;;  %vm3499_vm12 = vmpackc.low %vm701_vm8, %vm699_vm14  ;;  %vm660_vm14 = vcmp.eq.s32.totalorder %v573_v9, %v3393_v50  ;;  %vm695_vm10 = vcmp.eq.s32.totalorder %v624_v1, %v3396_v51 }
  0xc9   : > { %v5058_v8 = vsel %vm3499_vm12, 4294967295, %v5057_v8  ;;  %2876 = vmatpush.bf16.msk.msra.mxu3 %vm3499_vm12, %v3242_v57  ;;  %vm694_vm12 = vcmp.eq.s32.totalorder %v624_v1, %v3393_v50 }
  0xcb   : > { %v579_v10 = vpop.permute.xlu1 %578 }
  0xcc   : > { %vm664_vm13 = vcmp.eq.s32.totalorder %v579_v10, %v3393_v50  ;;  %vm665_vm2 = vcmp.eq.s32.totalorder %v579_v10, %v3396_v51  ;;  %v576_v11 = vpop.permute.xlu0 %575  ;;  %v615_v23 = vpop.permute.xlu2 %614  ;;  %v712_v10 = vld [vmem:[#allocation2 + $0x18] sm:$0xff] }
  0xcd   : > { %vm662_vm3 = vcmp.eq.s32.totalorder %v576_v11, %v3393_v50  ;;  %vm663_vm6 = vcmp.eq.s32.totalorder %v576_v11, %v3396_v51 }
  0xce   : > { %vm3510_vm5 = vmpackc.low %vm664_vm13, %vm662_vm3 }
  0xcf   : > { %v5060_v12 = vsel %vm3510_vm5, 4294967295, %v5059_v12  ;;  %2830 = vmatpush.bf16.msk.msra.mxu0 %vm3510_vm5, %v3242_v57  ;;  %vm3517_vm8 = vmpackc.low %vm665_vm2, %vm663_vm6 }
  0xd0   : > { %v5062_v13 = vsel %vm3517_vm8, 4294967295, %v5061_v13  ;;  %2862 = vmatpush.bf16.msk.msra.mxu2 %vm3517_vm8, %v3242_v57  ;;  %vm661_vm8 = vcmp.eq.s32.totalorder %v573_v9, %v3396_v51 }
  0xd3   : > { %v570_v15 = vpop.permute.xlu1 %569 }
  0xd4   : > { %v627_v16 = vpop.permute.xlu0 %626  ;;  %vm658_vm13 = vcmp.eq.s32.totalorder %v570_v15, %v3393_v50  ;;  %vm659_vm3 = vcmp.eq.s32.totalorder %v570_v15, %v3396_v51  ;;  %v606_v30 = vpop.permute.xlu2 %605 }
  0xd5   : > { %vm696_vm2 = vcmp.eq.s32.totalorder %v627_v16, %v3393_v50  ;;  %vm697_vm6 = vcmp.eq.s32.totalorder %v627_v16, %v3396_v51  ;;  %vm3530_vm5 = vmpackc.low %vm660_vm14, %vm658_vm13  ;;  %v713_v16 = vld [vmem:[#allocation2 + $0x8] sm:$0xff] }
  0xd6   : > { %v5064_v17 = vsel %vm3530_vm5, 4294967295, %v5063_v17  ;;  %2832 = vmatpush.bf16.msk.msra.mxu0 %vm3530_vm5, %v3242_v57  ;;  %vm3538_vm15 = vmpackc.low %vm696_vm2, %vm694_vm12  ;;  %vm689_vm5 = vcmp.eq.s32.totalorder %v615_v23, %v3396_v51 }
  0xd7   : > { %v5066_v18 = vsel %vm3538_vm15, 4294967295, %v5065_v18  ;;  %2846 = vmatpush.bf16.msk.msra.mxu1 %vm3538_vm15, %v3242_v57  ;;  %vm3546_vm14 = vmpackc.low %vm661_vm8, %vm659_vm3 }
  0xd8   : > { %v5068_v19 = vsel %vm3546_vm14, 4294967295, %v5067_v19  ;;  %2864 = vmatpush.bf16.msk.msra.mxu2 %vm3546_vm14, %v3242_v57  ;;  %vm3553_vm13 = vmpackc.low %vm697_vm6, %vm695_vm10  ;;  %vm688_vm6 = vcmp.eq.s32.totalorder %v615_v23, %v3393_v50  ;;  %v944_v23 = vld [vmem:[#allocation3] sm:$0xff] }
  0xd9   : > { %v5070_v20 = vsel %vm3553_vm13, 4294967295, %v5069_v20  ;;  %2878 = vmatpush.bf16.msk.msra.mxu3 %vm3553_vm13, %v3242_v57 }
  0xdb   : > { %v621_v21 = vpop.permute.xlu1 %620 }
  0xdc   : > { %v618_v22 = vpop.permute.xlu0 %617  ;;  %vm692_vm12 = vcmp.eq.s32.totalorder %v621_v21, %v3393_v50  ;;  %vm693_vm8 = vcmp.eq.s32.totalorder %v621_v21, %v3396_v51  ;;  %v555_v37 = vpop.permute.xlu2 %554 }
  0xdd   : > { %vm690_vm3 = vcmp.eq.s32.totalorder %v618_v22, %v3393_v50  ;;  %vm691_vm2 = vcmp.eq.s32.totalorder %v618_v22, %v3396_v51 }
  0xde   : > { %vm3564_vm15 = vmpackc.low %vm692_vm12, %vm690_vm3  ;;  %vm654_vm3 = vcmp.eq.s32.totalorder %v564_v14, %v3393_v50 }
  0xdf   : > { %v5072_v24 = vsel %vm3564_vm15, 4294967295, %v5071_v24  ;;  %2848 = vmatpush.bf16.msk.msra.mxu1 %vm3564_vm15, %v3242_v57  ;;  %vm3571_vm10 = vmpackc.low %vm693_vm8, %vm691_vm2 }
  0xe0   : > { %v5074_v25 = vsel %vm3571_vm10, 4294967295, %v5073_v25  ;;  %2880 = vmatpush.bf16.msk.msra.mxu3 %vm3571_vm10, %v3242_v57  ;;  %vm655_vm10 = vcmp.eq.s32.totalorder %v564_v14, %v3396_v51 }
  0xe3   : > { %v612_v26 = vpop.permute.xlu1 %611 }
  0xe4   : > { %vm686_vm12 = vcmp.eq.s32.totalorder %v612_v26, %v3393_v50  ;;  %v567_v27 = vpop.permute.xlu0 %566  ;;  %vm687_vm13 = vcmp.eq.s32.totalorder %v612_v26, %v3396_v51 }
  0xe5   : > { %vm656_vm15 = vcmp.eq.s32.totalorder %v567_v27, %v3393_v50  ;;  %vm657_vm8 = vcmp.eq.s32.totalorder %v567_v27, %v3396_v51  ;;  %vm3584_vm2 = vmpackc.low %vm688_vm6, %vm686_vm12 }
  0xe6   : > { %v5076_v28 = vsel %vm3584_vm2, 4294967295, %v5075_v28  ;;  %vm3589_vm14 = vmpackc.low %vm656_vm15, %vm654_vm3  ;;  %2850 = vmatpush.bf16.msk.msra.mxu1 %vm3584_vm2, %v3242_v57 }
  0xe7   : > { %v5078_v29 = vsel %vm3589_vm14, 4294967295, %v5077_v29  ;;  %2834 = vmatpush.bf16.msk.msra.mxu0 %vm3589_vm14, %v3242_v57  ;;  %vm3600_vm6 = vmpackc.low %vm657_vm8, %vm655_vm10  ;;  %vm683_vm14 = vcmp.eq.s32.totalorder %v606_v30, %v3396_v51 }
  0xe8   : > { %v5080_v31 = vsel %vm3600_vm6, 4294967295, %v5079_v31  ;;  %2866 = vmatpush.bf16.msk.msra.mxu2 %vm3600_vm6, %v3242_v57  ;;  %vm3607_vm15 = vmpackc.low %vm689_vm5, %vm687_vm13 }
  0xe9   : > { %v5082_v32 = vsel %vm3607_vm15, 4294967295, %v5081_v32  ;;  %2882 = vmatpush.bf16.msk.msra.mxu3 %vm3607_vm15, %v3242_v57  ;;  %vm648_vm15 = vcmp.eq.s32.totalorder %v555_v37, %v3393_v50 }
  0xeb   : > { %v561_v33 = vpop.permute.xlu1 %560 }
  0xec   : > { %vm652_vm12 = vcmp.eq.s32.totalorder %v561_v33, %v3393_v50  ;;  %vm653_vm10 = vcmp.eq.s32.totalorder %v561_v33, %v3396_v51  ;;  %v558_v34 = vpop.permute.xlu0 %557 }
  0xed   : > { %vm650_vm3 = vcmp.eq.s32.totalorder %v558_v34, %v3393_v50  ;;  %vm651_vm8 = vcmp.eq.s32.totalorder %v558_v34, %v3396_v51 }
  0xee   : > { %vm3618_vm5 = vmpackc.low %vm652_vm12, %vm650_vm3 }
  0xef   : > { %v5084_v35 = vsel %vm3618_vm5, 4294967295, %v5083_v35  ;;  %2836 = vmatpush.bf16.msk.msra.mxu0 %vm3618_vm5, %v3242_v57  ;;  %vm3625_vm13 = vmpackc.low %vm653_vm10, %vm651_vm8  ;;  %vm682_vm10 = vcmp.eq.s32.totalorder %v606_v30, %v3393_v50 }
  0xf0   : > { %v5086_v36 = vsel %vm3625_vm13, 4294967295, %v5085_v36  ;;  %2868 = vmatpush.bf16.msk.msra.mxu2 %vm3625_vm13, %v3242_v57  ;;  %vm649_vm13 = vcmp.eq.s32.totalorder %v555_v37, %v3396_v51 }
  0xf3   : > { %v552_v38 = vpop.permute.xlu1 %551 }
  0xf4   : > { %v609_v39 = vpop.permute.xlu0 %608  ;;  %vm646_vm12 = vcmp.eq.s32.totalorder %v552_v38, %v3393_v50  ;;  %vm647_vm3 = vcmp.eq.s32.totalorder %v552_v38, %v3396_v51  ;;  %v947_v38 = vld [vmem:[#allocation3 + $0x28] sm:$0xff] }
  0xf5   : > { %vm684_vm8 = vcmp.eq.s32.totalorder %v609_v39, %v3393_v50  ;;  %vm685_vm2 = vcmp.eq.s32.totalorder %v609_v39, %v3396_v51  ;;  %vm3640_vm5 = vmpackc.low %vm648_vm15, %vm646_vm12 }
  0xf6   : > { %2838 = vmatpush.bf16.msk.msra.mxu0 %vm3640_vm5, %v3242_v57  ;;  %vm3648_vm6 = vmpackc.low %vm684_vm8, %vm682_vm10  ;;  %vm5102_vm10 = vnez %v5048_v0  ;;  %vm5104_vm8 = vnez %v5050_v2  ;;  %v959_v0 = vpack.c.bf16 %v955_v63, %v955_v63  ;;  %v710_v2 = vld [vmem:[#allocation2 + $0x10] sm:$0xff] }
  0xf7   : > { %2852 = vmatpush.bf16.msk.msra.mxu1 %vm3648_vm6, %v3242_v57  ;;  %vm3656_vm15 = vmpackc.low %vm649_vm13, %vm647_vm3  ;;  %vm5100_vm3 = vnez %v5042_v59  ;;  %v953_v59 = vld [vmem:[%s3358_s23 + $0x18] sm:$0xff] }
  0xf8   : > { %2870 = vmatpush.bf16.msk.msra.mxu2 %vm3656_vm15, %v3242_v57  ;;  %vm3666_vm12 = vmpackc.low %vm685_vm2, %vm683_vm14  ;;  %v957_v60 = vpack.c.bf16 %v953_v59, %v951_v58 }
  0xf9   : > { %2884 = vmatpush.bf16.msk.msra.mxu3 %vm3666_vm12, %v3242_v57  ;;  %888 = vmatmul.bf16.vlgmr.msra.gmra.mxu0 %v718_v45 }
  0xfa   : > { %2888 = vmatpush.bf16.msk.msrb.mxu0 %vm3408_vm7, %v3242_v57 }
  0xfb   : > { %v603_v47 = vpop.permute.xlu1 %602  ;;  %916 = vmatmul.bf16.vlgmr.msra.gmra.mxu2 %v718_v45 }
  0xfc   : > { %2920 = vmatpush.bf16.msk.msrb.mxu2 %vm3421_vm11, %v3242_v57  ;;  %v600_v48 = vpop.permute.xlu0 %599  ;;  %vm680_vm7 = vcmp.eq.s32.totalorder %v603_v47, %v3393_v50  ;;  %vm681_vm14 = vcmp.eq.s32.totalorder %v603_v47, %v3396_v51 }
  0xfd   : > { %vm678_vm2 = vcmp.eq.s32.totalorder %v600_v48, %v3393_v50  ;;  %vm679_vm13 = vcmp.eq.s32.totalorder %v600_v48, %v3396_v51  ;;  %v719_v50 = vpack.c.bf16 %v717_v52, %v715_v49  ;;  %v950_v51 = vld [vmem:[%s3358_s23] sm:$0xff]  ;;  %v949_v48 = vld [vmem:[#allocation3 + $0x18] sm:$0xff] }
  0xfe   : > { %2890 = vmatpush.bf16.msk.msrb.mxu0 %vm3438_vm0, %v3242_v57  ;;  %vm3688_vm11 = vmpackc.low %vm680_vm7, %vm678_vm2  ;;  %vm5105_vm7 = vnez %v5064_v17  ;;  %vm5107_vm2 = vnez %v5068_v19  ;;  %v956_v56 = vpack.c.bf16 %v952_v55, %v950_v51 }
  0xff   : > { %vm3692_vm0 = vmpackc.low %vm681_vm14, %vm679_vm13  ;;  %2854 = vmatpush.bf16.msk.msra.mxu1 %vm3688_vm11, %v3242_v57  ;;  %vm5106_vm14 = vnez %v5052_v5  ;;  %vm5108_vm13 = vnez %v5058_v8  ;;  %v711_v8 = vld [vmem:[#allocation2] sm:$0xff] }
 0x100   : > { %2922 = vmatpush.bf16.msk.msrb.mxu2 %vm3445_vm1, %v3242_v57  ;;  %2886 = vmatpush.bf16.msk.msra.mxu3 %vm3692_vm0, %v3242_v57  ;;  %vm5099_vm1 = vnez %v5056_v7 }
 0x102   : > { %2892 = vmatpush.bf16.msk.msrb.mxu0 %vm3481_vm9, %v3242_v57  ;;  %902 = vmatmul.bf16.vlgmr.msra.gmra.mxu1 %v719_v50  ;;  %vm5101_vm9 = vnez %v5060_v12 }
 0x103   : > { %2904 = vmatpush.bf16.msk.msrb.mxu1 %vm3402_vm4, %v3242_v57  ;;  %930 = vmatmul.bf16.vlgmr.msra.gmra.mxu3 %v719_v50  ;;  %vm5103_vm4 = vnez %v5062_v13 }
 0x104   : > { %2924 = vmatpush.bf16.msk.msrb.mxu2 %vm5099_vm1, %v3242_v57  ;;  %2936 = vmatpush.bf16.msk.msrb.mxu3 %vm5100_vm3, %v3242_v57  ;;  %vm5109_vm1 = vnez %v5078_v29  ;;  %vm5110_vm3 = vnez %v5066_v18 }
 0x106   : > { %2894 = vmatpush.bf16.msk.msrb.mxu0 %vm5101_vm9, %v3242_v57  ;;  %vm5111_vm9 = vnez %v5080_v31  ;;  %v946_v31 = vld [vmem:[#allocation3 + $0x10] sm:$0xff] }
 0x107   : > { %2906 = vmatpush.bf16.msk.msrb.mxu1 %vm5102_vm10, %v3242_v57  ;;  %vm5112_vm10 = vnez %v5070_v20 }
 0x108   : > { %2926 = vmatpush.bf16.msk.msrb.mxu2 %vm5103_vm4, %v3242_v57  ;;  %2938 = vmatpush.bf16.msk.msrb.mxu3 %vm5104_vm8, %v3242_v57  ;;  %vm5113_vm4 = vnez %v5084_v35  ;;  %vm5114_vm8 = vnez %v5072_v24 }
 0x10a   : > { %2896 = vmatpush.bf16.msk.msrb.mxu0 %vm5105_vm7, %v3242_v57  ;;  %vm5115_vm7 = vnez %v5086_v36 }
 0x10b   : > { %2908 = vmatpush.bf16.msk.msrb.mxu1 %vm5106_vm14, %v3242_v57  ;;  %vm5116_vm14 = vnez %v5074_v25 }
 0x10c   : > { %2928 = vmatpush.bf16.msk.msrb.mxu2 %vm5107_vm2, %v3242_v57  ;;  %2940 = vmatpush.bf16.msk.msrb.mxu3 %vm5108_vm13, %v3242_v57  ;;  %vm5117_vm2 = vnez %v5076_v28  ;;  %vm5118_vm13 = vnez %v5082_v32  ;;  %v945_v28 = vld [vmem:[#allocation3 + $0x8] sm:$0xff] }
 0x10e   : > { %2898 = vmatpush.bf16.msk.msrb.mxu0 %vm5109_vm1, %v3242_v57 }
 0x10f   : > { %2910 = vmatpush.bf16.msk.msrb.mxu1 %vm5110_vm3, %v3242_v57 }
 0x110   : > { %2930 = vmatpush.bf16.msk.msrb.mxu2 %vm5111_vm9, %v3242_v57  ;;  %2942 = vmatpush.bf16.msk.msrb.mxu3 %vm5112_vm10, %v3242_v57 }
 0x112   : > { %2900 = vmatpush.bf16.msk.msrb.mxu0 %vm5113_vm4, %v3242_v57 }
 0x113   : > { %2912 = vmatpush.bf16.msk.msrb.mxu1 %vm5114_vm8, %v3242_v57 }
 0x114   : > { %2932 = vmatpush.bf16.msk.msrb.mxu2 %vm5115_vm7, %v3242_v57  ;;  %2944 = vmatpush.bf16.msk.msrb.mxu3 %vm5116_vm14, %v3242_v57 }
 0x116   : > { %2902 = vmatpush.bf16.msk.msrb.mxu0 %vm3640_vm5, %v3242_v57 }
 0x117   : > { %2914 = vmatpush.bf16.msk.msrb.mxu1 %vm5117_vm2, %v3242_v57 }
 0x118   : > { %2934 = vmatpush.bf16.msk.msrb.mxu2 %vm3656_vm15, %v3242_v57  ;;  %2946 = vmatpush.bf16.msk.msrb.mxu3 %vm5118_vm13, %v3242_v57 }
 0x119   : > { %968 = vmatmul.bf16.vlgmr.msrb.gmra.mxu0 %v956_v56 }
 0x11b   : > { %1004 = vmatmul.bf16.vlgmr.msrb.gmra.mxu2 %v956_v56  ;;  %2916 = vmatpush.bf16.msk.msrb.mxu1 %vm3648_vm6, %v3242_v57 }
 0x11c   : > { %2948 = vmatpush.bf16.msk.msrb.mxu3 %vm3666_vm12, %v3242_v57 }
 0x11f   : > { %2918 = vmatpush.bf16.msk.msrb.mxu1 %vm3688_vm11, %v3242_v57 }
 0x120   : > { %2950 = vmatpush.bf16.msk.msrb.mxu3 %vm3692_vm0, %v3242_v57 }
 0x122   : > { %986 = vmatmul.bf16.vlgmr.msrb.gmra.mxu1 %v957_v60 }
 0x123   : > { %1022 = vmatmul.bf16.vlgmr.msrb.gmra.mxu3 %v957_v60 }
 0x129   : > { %973 = vmatmul.bf16.gmra.mxu0 %v958_v62 }
 0x12b   : > { %1009 = vmatmul.bf16.gmra.mxu2 %v958_v62 }
 0x132   : > { %991 = vmatmul.bf16.gmra.mxu1 %v959_v0 }
 0x133   : > { %1027 = vmatmul.bf16.gmra.mxu3 %v959_v0 }
 0x176   : > { %v889_v1 = vpop.f32.mrf.mxu0 }
 0x17e   : > { %v917_v6 = vpop.f32.mrf.mxu2  ;;  %v891_v7 = vpop.f32.mrf.mxu0 }
 0x17f   : > { %v903_v3 = vpop.f32.mrf.mxu1 }
 0x180   : > { %v904_v4 = vadd.f32 %v903_v3, %v889_v1 }
 0x182   : > { %v936_v5 = vadd.f32 %v904_v4, %v710_v2 }
 0x184   : > { %940 = vst [vmem:[#allocation2 + $0x10] sm:$0xff] %v936_v5 }
 0x186   : > { %v931_v57 = vpop.f32.mrf.mxu3  ;;  %v919_v15 = vpop.f32.mrf.mxu2 }
 0x187   : > { %v932_v9 = vadd.f32 %v931_v57, %v917_v6  ;;  %v905_v11 = vpop.f32.mrf.mxu1 }
 0x188   : > { %v906_v12 = vadd.f32 %v905_v11, %v891_v7 }
 0x189   : > { %v937_v13 = vadd.f32 %v932_v9, %v711_v8 }
 0x18a   : > { %v938_v14 = vadd.f32 %v906_v12, %v712_v10 }
 0x18b   : > { %941 = vst [vmem:[#allocation2] sm:$0xff] %v937_v13 }
 0x18c   : > { %942 = vst [vmem:[#allocation2 + $0x18] sm:$0xff] %v938_v14 }
 0x18e   : > { %v933_v17 = vpop.f32.mrf.mxu3 }
 0x18f   : > { %v934_v18 = vadd.f32 %v933_v17, %v919_v15 }
 0x191   : > { %v939_v19 = vadd.f32 %v934_v18, %v713_v16 }
 0x193   : > { %943 = vst [vmem:[#allocation2 + $0x8] sm:$0xff] %v939_v19 }
 0x196   : > { %v969_v20 = vpop.f32.mrf.mxu0 }
 0x19e   : > { %v1005_v21 = vpop.f32.mrf.mxu2  ;;  %v971_v22 = vpop.f32.mrf.mxu0 }
 0x19f   : > { %v987_v24 = vpop.f32.mrf.mxu1 }
 0x1a0   : > { %v988_v25 = vadd.f32 %v987_v24, %v969_v20 }
 0x1a2   : > { %v1032_v26 = vadd.f32 %v988_v25, %v944_v23 }
 0x1a4   : > { %1038 = vst [vmem:[#allocation3] sm:$0xff] %v1032_v26 }
 0x1a6   : > { %v1007_v27 = vpop.f32.mrf.mxu2  ;;  %v1023_v29 = vpop.f32.mrf.mxu3 }
 0x1a7   : > { %v1024_v30 = vadd.f32 %v1023_v29, %v1005_v21  ;;  %v989_v32 = vpop.f32.mrf.mxu1  ;;  %v974_v33 = vpop.f32.mrf.mxu0 }
 0x1a8   : > { %v990_v34 = vadd.f32 %v989_v32, %v971_v22 }
 0x1a9   : > { %v1033_v35 = vadd.f32 %v1024_v30, %v945_v28 }
 0x1aa   : > { %v1034_v36 = vadd.f32 %v990_v34, %v946_v31 }
 0x1ab   : > { %1039 = vst [vmem:[#allocation3 + $0x8] sm:$0xff] %v1033_v35 }
 0x1ac   : > { %1040 = vst [vmem:[#allocation3 + $0x10] sm:$0xff] %v1034_v36 }
 0x1ae   : > { %v1010_v37 = vpop.f32.mrf.mxu2  ;;  %v1025_v39 = vpop.f32.mrf.mxu3 }
 0x1af   : > { %v1026_v40 = vadd.f32 %v1025_v39, %v1007_v27  ;;  %v992_v42 = vpop.f32.mrf.mxu1  ;;  %v976_v43 = vpop.f32.mrf.mxu0 }
 0x1b0   : > { %v993_v44 = vadd.f32 %v992_v42, %v974_v33 }
 0x1b1   : > { %v1035_v45 = vadd.f32 %v1026_v40, %v947_v38 }
 0x1b2   : > { %v1036_v46 = vadd.f32 %v993_v44, %v948_v41 }
 0x1b3   : > { %1041 = vst [vmem:[#allocation3 + $0x28] sm:$0xff] %v1035_v45 }
 0x1b4   : > { %1042 = vst [vmem:[#allocation3 + $0x20] sm:$0xff] %v1036_v46 }
 0x1b6   : > { %v1012_v47 = vpop.f32.mrf.mxu2  ;;  %v1028_v49 = vpop.f32.mrf.mxu3 }
 0x1b7   : > { %v1029_v52 = vadd.f32 %v1028_v49, %v1010_v37  ;;  %v994_v53 = vpop.f32.mrf.mxu1 }
 0x1b9   : > { %v1037_v54 = vadd.f32 %v1029_v52, %v949_v48 }
 0x1ba   : > { %1047 = sbr.rel (%p2951_p11) target bundleno = 1667 (0x683), region = 102 }
 0x1bb   : > { %1043 = vst [vmem:[#allocation3 + $0x18] sm:$0xff] %v1037_v54 }
 0x1be   : > { %v1030_v50 = vpop.f32.mrf.mxu3 }
 0x1bf   : > { %v1048_v51 = vld [vmem:[%s4992_s5] sm:$0x3]  ;;  %v3243_v56 = vmov 8.0   ;;  %v1079_v59 = vld [vmem:[#allocation3 + $0x10] sm:$0xff]  ;;  %v1078_v61 = vld [vmem:[#allocation3 + $0x8] sm:$0xff]  ;;  %vm1282_vm3 = vcmask 1043456  }
 0x1c0   : > { %3082 = vrcp.f32 %v1048_v51  ;;  %v1077_v55 = vld [vmem:[#allocation3] sm:$0xff]  ;;  %v1080_v1 = vld [vmem:[#allocation3 + $0x28] sm:$0xff]  ;;  %v1073_v3 = vld [vmem:[%s4988_s1 + $0x10] sm:$0xff]  ;;  %vm1272_vm9 = vcmask 195584  }
 0x1c1   : > { %3084 = vrcp.f32 %v3243_v56  ;;  %v1081_v60 = vld [vmem:[#allocation3 + $0x20] sm:$0xff]  ;;  %v1072_v5 = vld [vmem:[%s4988_s1 + $0x8] sm:$0xff]  ;;  %v1074_v57 = vld [vmem:[%s4988_s1 + $0x18] sm:$0xff] }
 0x1c2   : > { %v1071_v63 = vld [vmem:[%s4988_s1] sm:$0xff]  ;;  %v1082_v2 = vld [vmem:[#allocation3 + $0x18] sm:$0xff]  ;;  %v1076_v9 = vld [vmem:[%s4988_s1 + $0x28] sm:$0xff] }
 0x1c3   : > { %v1075_v4 = vld [vmem:[%s4988_s1 + $0x20] sm:$0xff] }
 0x1c6   : > { %v3083_v58 = vpop.eup %3082 }
 0x1c7   : > { %v3796_v62 = vperm.slane %v3083_v58, 0  ;;  %v3801_v0 = vperm.slane %v3083_v58, 1  ;;  %v3085_v13 = vpop.eup %3084 }
 0x1c8   : > { %v1225_v24 = vmul.f32 8.0, %v3085_v13  ;;  %vm1229_vm6 = vweird.f32 %v3085_v13 }
 0x1c9   : > { %v1083_v6 = vmul.f32 %v1077_v55, %v3796_v62  ;;  %v1085_v7 = vmul.f32 %v1079_v59, %v3796_v62  ;;  %v1087_v8 = vmul.f32 %v1081_v60, %v3796_v62  ;;  %v1084_v10 = vmul.f32 %v1078_v61, %v3801_v0 }
 0x1ca   : > { %v1086_v11 = vmul.f32 %v1080_v1, %v3801_v0  ;;  %v1088_v12 = vmul.f32 %v1082_v2, %v3801_v0  ;;  %v1226_v30 = vsub.f32 1.0, %v1225_v24  ;;  %v1095_v1 = vld [vmem:[%s4993_s6] sm:$0xff]  ;;  %v1261_v24 = vld [vmem:[%s4993_s6 + $0x30] sm:$0xff] }
 0x1cb   : > { %v3824_v14 = vadd.f32 %v1083_v6, %v1071_v63  ;;  %v3826_v15 = vadd.f32 %v1085_v7, %v1073_v3  ;;  %v3828_v16 = vadd.f32 %v1087_v8, %v1075_v4  ;;  %v3830_v17 = vadd.f32 %v1084_v10, %v1072_v5 }
 0x1cc   : > { %v3832_v18 = vadd.f32 %v1086_v11, %v1074_v57  ;;  %v3834_v19 = vadd.f32 %v1088_v12, %v1076_v9  ;;  %v1227_v35 = vmul.f32 %v3085_v13, %v1226_v30  ;;  %v3244_v3 = vmov 0   ;;  %v2030_v30 = vld [vmem:[%s4993_s6 + $0x150] sm:$0xff] }
 0x1cd   : > { %v1200_v20 = vmul.f32 %v3824_v14, %v3824_v14  ;;  %v1202_v21 = vmul.f32 %v3826_v15, %v3826_v15  ;;  %v1206_v22 = vmul.f32 %v3828_v16, %v3828_v16  ;;  %v1201_v23 = vmul.f32 %v3830_v17, %v3830_v17  ;;  %3079 = vset.pattern.permute.xlu0 %v3244_v3 }
 0x1ce   : > { %v1203_v25 = vmul.f32 %v3832_v18, %v3832_v18  ;;  %v1207_v26 = vmul.f32 %v3834_v19, %v3834_v19  ;;  %v1228_v40 = vadd.f32 %v3085_v13, %v1227_v35  ;;  %3080 = vset.pattern.permute.xlu1 %v3244_v3  ;;  %1174 = vperm.xlu0 %3079, %v1095_v1   ;;  %v2401_v35 = vld [vmem:[%s4993_s6 + $0x1b8] sm:$0xff] }
 0x1cf   : > { %v1204_v27 = vadd.f32 %v1202_v21, %v1200_v20  ;;  %3081 = vset.pattern.permute.xlu2 %v3244_v3  ;;  %v1097_v20 = vld [vmem:[%s4993_s6 + $0x10] sm:$0xff]  ;;  %v1096_v21 = vld [vmem:[%s4993_s6 + $0x8] sm:$0xff] }
 0x1d0   : > { %v1205_v28 = vadd.f32 %v1203_v25, %v1201_v23  ;;  %v1230_v45 = vsel %vm1229_vm6, %v3085_v13, %v1228_v40  ;;  %1188 = vperm.xlu1 %3080, %v1097_v20   ;;  %v1582_v23 = vld [vmem:[%s4993_s6 + $0xf0] sm:$0xff]  ;;  %v1262_v25 = vld [vmem:[%s4993_s6 + $0x38] sm:$0xff]  ;;  %v1057_v40 = vld [vmem:[#allocation2 + $0x8] sm:$0xff]  ;;  %vm5030_vm6 = vcmask 130048  }
 0x1d1   : > { %v1208_v29 = vadd.f32 %v1206_v22, %v1204_v27  ;;  %v1098_v22 = vld [vmem:[%s4993_s6 + $0x18] sm:$0xff] }
 0x1d2   : > { %v1209_v31 = vadd.f32 %v1207_v26, %v1205_v28  ;;  %v1266_v26 = vpack.c.bf16 %v1262_v25, %v1261_v24  ;;  %v1583_v27 = vld [vmem:[%s4993_s6 + $0xf8] sm:$0xff]  ;;  %v1581_v28 = vld [vmem:[%s4993_s6 + $0xe8] sm:$0xff] }
 0x1d3   : > { %v1210_v32 = vmax.f32 %v1208_v29, 1e-08  ;;  %v1578_v29 = vld [vmem:[%s4993_s6 + $0xd0] sm:$0xff] }
 0x1d4   : > { %v1211_v33 = vmax.f32 %v1209_v31, 1e-08  ;;  %v1263_v31 = vld [vmem:[%s4993_s6 + $0x40] sm:$0xff] }
 0x1d5   : > { %v1212_v34 = vrot.slane %v1210_v32, 4 }
 0x1d6   : > { %v1218_v36 = vrot.slane %v1211_v33, 4  ;;  %1179 = vperm.xlu0 %3079, %v1096_v21  }
 0x1d7   : > { %v1213_v37 = vadd.f32 %v1212_v34, %v1210_v32  ;;  %v1264_v32 = vld [vmem:[%s4993_s6 + $0x48] sm:$0xff]  ;;  %v2031_v34 = vld [vmem:[%s4993_s6 + $0x158] sm:$0xff] }
 0x1d8   : > { %v1219_v38 = vadd.f32 %v1218_v36, %v1211_v33  ;;  %1193 = vperm.xlu1 %3080, %v1098_v22   ;;  %v1267_v33 = vpack.c.bf16 %v1264_v32, %v1263_v31  ;;  %v2473_v36 = vld [vmem:[%s4993_s6 + $0x1e0] sm:$0xff] }
 0x1d9   : > { %v1214_v39 = vrot.slane %v1213_v37, 2 }
 0x1da   : > { %v1220_v41 = vrot.slane %v1219_v38, 2 }
 0x1db   : > { %v1215_v42 = vadd.f32 %v1214_v39, %v1213_v37  ;;  %v1054_v37 = vld [vmem:[#allocation2 + $0x10] sm:$0xff]  ;;  %v1056_v39 = vld [vmem:[#allocation2 + $0x18] sm:$0xff] }
 0x1dc   : > { %v1221_v43 = vadd.f32 %v1220_v41, %v1219_v38  ;;  %v1055_v38 = vld [vmem:[#allocation2] sm:$0xff]  ;;  %v1063_v41 = vmul.f32 %v3796_v62, %v1054_v37 }
 0x1dd   : > { %v1216_v44 = vrot.slane %v1215_v42, 1 }
 0x1de   : > { %v1222_v46 = vrot.slane %v1221_v43, 1  ;;  %1608 = vperm.xlu0 %3079, %v1582_v23  }
 0x1df   : > { %v1217_v47 = vadd.f32 %v1216_v44, %v1215_v42  ;;  %v1064_v42 = vmul.f32 %v3801_v0, %v1055_v38  ;;  %v1050_v44 = vld [vmem:[%s4987_s0] sm:$0xff] }
 0x1e0   : > { %v1223_v48 = vadd.f32 %v1222_v46, %v1221_v43  ;;  %1613 = vperm.xlu1 %3080, %v1583_v27   ;;  %v1065_v43 = vmul.f32 %v3796_v62, %v1056_v39  ;;  %v1052_v46 = vld [vmem:[%s4987_s0 + $0x10] sm:$0xff]  ;;  %v1053_v62 = vld [vmem:[%s4987_s0 + $0x18] sm:$0xff] }
 0x1e1   : > { %v1231_v49 = vmul.f32 %v1230_v45, %v1217_v47  ;;  %v1066_v47 = vmul.f32 %v3801_v0, %v1057_v40 }
 0x1e2   : > { %v1232_v52 = vmul.f32 %v1230_v45, %v1223_v48  ;;  %v1051_v45 = vld [vmem:[%s4987_s0 + $0x8] sm:$0xff]  ;;  %v3245_v48 = vmov 16.0  }
 0x1e3   : > { %3086 = vrsqrt.f32 %v1231_v49  ;;  %vm1239_vm5 = vweird.f32 %v1231_v49 }
 0x1e4   : > { %3088 = vrsqrt.f32 %v1232_v52  ;;  %vm1249_vm12 = vweird.f32 %v1232_v52 }
 0x1e5   : > { %3090 = vrcp.f32 %v3245_v48 }
 0x1e6   : > { %1603 = vperm.xlu0 %3079, %v1581_v28  }
 0x1e8   : > { %1588 = vperm.xlu1 %3080, %v1578_v29  }
 0x1e9   : > { %v3087_v53 = vpop.eup %3086 }
 0x1ea   : > { %v3089_v54 = vpop.eup %3088  ;;  %v1234_v50 = vmul.f32 %v3087_v53, %v1231_v49  ;;  %vm1240_vm15 = vweird.f32 %v3087_v53  ;;  %v1067_v49 = vadd.f32 %v1063_v41, %v1050_v44 }
 0x1eb   : > { %v1244_v51 = vmul.f32 %v3089_v54, %v1232_v52  ;;  %vm1250_vm11 = vweird.f32 %v3089_v54  ;;  %vm1241_vm0 = vmor %vm1239_vm5, %vm1240_vm15  ;;  %v1068_v52 = vadd.f32 %v1064_v42, %v1051_v45 }
 0x1ec   : > { %v1235_v55 = vmul.f32 %v3087_v53, %v1234_v50  ;;  %vm1251_vm1 = vmor %vm1249_vm12, %vm1250_vm11 }
 0x1ed   : > { %v1245_v56 = vmul.f32 %v3089_v54, %v1244_v51 }
 0x1ee   : > { %v1236_v58 = vmul.f32 0.5, %v1235_v55  ;;  %2034 = vperm.xlu0 %3079, %v2030_v30  }
 0x1ef   : > { %v1246_v59 = vmul.f32 0.5, %v1245_v56 }
 0x1f0   : > { %v1237_v60 = vsub.f32 1.5, %v1236_v58  ;;  %2039 = vperm.xlu1 %3080, %v2031_v34   ;;  %v3091_v58 = vpop.eup %3090 }
 0x1f1   : > { %v1247_v61 = vsub.f32 1.5, %v1246_v59  ;;  %vm1118_vm10 = vweird.f32 %v3091_v58 }
 0x1f2   : > { %v1238_v63 = vmul.f32 %v3087_v53, %v1237_v60  ;;  %v1114_v60 = vmul.f32 16.0, %v3091_v58 }
 0x1f3   : > { %v1248_v2 = vmul.f32 %v3089_v54, %v1247_v61 }
 0x1f4   : > { %v1242_v4 = vsel %vm1241_vm0, %v3087_v53, %v1238_v63  ;;  %v1069_v53 = vadd.f32 %v1065_v43, %v1052_v46  ;;  %v1115_v0 = vsub.f32 1.0, %v1114_v60 }
 0x1f5   : > { %v3852_v5 = vmul.f32 %v1242_v4, %v3828_v16  ;;  %v1252_v6 = vsel %vm1251_vm1, %v3089_v54, %v1248_v2  ;;  %v3858_v8 = vmul.f32 %v1242_v4, %v3824_v14  ;;  %v3861_v57 = vmul.f32 %v1242_v4, %v3826_v15  ;;  %v1259_v15 = vld [vmem:[%s4993_s6 + $0x20] sm:$0xff] }
 0x1f6   : > { %v3855_v7 = vmul.f32 %v1252_v6, %v3834_v19  ;;  %v3866_v10 = vmul.f32 %v1252_v6, %v3830_v17  ;;  %v3869_v11 = vmul.f32 %v1252_v6, %v3832_v18  ;;  %v1260_v17 = vld [vmem:[%s4993_s6 + $0x28] sm:$0xff]  ;;  %2409 = vperm.xlu0 %3079, %v2401_v35   ;;  %v1070_v54 = vadd.f32 %v1066_v47, %v1053_v62 }
 0x1f7   : > { %5119 = vst [vmem:[#allocation6_spill] sm:$0xff] %v3852_v5  ;;  %v1270_v9 = vpack.c.bf16 %v3852_v5, %v3852_v5  ;;  %v1268_v14 = vpack.c.bf16 %v3861_v57, %v3858_v8  ;;  %v1265_v19 = vpack.c.bf16 %v1260_v17, %v1259_v15  ;;  %v1099_v50 = vadd.f32 %v1069_v53, %v1067_v49 }
 0x1f8   : > { %5120 = vst [vmem:[#allocation7_spill] sm:$0xff] %v3855_v7  ;;  %v1271_v12 = vpack.c.bf16 %v3855_v7, %v3855_v7  ;;  %v1269_v18 = vpack.c.bf16 %v3869_v11, %v3866_v10  ;;  %2476 = vperm.xlu1 %3080, %v2473_v36   ;;  %v1106_v51 = vadd.f32 %v1070_v54, %v1068_v52 }
 0x1f9   : > { %5121 = vst [vmem:[#allocation8_spill] sm:$0xff] %v3858_v8  ;;  %v1284_v13 = vsel %vm1282_vm3, %v1270_v9, 0  ;;  %v1100_v55 = vrot.slane %v1099_v50, 4  ;;  %v1116_v3 = vmul.f32 %v3091_v58, %v1115_v0 }
 0x1fa   : > { %5122 = vst [vmem:[#allocation9_spill] sm:$0xff] %v3861_v57  ;;  %1295 = vmatpush.bf16.msra.mxu0 %v1284_v13  ;;  %v1287_v16 = vsel %vm1282_vm3, %v1271_v12, 0  ;;  %v1107_v56 = vrot.slane %v1106_v51, 4 }
 0x1fb   : > { %5123 = vst [vmem:[#allocation10_spill] sm:$0xff] %v3866_v10  ;;  %1319 = vmatpush.bf16.msra.mxu1 %v1287_v16  ;;  %v1101_v59 = vadd.f32 %v1100_v55, %v1099_v50  ;;  %v1117_v9 = vadd.f32 %v3091_v58, %v1116_v3 }
 0x1fc   : > { %5124 = vst [vmem:[#allocation11_spill] sm:$0xff] %v3869_v11  ;;  %v1108_v61 = vadd.f32 %v1107_v56, %v1106_v51 }
 0x1fd   : > { %v1102_v63 = vrot.slane %v1101_v59, 2  ;;  %v1119_v16 = vsel %vm1118_vm10, %v3091_v58, %v1117_v9  ;;  %vm5031_vm10 = vcmask 392192  }
 0x1fe   : > { %1296 = vmatpush.bf16.msra.mxu0 %v1268_v14  ;;  %v1109_v1 = vrot.slane %v1108_v61, 2 }
 0x1ff   : > { %1320 = vmatpush.bf16.msra.mxu1 %v1269_v18  ;;  %v1103_v2 = vadd.f32 %v1102_v63, %v1101_v59 }
 0x200   : > { %v1110_v4 = vadd.f32 %v1109_v1, %v1108_v61 }
 0x201   : > { %2952 = vmatmul.msk.bf16.vlgmr.msra.gmra.mxu0 %vm1272_vm9, %v1265_v19  ;;  %v1104_v6 = vrot.slane %v1103_v2, 1 }
 0x202   : > { %2955 = vmatmul.msk.bf16.vlgmr.msra.gmra.mxu1 %vm1272_vm9, %v1265_v19  ;;  %v1111_v12 = vrot.slane %v1110_v4, 1 }
 0x203   : > { %v1105_v13 = vadd.f32 %v1104_v6, %v1103_v2 }
 0x204   : > { %v1112_v14 = vadd.f32 %v1111_v12, %v1110_v4 }
 0x205   : > { %v1120_v15 = vmul.f32 %v1119_v16, %v1105_v13 }
 0x206   : > { %v1121_v17 = vmul.f32 %v1119_v16, %v1112_v14 }
 0x207   : > { %v1122_v18 = vsub.f32 %v1067_v49, %v1120_v15  ;;  %v1124_v19 = vsub.f32 %v1069_v53, %v1120_v15 }
 0x208   : > { %v1123_v20 = vsub.f32 %v1068_v52, %v1121_v17  ;;  %v3950_v21 = vsub.f32 %v1070_v54, %v1121_v17 }
 0x209   : > { %v1126_v22 = vmul.f32 %v1122_v18, %v1122_v18  ;;  %v1128_v23 = vmul.f32 %v1124_v19, %v1124_v19 }
 0x20a   : > { %v1127_v24 = vmul.f32 %v1123_v20, %v1123_v20  ;;  %v1129_v25 = vmul.f32 %v3950_v21, %v3950_v21 }
 0x20c   : > { %v1137_v27 = vadd.f32 %v1129_v25, %v1127_v24 }
 0x20e   : > { %v1138_v29 = vrot.slane %v1137_v27, 4 }
 0x210   : > { %v1139_v31 = vadd.f32 %v1138_v29, %v1137_v27 }
 0x211   : > { %2953 = vmatmul.msk.bf16.gmra.mxu0 %vm1272_vm9, %v1266_v26 }
 0x212   : > { %2956 = vmatmul.msk.bf16.gmra.mxu1 %vm1272_vm9, %v1266_v26  ;;  %v1130_v26 = vadd.f32 %v1128_v23, %v1126_v22  ;;  %v1140_v34 = vrot.slane %v1139_v31, 2 }
 0x214   : > { %v1131_v28 = vrot.slane %v1130_v26, 4  ;;  %v1141_v37 = vadd.f32 %v1140_v34, %v1139_v31 }
 0x216   : > { %v1132_v30 = vadd.f32 %v1131_v28, %v1130_v26  ;;  %v1142_v39 = vrot.slane %v1141_v37, 1 }
 0x218   : > { %v1133_v32 = vrot.slane %v1132_v30, 2  ;;  %v1143_v41 = vadd.f32 %v1142_v39, %v1141_v37 }
 0x21a   : > { %v1134_v36 = vadd.f32 %v1133_v32, %v1132_v30  ;;  %v1145_v44 = vmul.f32 %v1143_v41, %v1119_v16 }
 0x21c   : > { %v1135_v38 = vrot.slane %v1134_v36, 1  ;;  %v1147_v48 = vadd.f32 1e-05, %v1145_v44 }
 0x21e   : > { %v1136_v40 = vadd.f32 %v1135_v38, %v1134_v36  ;;  %vm1164_vm7 = vweird.f32 %v1147_v48 }
 0x220   : > { %v1144_v42 = vmul.f32 %v1136_v40, %v1119_v16 }
 0x221   : > { %2954 = vmatmul.msk.bf16.gmra.mxu0 %vm1272_vm9, %v1267_v33 }
 0x222   : > { %2957 = vmatmul.msk.bf16.gmra.mxu1 %vm1272_vm9, %v1267_v33  ;;  %v1146_v46 = vadd.f32 1e-05, %v1144_v42 }
 0x224   : > { %3092 = vrsqrt.f32 %v1146_v46  ;;  %vm1154_vm4 = vweird.f32 %v1146_v46 }
 0x225   : > { %3094 = vrsqrt.f32 %v1147_v48 }
 0x22a   : > { %v3093_v52 = vpop.eup %3092 }
 0x22b   : > { %v3095_v54 = vpop.eup %3094  ;;  %v1149_v50 = vmul.f32 %v3093_v52, %v1146_v46  ;;  %vm1155_vm8 = vweird.f32 %v3093_v52  ;;  %v1409_v46 = vld [vmem:[%s4993_s6 + $0x50] sm:$0xff] }
 0x22c   : > { %v1159_v51 = vmul.f32 %v3095_v54, %v1147_v48  ;;  %vm1165_vm14 = vweird.f32 %v3095_v54  ;;  %vm1156_vm2 = vmor %vm1154_vm4, %vm1155_vm8  ;;  %v1410_v48 = vld [vmem:[%s4993_s6 + $0x58] sm:$0xff] }
 0x22d   : > { %v1150_v56 = vmul.f32 %v3093_v52, %v1149_v50  ;;  %vm1166_vm13 = vmor %vm1164_vm7, %vm1165_vm14 }
 0x22e   : > { %v1160_v58 = vmul.f32 %v3095_v54, %v1159_v51 }
 0x22f   : > { %v1151_v59 = vmul.f32 0.5, %v1150_v56 }
 0x230   : > { %v1161_v61 = vmul.f32 0.5, %v1160_v58 }
 0x231   : > { %v1152_v63 = vsub.f32 1.5, %v1151_v59 }
 0x232   : > { %v1162_v1 = vsub.f32 1.5, %v1161_v61 }
 0x233   : > { %v1153_v3 = vmul.f32 %v3093_v52, %v1152_v63 }
 0x234   : > { %v1163_v4 = vmul.f32 %v3095_v54, %v1162_v1 }
 0x235   : > { %v1157_v6 = vsel %vm1156_vm2, %v3093_v52, %v1153_v3 }
 0x236   : > { %v1167_v12 = vsel %vm1166_vm13, %v3095_v54, %v1163_v4  ;;  %v1168_v13 = vmul.f32 %v1157_v6, %v1122_v18  ;;  %v1170_v16 = vmul.f32 %v1157_v6, %v1124_v19  ;;  %v1417_v54 = vpack.c.bf16 %v1410_v48, %v1409_v46 }
 0x237   : > { %v1169_v15 = vmul.f32 %v1167_v12, %v1123_v20  ;;  %v1171_v22 = vmul.f32 %v1167_v12, %v3950_v21 }
 0x240   : > { %v1175_v55 = vpop.permute.xlu0 %1174 }
 0x241   : > { %v1182_v24 = vmul.f32 %v1175_v55, %v1168_v13  ;;  %v1183_v27 = vmul.f32 %v1175_v55, %v1169_v15  ;;  %v1411_v15 = vld [vmem:[%s4993_s6 + $0x60] sm:$0xff] }
 0x242   : > { %v1189_v60 = vpop.permute.xlu1 %1188 }
 0x243   : > { %v3985_v30 = vadd.f32 %v1189_v60, %v1182_v24  ;;  %v3993_v34 = vadd.f32 %v1189_v60, %v1183_v27 }
 0x245   : > { %5125 = vst [vmem:[#allocation12_spill] sm:$0xff] %v3985_v30 }
 0x246   : > { %5127 = vst [vmem:[#allocation14_spill] sm:$0xff] %v3993_v34 }
 0x248   : > { %v1180_v17 = vpop.permute.xlu0 %1179 }
 0x249   : > { %v1184_v25 = vmul.f32 %v1180_v17, %v1170_v16  ;;  %v1185_v28 = vmul.f32 %v1180_v17, %v1171_v22  ;;  %v1412_v17 = vld [vmem:[%s4993_s6 + $0x68] sm:$0xff] }
 0x24a   : > { %v1194_v29 = vpop.permute.xlu1 %1193 }
 0x24b   : > { %v3987_v20 = vadd.f32 %v1194_v29, %v1184_v25  ;;  %v3995_v36 = vadd.f32 %v1194_v29, %v1185_v28  ;;  %v1418_v28 = vpack.c.bf16 %v1412_v17, %v1411_v15  ;;  %v1414_v17 = vld [vmem:[%s4993_s6 + $0x78] sm:$0xff] }
 0x24d   : > { %5126 = vst [vmem:[#allocation13_spill] sm:$0xff] %v3987_v20  ;;  %v1421_v39 = vpack.c.bf16 %v3987_v20, %v3985_v30  ;;  %v1422_v41 = vpack.c.bf16 %v3995_v36, %v3993_v34 }
 0x24e   : > { %5128 = vst [vmem:[#allocation15_spill] sm:$0xff] %v3995_v36 }
 0x24f   : > { %1527 = vmatpush.bf16.msrb.mxu0 %v1421_v39  ;;  %1556 = vmatpush.bf16.msrb.mxu1 %v1422_v41 }
 0x252   : > { %2966 = vmatmul.msk.bf16.vlgmr.msrb.gmra.mxu0 %vm5030_vm6, %v1417_v54  ;;  %2970 = vmatmul.msk.bf16.vlgmr.msrb.gmra.mxu1 %vm5030_vm6, %v1417_v54 }
 0x262   : > { %2967 = vmatmul.msk.bf16.gmra.mxu0 %vm5030_vm6, %v1418_v28  ;;  %2971 = vmatmul.msk.bf16.gmra.mxu1 %vm5030_vm6, %v1418_v28 }
 0x27e   : > { %v3954_v33 = vpop.f32.mrf.mxu0 }
 0x27f   : > { %v3956_v35 = vpop.f32.mrf.mxu1  ;;  %v1337_v23 = vmul.f32 %v3954_v33, %v3954_v33 }
 0x280   : > { %v1338_v26 = vmul.f32 %v3956_v35, %v3956_v35 }
 0x286   : > { %v3958_v43 = vpop.f32.mrf.mxu0 }
 0x287   : > { %v3960_v45 = vpop.f32.mrf.mxu1  ;;  %v1651_v47 = vpack.c.bf16 %v3958_v43, %v3954_v33  ;;  %v1339_v52 = vmul.f32 %v3958_v43, %v3958_v43  ;;  %v1415_v33 = vld [vmem:[%s4993_s6 + $0x80] sm:$0xff] }
 0x288   : > { %v1652_v62 = vpack.c.bf16 %v3960_v45, %v3956_v35  ;;  %v1340_v50 = vmul.f32 %v3960_v45, %v3960_v45  ;;  %v1416_v35 = vld [vmem:[%s4993_s6 + $0x88] sm:$0xff] }
 0x289   : > { %v1420_v45 = vpack.c.bf16 %v1416_v35, %v1415_v33 }
 0x28e   : > { %v3966_v49 = vpop.f32.mrf.mxu0 }
 0x28f   : > { %v3968_v53 = vpop.f32.mrf.mxu1  ;;  %v1341_v9 = vmul.f32 %v3966_v49, %v3966_v49 }
 0x290   : > { %v1342_v14 = vmul.f32 %v3968_v53, %v3968_v53 }
 0x291   : > { %v1345_v19 = vadd.f32 %v1341_v9, %v1337_v23 }
 0x292   : > { %v1346_v32 = vadd.f32 %v1342_v14, %v1338_v26 }
 0x296   : > { %v3970_v0 = vpop.f32.mrf.mxu0 }
 0x297   : > { %v3972_v2 = vpop.f32.mrf.mxu1  ;;  %v1343_v42 = vmul.f32 %v3970_v0, %v3970_v0 }
 0x298   : > { %v1344_v44 = vmul.f32 %v3972_v2, %v3972_v2 }
 0x299   : > { %v1347_v55 = vadd.f32 %v1343_v42, %v1339_v52 }
 0x29a   : > { %v1348_v59 = vadd.f32 %v1344_v44, %v1340_v50  ;;  %v1584_v44 = vld [vmem:[%s4993_s6 + $0x100] sm:$0xff] }
 0x29b   : > { %1618 = vperm.xlu2 %3081, %v1584_v44  }
 0x29e   : > { %v3983_v18 = vpop.f32.mrf.mxu0 }
 0x29f   : > { %v1349_v21 = vmul.f32 %v3983_v18, %v3983_v18  ;;  %v3991_v31 = vpop.f32.mrf.mxu1 }
 0x2a0   : > { %v1350_v37 = vmul.f32 %v3991_v31, %v3991_v31 }
 0x2a1   : > { %v3999_v38 = vadd.f32 %v1349_v21, %v1345_v19 }
 0x2a2   : > { %v4003_v40 = vadd.f32 %v1350_v37, %v1346_v32 }
 0x2a3   : > { %3096 = vrsqrt.f32 %v3999_v38  ;;  %vm1364_vm5 = vcmp.eq.f32.partialorder %v3999_v38, inf  ;;  %vm1366_vm12 = vcmp.eq.f32.partialorder %v3999_v38, 0.0  ;;  %v1367_v54 = vand.u32 2147483648, %v3999_v38 }
 0x2a4   : > { %3098 = vrsqrt.f32 %v4003_v40  ;;  %vm1376_vm15 = vcmp.eq.f32.partialorder %v4003_v40, inf  ;;  %vm1378_vm0 = vcmp.eq.f32.partialorder %v4003_v40, 0.0 }
 0x2a6   : > { %v4023_v51 = vpop.f32.mrf.mxu0 }
 0x2a7   : > { %v1351_v56 = vmul.f32 %v4023_v51, %v4023_v51  ;;  %v4027_v58 = vpop.f32.mrf.mxu1 }
 0x2a8   : > { %v1352_v60 = vmul.f32 %v4027_v58, %v4027_v58  ;;  %v1656_v28 = vpack.c.bf16 %v4027_v58, %v3991_v31  ;;  %v1585_v31 = vld [vmem:[%s4993_s6 + $0x108] sm:$0xff] }
 0x2a9   : > { %v3097_v61 = vpop.eup %3096  ;;  %v1355_v63 = vadd.f32 %v1351_v56, %v1347_v55  ;;  %1623 = vperm.xlu2 %3081, %v1585_v31  }
 0x2aa   : > { %v3099_v1 = vpop.eup %3098  ;;  %v1356_v3 = vadd.f32 %v1352_v60, %v1348_v59  ;;  %v1358_v4 = vmul.f32 %v3097_v61, %v3999_v38  ;;  %v1379_v59 = vand.u32 2147483648, %v4003_v40 }
 0x2ab   : > { %3100 = vrsqrt.f32 %v1355_v63  ;;  %v1370_v9 = vmul.f32 %v3099_v1, %v4003_v40  ;;  %vm1388_vm11 = vcmp.eq.f32.partialorder %v1355_v63, inf  ;;  %vm1390_vm1 = vcmp.eq.f32.partialorder %v1355_v63, 0.0 }
 0x2ac   : > { %v1359_v6 = vmul.f32 %v3097_v61, %v1358_v4  ;;  %3102 = vrsqrt.f32 %v1356_v3  ;;  %vm1400_vm3 = vcmp.eq.f32.partialorder %v1356_v3, inf  ;;  %vm1402_vm9 = vcmp.eq.f32.partialorder %v1356_v3, 0.0 }
 0x2ad   : > { %v1371_v13 = vmul.f32 %v3099_v1, %v1370_v9  ;;  %v1403_v9 = vand.u32 2147483648, %v1356_v3 }
 0x2ae   : > { %v1360_v12 = vmul.f32 0.5, %v1359_v6 }
 0x2af   : > { %v1372_v14 = vmul.f32 0.5, %v1371_v13 }
 0x2b0   : > { %v1361_v16 = vsub.f32 1.5, %v1360_v12 }
 0x2b1   : > { %v3101_v22 = vpop.eup %3100  ;;  %v1373_v26 = vsub.f32 1.5, %v1372_v14 }
 0x2b2   : > { %v3103_v23 = vpop.eup %3102  ;;  %v1362_v24 = vmul.f32 %v3097_v61, %v1361_v16  ;;  %v1382_v25 = vmul.f32 %v3101_v22, %v1355_v63  ;;  %v1391_v61 = vand.u32 2147483648, %v1355_v63  ;;  %v1424_v16 = vld [vmem:[%s4993_s6 + $0x98] sm:$0xff] }
 0x2b3   : > { %v1394_v27 = vmul.f32 %v3103_v23, %v1356_v3  ;;  %v1374_v19 = vmul.f32 %v3099_v1, %v1373_v26 }
 0x2b4   : > { %v1383_v29 = vmul.f32 %v3101_v22, %v1382_v25  ;;  %v1363_v32 = vmul.f32 %v1362_v24, %v3999_v38  ;;  %v1655_v25 = vpack.c.bf16 %v4023_v51, %v3983_v18  ;;  %v1654_v18 = vpack.c.bf16 %v3972_v2, %v3968_v53  ;;  %v1425_v53 = vld [vmem:[%s4993_s6 + $0xa0] sm:$0xff]  ;;  %v1427_v2 = vld [vmem:[%s4993_s6 + $0xb0] sm:$0xff]  ;;  %v1428_v51 = vld [vmem:[%s4993_s6 + $0xb8] sm:$0xff] }
 0x2b5   : > { %v1395_v21 = vmul.f32 %v3103_v23, %v1394_v27  ;;  %v1375_v39 = vmul.f32 %v1374_v19, %v4003_v40  ;;  %v1433_v58 = vpack.c.bf16 %v1428_v51, %v1427_v2  ;;  %v1429_v19 = vld [vmem:[%s4993_s6 + $0xc0] sm:$0xff] }
 0x2b6   : > { %v1384_v37 = vmul.f32 0.5, %v1383_v29  ;;  %v1365_v48 = vsel %vm1364_vm5, %v3999_v38, %v1363_v32  ;;  %v1423_v38 = vld [vmem:[%s4993_s6 + $0x90] sm:$0xff]  ;;  %v1653_v29 = vpack.c.bf16 %v3970_v0, %v3966_v49  ;;  %v1580_v49 = vld [vmem:[%s4993_s6 + $0xe0] sm:$0xff]  ;;  %v1426_v0 = vld [vmem:[%s4993_s6 + $0xa8] sm:$0xff] }
 0x2b7   : > { %v1396_v41 = vmul.f32 0.5, %v1395_v21  ;;  %v1377_v50 = vsel %vm1376_vm15, %v4003_v40, %v1375_v39  ;;  %v1368_v60 = vsel %vm1366_vm12, %v1367_v54, %v1365_v48  ;;  %v1431_v26 = vpack.c.bf16 %v1424_v16, %v1423_v38  ;;  %1598 = vperm.xlu2 %3081, %v1580_v49   ;;  %v1430_v21 = vld [vmem:[%s4993_s6 + $0xc8] sm:$0xff] }
 0x2b8   : > { %v1385_v42 = vsub.f32 1.5, %v1384_v37  ;;  %v1380_v6 = vsel %vm1378_vm0, %v1379_v59, %v1377_v50  ;;  %v1405_v40 = vadd.f32 1e-08, %v1368_v60  ;;  %v1432_v43 = vpack.c.bf16 %v1426_v0, %v1425_v53 }
 0x2b9   : > { %v1397_v46 = vsub.f32 1.5, %v1396_v41  ;;  %v1434_v32 = vpack.c.bf16 %v1430_v21, %v1429_v19 }
 0x2ba   : > { %v1386_v52 = vmul.f32 %v3101_v22, %v1385_v42 }
 0x2bb   : > { %v1398_v55 = vmul.f32 %v3103_v23, %v1397_v46 }
 0x2bc   : > { %v1387_v56 = vmul.f32 %v1386_v52, %v1355_v63 }
 0x2bd   : > { %v1399_v1 = vmul.f32 %v1398_v55, %v1356_v3  ;;  %v4134_v55 = vpop.permute.xlu1 %1613 }
 0x2be   : > { %v1389_v4 = vsel %vm1388_vm11, %v1355_v63, %v1387_v56  ;;  %v1413_v63 = vld [vmem:[%s4993_s6 + $0x70] sm:$0xff] }
 0x2bf   : > { %v1392_v12 = vsel %vm1390_vm1, %v1391_v61, %v1389_v4  ;;  %v1401_v13 = vsel %vm1400_vm3, %v1356_v3, %v1399_v1  ;;  %v1406_v3 = vadd.f32 1e-08, %v1380_v6  ;;  %v1419_v27 = vpack.c.bf16 %v1414_v17, %v1413_v63 }
 0x2c0   : > { %v1407_v14 = vadd.f32 1e-08, %v1392_v12  ;;  %v1404_v15 = vsel %vm1402_vm9, %v1403_v9, %v1401_v13  ;;  %v4138_v9 = vpop.permute.xlu0 %1608 }
 0x2c1   : > { %v1408_v22 = vadd.f32 1e-08, %v1404_v15  ;;  %2968 = vmatmul.msk.bf16.gmra.mxu0 %vm5030_vm6, %v1419_v27  ;;  %2972 = vmatmul.msk.bf16.gmra.mxu1 %vm5030_vm6, %v1419_v27 }
 0x2c2   : > { %v1435_v23 = vpack.c.bf16 %v1407_v14, %v1405_v40 }
 0x2c3   : > { %v1436_v24 = vpack.c.bf16 %v1408_v22, %v1406_v3  ;;  %v1642_v22 = vld [vmem:[%s4993_s6 + $0x110] sm:$0xff] }
 0x2c4   : > { %1457 = vmatpush.bf16.msra.mxu2 %v1435_v23  ;;  %v1643_v23 = vld [vmem:[%s4993_s6 + $0x118] sm:$0xff] }
 0x2c5   : > { %1486 = vmatpush.bf16.msra.mxu3 %v1436_v24  ;;  %v1589_v4 = vpop.permute.xlu1 %1588 }
 0x2c7   : > { %2958 = vmatmul.msk.bf16.vlgmr.msra.gmra.mxu2 %vm5030_vm6, %v1431_v26 }
 0x2c8   : > { %1672 = vmatpush.bf16.msrb.mxu2 %v1655_v25  ;;  %2962 = vmatmul.msk.bf16.vlgmr.msra.gmra.mxu3 %vm5030_vm6, %v1431_v26  ;;  %v1648_v26 = vpack.c.bf16 %v1643_v23, %v1642_v22 }
 0x2c9   : > { %1696 = vmatpush.bf16.msrb.mxu3 %v1656_v28 }
 0x2cc   : > { %1673 = vmatpush.bf16.msrb.mxu2 %v1653_v29 }
 0x2cd   : > { %1697 = vmatpush.bf16.msrb.mxu3 %v1654_v18 }
 0x2cf   : > { %v1529_v37 = vpop.f32.mrf.mxu0  ;;  %v1558_v39 = vpop.f32.mrf.mxu1 }
 0x2d0   : > { %1674 = vmatpush.bf16.msrb.mxu2 %v1651_v47  ;;  %v1579_v47 = vld [vmem:[%s4993_s6 + $0xd8] sm:$0xff] }
 0x2d1   : > { %1698 = vmatpush.bf16.msrb.mxu3 %v1652_v62  ;;  %2969 = vmatmul.msk.bf16.gmra.mxu0 %vm5030_vm6, %v1420_v45  ;;  %v2400_v62 = vld [vmem:[%s4993_s6 + $0x1b0] sm:$0xff] }
 0x2d2   : > { %2973 = vmatmul.msk.bf16.gmra.mxu1 %vm5030_vm6, %v1420_v45  ;;  %1593 = vperm.xlu2 %3081, %v1579_v47  }
 0x2d7   : > { %2959 = vmatmul.msk.bf16.gmra.mxu2 %vm5030_vm6, %v1432_v43  ;;  %v1531_v42 = vpop.f32.mrf.mxu0  ;;  %v1560_v44 = vpop.f32.mrf.mxu1 }
 0x2d8   : > { %2963 = vmatmul.msk.bf16.gmra.mxu3 %vm5030_vm6, %v1432_v43  ;;  %v1604_v43 = vpop.permute.xlu0 %1603 }
 0x2da   : > { %2404 = vperm.xlu2 %3081, %v2400_v62  }
 0x2df   : > { %v1534_v56 = vpop.f32.mrf.mxu0  ;;  %v1563_v59 = vpop.f32.mrf.mxu1 }
 0x2e7   : > { %2960 = vmatmul.msk.bf16.gmra.mxu2 %vm5030_vm6, %v1433_v58  ;;  %v1536_v13 = vpop.f32.mrf.mxu0  ;;  %v1565_v14 = vpop.f32.mrf.mxu1 }
 0x2e8   : > { %2964 = vmatmul.msk.bf16.gmra.mxu3 %vm5030_vm6, %v1433_v58 }
 0x2f5   : > { %v4130_v41 = vpop.permute.xlu2 %1618 }
 0x2f7   : > { %2961 = vmatmul.msk.bf16.gmra.mxu2 %vm5030_vm6, %v1434_v32 }
 0x2f8   : > { %2965 = vmatmul.msk.bf16.gmra.mxu3 %vm5030_vm6, %v1434_v32 }
 0x303   : > { %v4132_v46 = vpop.permute.xlu2 %1623 }
 0x307   : > { %2974 = vmatmul.msk.bf16.vlgmr.msrb.gmra.mxu2 %vm5031_vm10, %v1648_v26 }
 0x308   : > { %2977 = vmatmul.msk.bf16.vlgmr.msrb.gmra.mxu3 %vm5031_vm10, %v1648_v26 }
 0x311   : > { %v1599_v60 = vpop.permute.xlu2 %1598 }
 0x32c   : > { %v1594_v17 = vpop.permute.xlu2 %1593 }
 0x33e   : > { %v1539_v62 = vpop.f32.mrf.mxu0  ;;  %v1568_v51 = vpop.f32.mrf.mxu1 }
 0x34a   : > { %v1459_v48 = vpop.f32.mrf.mxu2 }
 0x34b   : > { %v1530_v52 = vadd.f32 %v1529_v37, %v1459_v48  ;;  %v1488_v54 = vpop.f32.mrf.mxu3 }
 0x34c   : > { %v1559_v50 = vadd.f32 %v1558_v39, %v1488_v54 }
 0x34d   : > { %v4136_v6 = vadd.f32 %v1589_v4, %v1530_v52 }
 0x34e   : > { %v4147_v24 = vadd.f32 %v1589_v4, %v1559_v50 }
 0x34f   : > { %5129 = vst [vmem:[#allocation16_spill] sm:$0xff] %v4136_v6  ;;  %v2980_v15 = vmul.f32 -1.442695, %v4136_v6 }
 0x350   : > { %5130 = vst [vmem:[#allocation17_spill] sm:$0xff] %v4147_v24  ;;  %v2981_v49 = vmul.f32 -1.442695, %v4147_v24 }
 0x351   : > { %3104 = vpow2.f32 %v2980_v15  ;;  %v1570_v15 = vpop.f32.mrf.mxu1 }
 0x352   : > { %v1461_v61 = vpop.f32.mrf.mxu2 }
 0x353   : > { %v1490_v1 = vpop.f32.mrf.mxu3  ;;  %v1532_v38 = vadd.f32 %v1531_v42, %v1461_v61  ;;  %v1645_v61 = vld [vmem:[%s4993_s6 + $0x128] sm:$0xff] }
 0x354   : > { %v1561_v63 = vadd.f32 %v1560_v44, %v1490_v1 }
 0x355   : > { %v4153_v28 = vadd.f32 %v1594_v17, %v1532_v38 }
 0x356   : > { %v4158_v18 = vadd.f32 %v1594_v17, %v1561_v63 }
 0x357   : > { %5132 = vst [vmem:[#allocation19_spill] sm:$0xff] %v4153_v28  ;;  %v2982_v0 = vmul.f32 -1.442695, %v4153_v28  ;;  %v3105_v58 = vpop.eup %3104 }
 0x358   : > { %5133 = vst [vmem:[#allocation20_spill] sm:$0xff] %v4158_v18  ;;  %v2983_v45 = vmul.f32 -1.442695, %v4158_v18  ;;  %v4171_v42 = vadd.f32 1.0, %v3105_v58 }
 0x35a   : > { %v1464_v12 = vpop.f32.mrf.mxu2 }
 0x35b   : > { %v1535_v16 = vadd.f32 %v1534_v56, %v1464_v12  ;;  %v1493_v40 = vpop.f32.mrf.mxu3 }
 0x35c   : > { %v1564_v3 = vadd.f32 %v1563_v59, %v1493_v40  ;;  %v1541_v40 = vpop.f32.mrf.mxu0 }
 0x35d   : > { %v4149_v25 = vadd.f32 %v1599_v60, %v1535_v16 }
 0x35e   : > { %v4151_v27 = vadd.f32 %v1599_v60, %v1564_v3  ;;  %v1644_v60 = vld [vmem:[%s4993_s6 + $0x120] sm:$0xff] }
 0x35f   : > { %v2984_v29 = vmul.f32 -1.442695, %v4149_v25  ;;  %v1649_v12 = vpack.c.bf16 %v1645_v61, %v1644_v60 }
 0x360   : > { %5131 = vst [vmem:[#allocation18_spill] sm:$0xff] %v4151_v27  ;;  %v2985_v31 = vmul.f32 -1.442695, %v4151_v27 }
 0x361   : > { %3106 = vpow2.f32 %v2984_v29  ;;  %2975 = vmatmul.msk.bf16.gmra.mxu2 %vm5031_vm10, %v1649_v12  ;;  %2978 = vmatmul.msk.bf16.gmra.mxu3 %vm5031_vm10, %v1649_v12 }
 0x362   : > { %v1466_v53 = vpop.f32.mrf.mxu2  ;;  %3108 = vpow2.f32 %v2985_v31 }
 0x363   : > { %v1537_v33 = vadd.f32 %v1536_v13, %v1466_v53  ;;  %v1495_v35 = vpop.f32.mrf.mxu3  ;;  %3110 = vpow2.f32 %v2981_v49 }
 0x364   : > { %v1566_v47 = vadd.f32 %v1565_v14, %v1495_v35  ;;  %3112 = vpow2.f32 %v2982_v0 }
 0x365   : > { %v4164_v2 = vadd.f32 %v1604_v43, %v1537_v33  ;;  %3114 = vpow2.f32 %v2983_v45 }
 0x366   : > { %v4167_v32 = vadd.f32 %v1604_v43, %v1566_v47 }
 0x367   : > { %v3107_v19 = vpop.eup %3106  ;;  %v2986_v21 = vmul.f32 -1.442695, %v4164_v2 }
 0x368   : > { %5134 = vst [vmem:[#allocation21_spill] sm:$0xff] %v4167_v32  ;;  %v4169_v37 = vadd.f32 1.0, %v3107_v19  ;;  %v3109_v39 = vpop.eup %3108  ;;  %v2987_v52 = vmul.f32 -1.442695, %v4167_v32 }
 0x369   : > { %v3111_v48 = vpop.eup %3110  ;;  %v4175_v56 = vadd.f32 1.0, %v3109_v39 }
 0x36a   : > { %3116 = vrcp.f32 %v4169_v37  ;;  %v1469_v44 = vpop.f32.mrf.mxu2  ;;  %v3113_v1 = vpop.eup %3112  ;;  %v4187_v38 = vadd.f32 1.0, %v3111_v48  ;;  %v1850_v35 = vand.u32 2147483648, %v4169_v37  ;;  %vm1844_vm4 = vweird.f32 %v4169_v37 }
 0x36b   : > { %3118 = vpow2.f32 %v2986_v21  ;;  %v1540_v54 = vadd.f32 %v1539_v62, %v1469_v44  ;;  %v1498_v50 = vpop.f32.mrf.mxu3  ;;  %v3115_v13 = vpop.eup %3114  ;;  %v4197_v17 = vadd.f32 1.0, %v3113_v1 }
 0x36c   : > { %v1569_v59 = vadd.f32 %v1568_v51, %v1498_v50  ;;  %3120 = vrcp.f32 %v4171_v42  ;;  %v4232_v60 = vor.u32 1.1754944e-38, %v1850_v35 }
 0x36d   : > { %v4184_v4 = vadd.f32 %v4138_v9, %v1540_v54  ;;  %3122 = vpow2.f32 %v2987_v52  ;;  %v1848_v54 = vand.u32 2147483647, %v4169_v37 }
 0x36e   : > { %v4190_v16 = vadd.f32 %v4138_v9, %v1569_v59  ;;  %3124 = vrcp.f32 %v4175_v56  ;;  %v4201_v9 = vadd.f32 1.0, %v3115_v13  ;;  %v1544_v13 = vpop.f32.mrf.mxu0 }
 0x36f   : > { %v2988_v14 = vmul.f32 -1.442695, %v4184_v4  ;;  %vm4264_vm8 = vcmp.eq.f32.partialorder %v1848_v54, 8.507059e+37 }
 0x370   : > { %v4195_v63 = vpop.eup %3116  ;;  %v2989_v3 = vmul.f32 -1.442695, %v4190_v16 }
 0x371   : > { %v3119_v22 = vpop.eup %3118  ;;  %3126 = vpow2.f32 %v2988_v14  ;;  %v1840_v23 = vmul.f32 %v4195_v63, %v4169_v37  ;;  %vm1845_vm7 = vweird.f32 %v4195_v63 }
 0x372   : > { %3128 = vrcp.f32 %v4187_v38  ;;  %v1471_v49 = vpop.f32.mrf.mxu2  ;;  %v4211_v43 = vpop.eup %3120  ;;  %v4215_v47 = vadd.f32 1.0, %v3119_v22  ;;  %vm4301_vm14 = vmor %vm1844_vm4, %vm1845_vm7 }
 0x373   : > { %3130 = vpow2.f32 %v2989_v3  ;;  %v1542_v0 = vadd.f32 %v1541_v40, %v1471_v49  ;;  %v1500_v33 = vpop.f32.mrf.mxu3  ;;  %v3123_v51 = vpop.eup %3122  ;;  %v1841_v21 = vsub.f32 1.0, %v1840_v23  ;;  %v1780_v40 = vmul.f32 %v4211_v43, %v4171_v42 }
 0x374   : > { %3132 = vrcp.f32 %v4197_v17  ;;  %v1571_v62 = vadd.f32 %v1570_v15, %v1500_v33  ;;  %v4222_v39 = vpop.eup %3124  ;;  %v1573_v3 = vpop.f32.mrf.mxu1  ;;  %v1865_v23 = vand.u32 2147483648, %v4175_v56  ;;  %v1880_v31 = vand.u32 2147483648, %v4215_v47 }
 0x375   : > { %3134 = vrcp.f32 %v4201_v9  ;;  %v4220_v19 = vadd.f32 %v4134_v55, %v1542_v0  ;;  %v1842_v22 = vmul.f32 %v4195_v63, %v1841_v21  ;;  %v4248_v0 = vadd.f32 1.0, %v3123_v51  ;;  %v1646_v51 = vld [vmem:[%s4993_s6 + $0x130] sm:$0xff] }
 0x376   : > { %v4227_v52 = vadd.f32 %v4134_v55, %v1571_v62  ;;  %3136 = vrcp.f32 %v4215_v47  ;;  %v1855_v62 = vmul.f32 %v4222_v39, %v4175_v56  ;;  %v4275_v58 = vor.u32 1.1754944e-38, %v1865_v23  ;;  %v1546_v23 = vpop.f32.mrf.mxu0 }
 0x377   : > { %v3127_v50 = vpop.eup %3126  ;;  %v2990_v59 = vmul.f32 -1.442695, %v4220_v19  ;;  %v1843_v48 = vadd.f32 %v4195_v63, %v1842_v22  ;;  %v4288_v22 = vor.u32 1.1754944e-38, %v1880_v31  ;;  %vm1874_vm9 = vweird.f32 %v4215_v47 }
 0x378   : > { %v4235_v1 = vpop.eup %3128  ;;  %v4238_v12 = vadd.f32 1.0, %v3127_v50  ;;  %v2991_v55 = vmul.f32 -1.442695, %v4227_v52 }
 0x379   : > { %v3131_v14 = vpop.eup %3130  ;;  %3138 = vpow2.f32 %v2990_v59 }
 0x37a   : > { %v4246_v49 = vpop.eup %3132  ;;  %3140 = vrcp.f32 %v4238_v12  ;;  %v4251_v33 = vadd.f32 1.0, %v3131_v14  ;;  %v1474_v35 = vpop.f32.mrf.mxu2  ;;  %v1647_v14 = vld [vmem:[%s4993_s6 + $0x138] sm:$0xff]  ;;  %vm1904_vm2 = vweird.f32 %v4238_v12 }
 0x37b   : > { %v4255_v50 = vpop.eup %3134  ;;  %3142 = vpow2.f32 %v2991_v55  ;;  %v1545_v21 = vadd.f32 %v1544_v13, %v1474_v35  ;;  %v1503_v53 = vpop.f32.mrf.mxu3  ;;  %v1650_v55 = vpack.c.bf16 %v1647_v14, %v1646_v51  ;;  %v1781_v13 = vsub.f32 1.0, %v1780_v40 }
 0x37c   : > { %3144 = vrcp.f32 %v4251_v33  ;;  %v1574_v26 = vadd.f32 %v1573_v3, %v1503_v53  ;;  %v4277_v54 = vpop.eup %3136  ;;  %v1856_v3 = vsub.f32 1.0, %v1855_v62  ;;  %v1910_v62 = vand.u32 2147483648, %v4238_v12  ;;  %v1575_v59 = vpop.f32.mrf.mxu1 }
 0x37d   : > { %v4271_v35 = vadd.f32 %v4130_v41, %v1545_v21  ;;  %3146 = vrcp.f32 %v4248_v0  ;;  %2976 = vmatmul.msk.bf16.gmra.mxu2 %vm5031_vm10, %v1650_v55  ;;  %2979 = vmatmul.msk.bf16.gmra.mxu3 %vm5031_vm10, %v1650_v55  ;;  %v4306_v31 = vmul.f32 %v4211_v43, %v1781_v13  ;;  %v1847_v21 = vsel %vm4301_vm14, %v4195_v63, %v1843_v48 }
 0x37e   : > { %v4281_v44 = vadd.f32 %v4130_v41, %v1574_v26  ;;  %v1870_v61 = vmul.f32 %v4277_v54, %v4215_v47  ;;  %v1908_v63 = vand.u32 2147483647, %v4238_v12  ;;  %vm1919_vm15 = vweird.f32 %v4251_v33 }
 0x37f   : > { %v3139_v40 = vpop.eup %3138  ;;  %v2992_v51 = vmul.f32 -1.442695, %v4271_v35  ;;  %vm1875_vm11 = vweird.f32 %v4277_v54  ;;  %v1783_v27 = vadd.f32 %v4211_v43, %v4306_v31 }
 0x380   : > { %v4291_v14 = vpop.eup %3140  ;;  %v4293_v41 = vadd.f32 1.0, %v3139_v40  ;;  %v2993_v26 = vmul.f32 -1.442695, %v4281_v44  ;;  %v2175_v29 = vmax.f32 %v4281_v44, 0.0  ;;  %vm4344_vm5 = vcmp.eq.f32.partialorder %v1908_v63, 8.507059e+37 }
 0x381   : > { %v3143_v55 = vpop.eup %3142  ;;  %3148 = vpow2.f32 %v2992_v51  ;;  %v1900_v40 = vmul.f32 %v4291_v14, %v4238_v12  ;;  %v1857_v51 = vmul.f32 %v4222_v39, %v1856_v3  ;;  %v4333_v3 = vsel %vm4264_vm8, %v4232_v60, %v1847_v21 }
 0x382   : > { %v4314_v15 = vpop.eup %3144  ;;  %3150 = vrcp.f32 %v4293_v41  ;;  %v4317_v37 = vadd.f32 1.0, %v3143_v55  ;;  %v1476_v13 = vpop.f32.mrf.mxu2  ;;  %v4326_v55 = vor.u32 1.1754944e-38, %v1910_v62  ;;  %v1925_v62 = vand.u32 2147483648, %v4251_v33 }
 0x383   : > { %3152 = vpow2.f32 %v2993_v26  ;;  %v1547_v53 = vadd.f32 %v1546_v23, %v1476_v13  ;;  %v1505_v7 = vpop.f32.mrf.mxu3  ;;  %v1901_v11 = vsub.f32 1.0, %v1900_v40  ;;  %v4324_v45 = vpop.eup %3146  ;;  %v1915_v10 = vmul.f32 %v4314_v15, %v4251_v33 }
 0x384   : > { %v1576_v48 = vadd.f32 %v1575_v59, %v1505_v7  ;;  %3154 = vrcp.f32 %v4317_v37  ;;  %v1923_v40 = vand.u32 2147483647, %v4251_v33  ;;  %v2174_v7 = vmax.f32 %v4271_v35, 0.0 }
 0x385   : > { %v1640_v23 = vadd.f32 %v4132_v46, %v1547_v53  ;;  %v1902_v26 = vmul.f32 %v4291_v14, %v1901_v11  ;;  %v1871_v13 = vsub.f32 1.0, %v1870_v61  ;;  %vm1905_vm13 = vweird.f32 %v4291_v14 }
 0x386   : > { %v1641_v59 = vadd.f32 %v4132_v46, %v1576_v48  ;;  %v1916_v48 = vsub.f32 1.0, %v1915_v10  ;;  %v1938_v10 = vand.u32 2147483647, %v4293_v41  ;;  %vm4375_vm12 = vmor %vm1904_vm2, %vm1905_vm13  ;;  %vm1934_vm0 = vweird.f32 %v4293_v41 }
 0x387   : > { %v3149_v5 = vpop.eup %3148  ;;  %v2994_v60 = vmul.f32 -1.442695, %v1640_v23  ;;  %v2176_v21 = vmax.f32 %v1640_v23, 0.0  ;;  %v1903_v44 = vadd.f32 %v4291_v14, %v1902_v26  ;;  %v4368_v26 = vadd.f32 %v4222_v39, %v1857_v51 }
 0x388   : > { %v4348_v11 = vpop.eup %3150  ;;  %v4350_v57 = vadd.f32 1.0, %v3149_v5  ;;  %v2995_v35 = vmul.f32 -1.442695, %v1641_v59  ;;  %v2177_v46 = vmax.f32 %v1641_v59, 0.0  ;;  %v1940_v5 = vand.u32 2147483648, %v4293_v41 }
 0x389   : > { %v3153_v8 = vpop.eup %3152  ;;  %3156 = vpow2.f32 %v2994_v60  ;;  %v4352_v61 = vpack.c.bf16 %v2176_v21, %v2174_v7  ;;  %v1930_v23 = vmul.f32 %v4348_v11, %v4293_v41  ;;  %v1917_v7 = vmul.f32 %v4314_v15, %v1916_v48 }
 0x38a   : > { %3158 = vrcp.f32 %v4350_v57  ;;  %v4358_v63 = vadd.f32 1.0, %v3153_v8  ;;  %v4360_v36 = vpack.c.bf16 %v2177_v46, %v2175_v29  ;;  %v4363_v20 = vpop.eup %3154  ;;  %v4380_v59 = vor.u32 1.1754944e-38, %v1925_v62 }
 0x38b   : > { %5141 = vst [vmem:[#allocation22_spill] sm:$0xff] %v4352_v61  ;;  %3160 = vpow2.f32 %v2995_v35  ;;  %v4385_v51 = vmul.f32 %v4324_v45, %v4248_v0  ;;  %v1970_v29 = vand.u32 2147483648, %v4350_v57  ;;  %v1907_v12 = vsel %vm4375_vm12, %v4291_v14, %v1903_v44 }
 0x38c   : > { %5142 = vst [vmem:[#allocation23_spill] sm:$0xff] %v4360_v36  ;;  %3162 = vrcp.f32 %v4358_v63  ;;  %v1931_v60 = vsub.f32 1.0, %v1930_v23  ;;  %v1872_v21 = vmul.f32 %v4277_v54, %v1871_v13  ;;  %v1941_v35 = vor.u32 1.1754944e-38, %v1940_v5 }
 0x38d   : > { %vm1920_vm1 = vweird.f32 %v4314_v15  ;;  %vm4394_vm3 = vcmp.eq.f32.partialorder %v1923_v40, 8.507059e+37  ;;  %v1945_v46 = vmul.f32 %v4363_v20, %v4317_v37  ;;  %v1985_v14 = vand.u32 2147483648, %v4358_v63 }
 0x38e   : > { %v1932_v44 = vmul.f32 %v4348_v11, %v1931_v60  ;;  %vm4403_vm4 = vcmp.eq.f32.partialorder %v1938_v10, 8.507059e+37  ;;  %v1953_v23 = vand.u32 2147483647, %v4317_v37  ;;  %v1955_v40 = vand.u32 2147483648, %v4317_v37  ;;  %vm4450_vm12 = vmor %vm1919_vm15, %vm1920_vm1 }
 0x38f   : > { %v3157_v48 = vpop.eup %3156  ;;  %vm1860_vm8 = vweird.f32 %v4222_v39  ;;  %vm1964_vm7 = vweird.f32 %v4350_v57  ;;  %v1968_v34 = vand.u32 2147483647, %v4350_v57  ;;  %v4419_v10 = vsel %vm4344_vm5, %v4326_v55, %v1907_v12 }
 0x390   : > { %v4410_v5 = vpop.eup %3158  ;;  %v4412_v8 = vadd.f32 1.0, %v3157_v48  ;;  %v1918_v60 = vadd.f32 %v4314_v15, %v1917_v7  ;;  %v4424_v61 = vor.u32 1.1754944e-38, %v1970_v29  ;;  %v1983_v48 = vand.u32 2147483647, %v4358_v63 }
 0x391   : > { %v3161_v30 = vpop.eup %3160  ;;  %v1960_v36 = vmul.f32 %v4410_v5, %v4350_v57  ;;  %vm1935_vm14 = vweird.f32 %v4348_v11  ;;  %vm1859_vm2 = vweird.f32 %v4175_v56  ;;  %v1933_v53 = vadd.f32 %v4348_v11, %v1932_v44 }
 0x392   : > { %v4429_v18 = vpop.eup %3162  ;;  %3164 = vrcp.f32 %v4412_v8  ;;  %v4432_v55 = vadd.f32 1.0, %v3161_v30  ;;  %v1946_v7 = vsub.f32 1.0, %v1945_v46  ;;  %v5149_v29 = vand.u32 2147483647, %v4215_v47  ;;  %vm4472_vm1 = vmor %vm1934_vm0, %vm1935_vm14 }
 0x393   : > { %v1975_v24 = vmul.f32 %v4429_v18, %v4358_v63  ;;  %v1961_v28 = vsub.f32 1.0, %v1960_v36  ;;  %v4444_v6 = vor.u32 1.1754944e-38, %v1985_v14  ;;  %vm1950_vm10 = vweird.f32 %v4363_v20  ;;  %vm4502_vm14 = vmor %vm1874_vm9, %vm1875_vm11 }
 0x394   : > { %vm4438_vm5 = vcmp.eq.f32.partialorder %v5149_v29, 8.507059e+37  ;;  %3166 = vrcp.f32 %v4432_v55  ;;  %vm4457_vm13 = vcmp.eq.f32.partialorder %v1968_v34, 8.507059e+37  ;;  %v1922_v36 = vsel %vm4450_vm12, %v4314_v15, %v1918_v60 }
 0x395   : > { %v1956_v14 = vor.u32 1.1754944e-38, %v1955_v40  ;;  %v1873_v33 = vadd.f32 %v4277_v54, %v1872_v21  ;;  %v1962_v44 = vmul.f32 %v4410_v5, %v1961_v28  ;;  %vm1965_vm15 = vweird.f32 %v4410_v5 }
 0x396   : > { %v1998_v29 = vand.u32 2147483647, %v4412_v8  ;;  %v1976_v32 = vsub.f32 1.0, %v1975_v24  ;;  %v2000_v15 = vand.u32 2147483648, %v4412_v8  ;;  %vm4477_vm12 = vcmp.eq.f32.partialorder %v1983_v48, 8.507059e+37  ;;  %vm4521_vm11 = vmor %vm1964_vm7, %vm1965_vm15 }
 0x397   : > { %v2015_v28 = vand.u32 2147483648, %v4432_v55  ;;  %v1937_v24 = vsel %vm4472_vm1, %v4348_v11, %v1933_v53  ;;  %v1947_v21 = vmul.f32 %v4363_v20, %v1946_v7  ;;  %v1963_v41 = vadd.f32 %v4410_v5, %v1962_v44  ;;  %vm4539_vm7 = vmor %vm1859_vm2, %vm1860_vm8 }
 0x398   : > { %v1977_v60 = vmul.f32 %v4429_v18, %v1976_v32  ;;  %v2013_v30 = vand.u32 2147483647, %v4432_v55  ;;  %v4492_v48 = vsel %vm4394_vm3, %v4380_v59, %v1922_v36  ;;  %vm4494_vm0 = vcmp.eq.f32.partialorder %v1953_v23, 8.507059e+37  ;;  %v3165_v32 = vpop.eup %3164 }
 0x399   : > { %vm1994_vm1 = vweird.f32 %v4412_v8  ;;  %vm1980_vm6 = vweird.f32 %v4429_v18  ;;  %v4510_v59 = vsel %vm4403_vm4, %v1941_v35, %v1937_v24  ;;  %v1877_v62 = vsel %vm4502_vm14, %v4277_v54, %v1873_v33 }
 0x39a   : > { %vm1889_vm3 = vweird.f32 %v4248_v0  ;;  %v1990_v47 = vmul.f32 %v3165_v32, %v4412_v8  ;;  %vm4525_vm9 = vcmp.eq.f32.partialorder %v1998_v29, 8.507059e+37  ;;  %v1978_v35 = vadd.f32 %v4429_v18, %v1977_v60  ;;  %v3167_v53 = vpop.eup %3166 }
 0x39b   : > { %v1948_v54 = vadd.f32 %v4363_v20, %v1947_v21  ;;  %v1967_v7 = vsel %vm4521_vm11, %v4410_v5, %v1963_v41  ;;  %v2001_v36 = vor.u32 1.1754944e-38, %v2000_v15  ;;  %vm2009_vm4 = vweird.f32 %v4432_v55 }
 0x39c   : > { %v2016_v57 = vor.u32 1.1754944e-38, %v2015_v28  ;;  %v2005_v44 = vmul.f32 %v3167_v53, %v4432_v55  ;;  %v1991_v29 = vsub.f32 1.0, %v1990_v47  ;;  %vm5170_vm15 = vweird.f32 %v4358_v63 }
 0x39d   : > { %vm4548_vm14 = vmor %vm5170_vm15, %vm1980_vm6  ;;  %vm4552_vm11 = vcmp.eq.f32.partialorder %v2013_v30, 8.507059e+37  ;;  %v2026_v15 = vpack.c.bf16 %v4510_v59, %v4419_v10  ;;  %v4561_v28 = vsel %vm4438_vm5, %v4288_v22, %v1877_v62  ;;  %vm1995_vm8 = vweird.f32 %v3165_v32 }
 0x39e   : > { %v1982_v63 = vsel %vm4548_vm14, %v4429_v18, %v1978_v35  ;;  %vm5175_vm6 = vweird.f32 %v4317_v37  ;;  %v1862_v12 = vsel %vm4539_vm7, %v4222_v39, %v4368_v26  ;;  %v1886_v22 = vsub.f32 1.0, %v4385_v51  ;;  %vm1996_vm7 = vmor %vm1994_vm1, %vm1995_vm8 }
 0x39f   : > { %vm4570_vm2 = vmor %vm5175_vm6, %vm1950_vm10  ;;  %v1972_v21 = vsel %vm4457_vm13, %v4424_v61, %v1967_v7  ;;  %v1992_v18 = vmul.f32 %v3165_v32, %v1991_v29  ;;  %v2006_v41 = vsub.f32 1.0, %v2005_v44  ;;  %v5178_v60 = vand.u32 2147483647, %v4175_v56 }
 0x3a0   : > { %v1952_v37 = vsel %vm4570_vm2, %v4363_v20, %v1948_v54  ;;  %v2024_v39 = vpack.c.bf16 %v4561_v28, %v4333_v3  ;;  %v1887_v26 = vmul.f32 %v4324_v45, %v1886_v22  ;;  %vm1890_vm5 = vweird.f32 %v4324_v45 }
 0x3a1   : > { %vm4587_vm10 = vcmp.eq.f32.partialorder %v5178_v60, 8.507059e+37  ;;  %v1895_v61 = vand.u32 2147483648, %v4248_v0  ;;  %v1993_v51 = vadd.f32 %v3165_v32, %v1992_v18  ;;  %v1987_v20 = vsel %vm4477_vm12, %v4444_v6, %v1982_v63  ;;  %vm1891_vm12 = vmor %vm1889_vm3, %vm1890_vm5 }
 0x3a2   : > { %v2007_v46 = vmul.f32 %v3167_v53, %v2006_v41  ;;  %vm2010_vm13 = vweird.f32 %v3167_v53  ;;  %v1957_v56 = vsel %vm4494_vm0, %v1956_v14, %v1952_v37  ;;  %v1888_v11 = vadd.f32 %v4324_v45, %v1887_v26 }
 0x3a3   : > { %v5181_v62 = vand.u32 2147483647, %v4248_v0  ;;  %v1810_v6 = vmul.f32 %v4246_v49, %v4197_v17  ;;  %v1997_v40 = vsel %vm1996_vm7, %v3165_v32, %v1993_v51  ;;  %vm1785_vm0 = vweird.f32 %v4211_v43  ;;  %vm2011_vm1 = vmor %vm2009_vm4, %vm2010_vm13 }
 0x3a4   : > { %v2008_v23 = vadd.f32 %v3167_v53, %v2007_v46  ;;  %v2002_v8 = vsel %vm4525_vm9, %v2001_v36, %v1997_v40  ;;  %v1892_v14 = vsel %vm1891_vm12, %v4324_v45, %v1888_v11  ;;  %v1896_v35 = vor.u32 1.1754944e-38, %v1895_v61  ;;  %v5200_v11 = vld [vmem:[#allocation21_spill] sm:$0xff] }
 0x3a5   : > { %vm4607_vm15 = vcmp.eq.f32.partialorder %v5181_v62, 8.507059e+37  ;;  %v1811_v54 = vsub.f32 1.0, %v1810_v6  ;;  %v2028_v32 = vpack.c.bf16 %v2002_v8, %v1972_v21  ;;  %v1788_v0 = vand.u32 2147483647, %v4171_v42  ;;  %v5202_v6 = vld [vmem:[#allocation16_spill] sm:$0xff] }
 0x3a6   : > { %v2012_v7 = vsel %vm2011_vm1, %v3167_v53, %v2008_v23  ;;  %v1790_v33 = vand.u32 2147483648, %v4171_v42  ;;  %v1897_v13 = vsel %vm4607_vm15, %v1896_v35, %v1892_v14  ;;  %vm1784_vm3 = vweird.f32 %v4171_v42  ;;  %v5204_v23 = vld [vmem:[#allocation19_spill] sm:$0xff]  ;;  %v5206_v14 = vld [vmem:[#allocation17_spill] sm:$0xff] }
 0x3a7   : > { %v2017_v31 = vsel %vm4552_vm11, %v2016_v57, %v2012_v7  ;;  %v1812_v55 = vmul.f32 %v4246_v49, %v1811_v54  ;;  %2050 = vmatpush.bf16.msra.mxu2 %v2028_v32  ;;  %vm1815_vm9 = vweird.f32 %v4246_v49  ;;  %v1818_v53 = vand.u32 2147483647, %v4197_v17  ;;  %vm4639_vm4 = vmor %vm1784_vm3, %vm1785_vm0  ;;  %v5208_v54 = vld [vmem:[#allocation20_spill] sm:$0xff] }
 0x3a8   : > { %v2029_v45 = vpack.c.bf16 %v2017_v31, %v1987_v20  ;;  %v1820_v36 = vand.u32 2147483648, %v4197_v17  ;;  %v1867_v44 = vsel %vm4587_vm10, %v4275_v58, %v1862_v12  ;;  %vm1814_vm14 = vweird.f32 %v4197_v17 }
 0x3a9   : > { %v1813_v42 = vadd.f32 %v4246_v49, %v1812_v55  ;;  %v1795_v29 = vmul.f32 %v4235_v1, %v4187_v38  ;;  %v2027_v5 = vpack.c.bf16 %v1957_v56, %v4492_v48  ;;  %v1787_v58 = vsel %vm4639_vm4, %v4211_v43, %v1783_v27  ;;  %vm4655_vm8 = vmor %vm1814_vm14, %vm1815_vm9  ;;  %v5198_v56 = vld [vmem:[#allocation18_spill] sm:$0xff] }
 0x3aa   : > { %2064 = vmatpush.bf16.msra.mxu3 %v2029_v45  ;;  %vm4651_vm11 = vcmp.eq.f32.partialorder %v1788_v0, 8.507059e+37  ;;  %v1791_v63 = vor.u32 1.1754944e-38, %v1790_v33  ;;  %v2025_v17 = vpack.c.bf16 %v1897_v13, %v1867_v44  ;;  %v1825_v48 = vmul.f32 %v4255_v50, %v4201_v9 }
 0x3ab   : > { %v1817_v12 = vsel %vm4655_vm8, %v4246_v49, %v1813_v42  ;;  %v1796_v22 = vsub.f32 1.0, %v1795_v29  ;;  %2051 = vmatpush.bf16.msra.mxu2 %v2026_v15  ;;  %vm1819_vm6 = vcmp.eq.f32.partialorder %v1818_v53, 8.507059e+37  ;;  %v1821_v43 = vor.u32 1.1754944e-38, %v1820_v36  ;;  %v4742_v53 = vpop.f32.mrf.mxu2  ;;  %v4744_v36 = vpop.f32.mrf.mxu3 }
 0x3ac   : > { %vm1799_vm2 = vweird.f32 %v4187_v38  ;;  %vm1800_vm10 = vweird.f32 %v4235_v1  ;;  %v1803_v18 = vand.u32 2147483647, %v4187_v38  ;;  %v1805_v49 = vand.u32 2147483648, %v4187_v38 }
 0x3ad   : > { %v1797_v21 = vmul.f32 %v4235_v1, %v1796_v22  ;;  %v1826_v41 = vsub.f32 1.0, %v1825_v48  ;;  %v1822_v37 = vsel %vm1819_vm6, %v1821_v43, %v1817_v12  ;;  %vm1830_vm5 = vweird.f32 %v4255_v50  ;;  %vm4698_vm13 = vmor %vm1799_vm2, %vm1800_vm10 }
 0x3ae   : > { %2065 = vmatpush.bf16.msra.mxu3 %v2027_v5  ;;  %v1835_v10 = vand.u32 2147483648, %v4201_v9  ;;  %v5190_v59 = vmax.f32 %v4184_v4, 0.0  ;;  %v5191_v15 = vmax.f32 %v4220_v19, 0.0  ;;  %v1833_v61 = vand.u32 2147483647, %v4201_v9 }
 0x3af   : > { %v1798_v30 = vadd.f32 %v4235_v1, %v1797_v21  ;;  %v1827_v26 = vmul.f32 %v4255_v50, %v1826_v41  ;;  %v5192_v51 = vmax.f32 %v4190_v16, 0.0  ;;  %v5193_v20 = vmax.f32 %v4227_v52, 0.0  ;;  %2052 = vmatpush.bf16.msra.mxu2 %v2024_v39  ;;  %v2019_v16 = vld [vmem:[%s4993_s6 + $0x140] sm:$0xff]  ;;  %v2020_v52 = vld [vmem:[%s4993_s6 + $0x148] sm:$0xff] }
 0x3b0   : > { %v4678_v60 = vpack.c.bf16 %v5191_v15, %v5190_v59  ;;  %v1792_v4 = vsel %vm4651_vm11, %v1791_v63, %v1787_v58  ;;  %v5196_v3 = vmax.f32 %v4149_v25, 0.0  ;;  %v5197_v28 = vmax.f32 %v4164_v2, 0.0 }
 0x3b1   : > { %v4687_v46 = vpack.c.bf16 %v5193_v20, %v5192_v51  ;;  %v5199_v38 = vmax.f32 %v5198_v56, 0.0  ;;  %v5201_v62 = vmax.f32 %v5200_v11, 0.0  ;;  %v5203_v40 = vmax.f32 %v5202_v6, 0.0 }
 0x3b2   : > { %v4712_v39 = vpack.c.bf16 %v5197_v28, %v5196_v3  ;;  %v5205_v27 = vmax.f32 %v5204_v23, 0.0  ;;  %v1802_v25 = vsel %vm4698_vm13, %v4235_v1, %v1798_v30  ;;  %v1828_v2 = vadd.f32 %v4255_v50, %v1827_v26  ;;  %2066 = vmatpush.bf16.msra.mxu3 %v2025_v17  ;;  %v2035_v17 = vpop.permute.xlu0 %2034 }
 0x3b3   : > { %v4718_v47 = vpack.c.bf16 %v5201_v62, %v5199_v38  ;;  %vm1829_vm7 = vweird.f32 %v4201_v9  ;;  %v5207_v35 = vmax.f32 %v5206_v14, 0.0  ;;  %v5209_v32 = vmax.f32 %v5208_v54, 0.0  ;;  %v4746_v44 = vpop.f32.mrf.mxu2  ;;  %v4748_v57 = vpop.f32.mrf.mxu3 }
 0x3b4   : > { %v4724_v8 = vpack.c.bf16 %v5205_v27, %v5203_v40  ;;  %v2022_v0 = vpack.c.bf16 %v1822_v37, %v1792_v4  ;;  %v1806_v33 = vor.u32 1.1754944e-38, %v1805_v49  ;;  %vm1831_vm15 = vmor %vm1829_vm7, %vm1830_vm5  ;;  %v1836_v31 = vor.u32 1.1754944e-38, %v1835_v10  ;;  %v2040_v49 = vpop.permute.xlu1 %2039 }
 0x3b5   : > { %v4735_v7 = vpack.c.bf16 %v5209_v32, %v5207_v35  ;;  %vm1804_vm12 = vcmp.eq.f32.partialorder %v1803_v18, 8.507059e+37  ;;  %v1832_v1 = vsel %vm1831_vm15, %v4255_v50, %v1828_v2  ;;  %vm1834_vm0 = vcmp.eq.f32.partialorder %v1833_v61, 8.507059e+37 }
 0x3b6   : > { %v2021_v13 = vpack.c.bf16 %v2020_v52, %v2019_v16  ;;  %2053 = vmatpush.bf16.msra.mxu2 %v2022_v0  ;;  %v1807_v9 = vsel %vm1804_vm12, %v1806_v33, %v1802_v25  ;;  %v1837_v55 = vsel %vm1834_vm0, %v1836_v31, %v1832_v1  ;;  %vm2042_vm1 = vcmask 523264  }
 0x3b7   : > { %v2023_v45 = vpack.c.bf16 %v1837_v55, %v1807_v9 }
 0x3b9   : > { %2067 = vmatpush.bf16.msra.mxu3 %v2023_v45  ;;  %2996 = vmatmul.msk.bf16.vlgmr.msra.gmra.mxu2 %vm2042_vm1, %v2021_v13 }
 0x3bc   : > { %2997 = vmatmul.msk.bf16.vlgmr.msra.gmra.mxu3 %vm2042_vm1, %v2021_v13 }
 0x3e4   : > { %v4750_v50 = vpop.f32.mrf.mxu2  ;;  %v4752_v42 = vpop.f32.mrf.mxu3 }
 0x3ec   : > { %v4754_v29 = vpop.f32.mrf.mxu2  ;;  %v4756_v5 = vpop.f32.mrf.mxu3 }
 0x400   : > { %v4758_v58 = vpop.f32.mrf.mxu2  ;;  %v4760_v34 = vpop.f32.mrf.mxu3 }
 0x408   : > { %v4762_v63 = vpop.f32.mrf.mxu2  ;;  %v4764_v24 = vpop.f32.mrf.mxu3 }
 0x43c   : > { %v2055_v12 = vpop.f32.mrf.mxu2 }
 0x43d   : > { %v2056_v22 = vadd.f32 %v2055_v12, %v2035_v17 }
 0x43f   : > { %v2998_v48 = vmul.f32 -1.442695, %v2056_v22  ;;  %v2069_v43 = vpop.f32.mrf.mxu3 }
 0x440   : > { %v2070_v21 = vadd.f32 %v2069_v43, %v2035_v17 }
 0x441   : > { %3168 = vpow2.f32 %v2998_v48 }
 0x442   : > { %v2999_v18 = vmul.f32 -1.442695, %v2070_v21 }
 0x444   : > { %3170 = vpow2.f32 %v2999_v18  ;;  %v2057_v41 = vpop.f32.mrf.mxu2 }
 0x445   : > { %v2058_v37 = vadd.f32 %v2057_v41, %v2040_v49 }
 0x447   : > { %v3169_v10 = vpop.eup %3168  ;;  %v3000_v59 = vmul.f32 -1.442695, %v2058_v37  ;;  %v2071_v15 = vpop.f32.mrf.mxu3 }
 0x448   : > { %v2086_v30 = vadd.f32 1.0, %v3169_v10  ;;  %v2072_v26 = vadd.f32 %v2071_v15, %v2040_v49 }
 0x449   : > { %3172 = vpow2.f32 %v3000_v59 }
 0x44a   : > { %v3171_v61 = vpop.eup %3170  ;;  %3174 = vrcp.f32 %v2086_v30  ;;  %v3001_v51 = vmul.f32 -1.442695, %v2072_v26  ;;  %v2101_v40 = vand.u32 2147483648, %v2086_v30  ;;  %vm2095_vm9 = vweird.f32 %v2086_v30 }
 0x44b   : > { %v2087_v20 = vadd.f32 1.0, %v3171_v61  ;;  %v2099_v14 = vand.u32 2147483647, %v2086_v30 }
 0x44c   : > { %3176 = vpow2.f32 %v3001_v51  ;;  %v2102_v0 = vor.u32 1.1754944e-38, %v2101_v40 }
 0x44d   : > { %3178 = vrcp.f32 %v2087_v20  ;;  %vm2110_vm4 = vweird.f32 %v2087_v20  ;;  %v2116_v33 = vand.u32 2147483648, %v2087_v20  ;;  %vm2100_vm2 = vcmp.eq.f32.partialorder %v2099_v14, 8.507059e+37 }
 0x44e   : > { %v2114_v12 = vand.u32 2147483647, %v2087_v20 }
 0x44f   : > { %v3173_v4 = vpop.eup %3172  ;;  %v2117_v59 = vor.u32 1.1754944e-38, %v2116_v33 }
 0x450   : > { %v3175_v19 = vpop.eup %3174  ;;  %v2088_v16 = vadd.f32 1.0, %v3173_v4  ;;  %vm2115_vm12 = vcmp.eq.f32.partialorder %v2114_v12, 8.507059e+37 }
 0x451   : > { %v2091_v52 = vmul.f32 %v3175_v19, %v2086_v30  ;;  %vm2096_vm3 = vweird.f32 %v3175_v19 }
 0x452   : > { %v3177_v3 = vpop.eup %3176  ;;  %3180 = vrcp.f32 %v2088_v16  ;;  %v2131_v32 = vand.u32 2147483648, %v2088_v16  ;;  %vm4766_vm14 = vmor %vm2095_vm9, %vm2096_vm3  ;;  %v2129_v45 = vand.u32 2147483647, %v2088_v16  ;;  %vm2125_vm6 = vweird.f32 %v2088_v16 }
 0x453   : > { %v3179_v28 = vpop.eup %3178  ;;  %v2092_v56 = vsub.f32 1.0, %v2091_v52  ;;  %v2089_v38 = vadd.f32 1.0, %v3177_v3  ;;  %vm5214_vm9 = vcmask 392192  }
 0x454   : > { %v2106_v11 = vmul.f32 %v3179_v28, %v2087_v20  ;;  %vm2111_vm11 = vweird.f32 %v3179_v28  ;;  %v2132_v43 = vor.u32 1.1754944e-38, %v2131_v32  ;;  %vm2130_vm7 = vcmp.eq.f32.partialorder %v2129_v45, 8.507059e+37 }
 0x455   : > { %v2093_v62 = vmul.f32 %v3175_v19, %v2092_v56  ;;  %3182 = vrcp.f32 %v2089_v38  ;;  %v2146_v22 = vand.u32 2147483648, %v2089_v38  ;;  %vm4773_vm10 = vmor %vm2110_vm4, %vm2111_vm11  ;;  %v2144_v18 = vand.u32 2147483647, %v2089_v38 }
 0x456   : > { %v2107_v6 = vsub.f32 1.0, %v2106_v11  ;;  %vm2140_vm15 = vweird.f32 %v2089_v38  ;;  %vm5215_vm4 = vmmov %vm5214_vm9 }
 0x457   : > { %v2094_v2 = vadd.f32 %v3175_v19, %v2093_v62  ;;  %v2147_v20 = vor.u32 1.1754944e-38, %v2146_v22  ;;  %vm2145_vm3 = vcmp.eq.f32.partialorder %v2144_v18, 8.507059e+37  ;;  %vm5217_vm11 = vmmov %vm5215_vm4 }
 0x458   : > { %v3181_v23 = vpop.eup %3180  ;;  %v2108_v27 = vmul.f32 %v3179_v28, %v2107_v6 }
 0x459   : > { %v2121_v25 = vmul.f32 %v3181_v23, %v2088_v16  ;;  %v2098_v55 = vsel %vm4766_vm14, %v3175_v19, %v2094_v2  ;;  %vm2126_vm8 = vweird.f32 %v3181_v23  ;;  %vm5216_vm14 = vmmov %vm5215_vm4 }
 0x45a   : > { %v2109_v13 = vadd.f32 %v3179_v28, %v2108_v27  ;;  %v2103_v41 = vsel %vm2100_vm2, %v2102_v0, %v2098_v55  ;;  %vm2127_vm5 = vmor %vm2125_vm6, %vm2126_vm8  ;;  %v2183_v27 = vld [vmem:[%s4993_s6 + $0x188] sm:$0xff] }
 0x45b   : > { %v3183_v35 = vpop.eup %3182  ;;  %v2122_v54 = vsub.f32 1.0, %v2121_v25  ;;  %v2158_v26 = vmul.f32 %v2103_v41, %v4758_v58  ;;  %v2154_v56 = vmul.f32 %v2103_v41, %v4750_v50  ;;  %v2150_v6 = vmul.f32 %v2103_v41, %v4742_v53  ;;  %v2179_v50 = vld [vmem:[%s4993_s6 + $0x168] sm:$0xff]  ;;  %v2180_v53 = vld [vmem:[%s4993_s6 + $0x170] sm:$0xff]  ;;  %vm5218_vm8 = vmmov %vm5215_vm4 }
 0x45c   : > { %v2136_v31 = vmul.f32 %v3183_v35, %v2089_v38  ;;  %v2113_v37 = vsel %vm4773_vm10, %v3179_v28, %v2109_v13  ;;  %vm2141_vm13 = vweird.f32 %v3183_v35  ;;  %vm5219_vm6 = vmmov %vm5215_vm4 }
 0x45d   : > { %v2123_v9 = vmul.f32 %v3181_v23, %v2122_v54  ;;  %v2118_v51 = vsel %vm2115_vm12, %v2117_v59, %v2113_v37  ;;  %vm2142_vm0 = vmor %vm2140_vm15, %vm2141_vm13 }
 0x45e   : > { %v2137_v17 = vsub.f32 1.0, %v2136_v31  ;;  %v2159_v3 = vmul.f32 %v2118_v51, %v4760_v34  ;;  %v2155_v62 = vmul.f32 %v2118_v51, %v4752_v42 }
 0x45f   : > { %v2124_v48 = vadd.f32 %v3181_v23, %v2123_v9 }
 0x460   : > { %v2138_v49 = vmul.f32 %v3183_v35, %v2137_v17 }
 0x461   : > { %v2128_v10 = vsel %vm2127_vm5, %v3181_v23, %v2124_v48 }
 0x462   : > { %v2133_v15 = vsel %vm2130_vm7, %v2132_v43, %v2128_v10  ;;  %v2139_v30 = vadd.f32 %v3183_v35, %v2138_v49 }
 0x463   : > { %v2160_v61 = vmul.f32 %v2133_v15, %v4762_v63  ;;  %v2156_v52 = vmul.f32 %v2133_v15, %v4754_v29  ;;  %v2152_v11 = vmul.f32 %v2133_v15, %v4746_v44  ;;  %v2178_v29 = vld [vmem:[%s4993_s6 + $0x160] sm:$0xff]  ;;  %v2151_v44 = vmul.f32 %v2118_v51, %v4744_v36 }
 0x464   : > { %v2143_v4 = vsel %vm2142_vm0, %v3183_v35, %v2139_v30  ;;  %v2184_v40 = vpack.c.bf16 %v2179_v50, %v2178_v29  ;;  %v2182_v36 = vld [vmem:[%s4993_s6 + $0x180] sm:$0xff] }
 0x465   : > { %v2191_v19 = vpack.c.bf16 %v2160_v61, %v2158_v26  ;;  %v2148_v16 = vsel %vm2145_vm3, %v2147_v20, %v2143_v4  ;;  %v2189_v63 = vpack.c.bf16 %v2156_v52, %v2154_v56  ;;  %v2186_v25 = vpack.c.bf16 %v2183_v27, %v2182_v36 }
 0x466   : > { %v2161_v28 = vmul.f32 %v2148_v16, %v4764_v24  ;;  %v2157_v58 = vmul.f32 %v2148_v16, %v4756_v5  ;;  %v2153_v5 = vmul.f32 %v2148_v16, %v4748_v57  ;;  %v2187_v24 = vpack.c.bf16 %v2152_v11, %v2150_v6  ;;  %v2181_v57 = vld [vmem:[%s4993_s6 + $0x178] sm:$0xff] }
 0x467   : > { %2207 = vmatpush.bf16.msra.mxu0 %v2191_v19  ;;  %v2185_v23 = vpack.c.bf16 %v2181_v57, %v2180_v53  ;;  %vm5221_vm3 = vcmask 130048  }
 0x468   : > { %v2192_v38 = vpack.c.bf16 %v2161_v28, %v2159_v3  ;;  %v2190_v34 = vpack.c.bf16 %v2157_v58, %v2155_v62  ;;  %v2188_v42 = vpack.c.bf16 %v2153_v5, %v2151_v44 }
 0x46a   : > { %2231 = vmatpush.bf16.msra.mxu1 %v2192_v38 }
 0x46b   : > { %2208 = vmatpush.bf16.msra.mxu0 %v2189_v63 }
 0x46e   : > { %2232 = vmatpush.bf16.msra.mxu1 %v2190_v34 }
 0x46f   : > { %2209 = vmatpush.bf16.msra.mxu0 %v2187_v24 }
 0x472   : > { %2233 = vmatpush.bf16.msra.mxu1 %v2188_v42  ;;  %3002 = vmatmul.msk.bf16.vlgmr.msra.gmra.mxu0 %vm5214_vm9, %v2184_v40  ;;  %vm5223_vm9 = vmmov %vm5221_vm3 }
 0x475   : > { %3005 = vmatmul.msk.bf16.vlgmr.msra.gmra.mxu1 %vm5215_vm4, %v2184_v40 }
 0x482   : > { %3003 = vmatmul.msk.bf16.gmra.mxu0 %vm5216_vm14, %v2185_v23 }
 0x485   : > { %3006 = vmatmul.msk.bf16.gmra.mxu1 %vm5217_vm11, %v2185_v23 }
 0x492   : > { %3004 = vmatmul.msk.bf16.gmra.mxu0 %vm5218_vm8, %v2186_v25  ;;  %vm5232_vm8 = vmmov %vm5221_vm3 }
 0x495   : > { %3007 = vmatmul.msk.bf16.gmra.mxu1 %vm5219_vm6, %v2186_v25  ;;  %vm5233_vm6 = vmmov %vm5221_vm3 }
 0x4ef   : > { %v4815_v2 = vpop.f32.mrf.mxu0 }
 0x4f0   : > { %v2250_v55 = vmul.f32 %v4815_v2, %v4815_v2 }
 0x4f2   : > { %v4817_v14 = vpop.f32.mrf.mxu1 }
 0x4f3   : > { %v2251_v48 = vmul.f32 %v4817_v14, %v4817_v14 }
 0x4f7   : > { %v4819_v35 = vpop.f32.mrf.mxu0 }
 0x4f8   : > { %v2421_v54 = vpack.c.bf16 %v4819_v35, %v4815_v2  ;;  %v2252_v10 = vmul.f32 %v4819_v35, %v4819_v35 }
 0x4fa   : > { %v4823_v32 = vpop.f32.mrf.mxu1 }
 0x4fb   : > { %v2422_v0 = vpack.c.bf16 %v4823_v32, %v4817_v14  ;;  %v2253_v61 = vmul.f32 %v4823_v32, %v4823_v32  ;;  %v2405_v32 = vpop.permute.xlu2 %2404 }
 0x4ff   : > { %v4827_v33 = vpop.f32.mrf.mxu0 }
 0x500   : > { %v2254_v9 = vmul.f32 %v4827_v33, %v4827_v33 }
 0x502   : > { %v4829_v31 = vpop.f32.mrf.mxu1  ;;  %v2258_v12 = vadd.f32 %v2254_v9, %v2250_v55 }
 0x503   : > { %v2255_v45 = vmul.f32 %v4829_v31, %v4829_v31 }
 0x505   : > { %v2259_v18 = vadd.f32 %v2255_v45, %v2251_v48 }
 0x507   : > { %v4831_v1 = vpop.f32.mrf.mxu0 }
 0x508   : > { %v2256_v41 = vmul.f32 %v4831_v1, %v4831_v1 }
 0x50a   : > { %v4833_v13 = vpop.f32.mrf.mxu1  ;;  %v2260_v30 = vadd.f32 %v2256_v41, %v2252_v10 }
 0x50b   : > { %v2257_v59 = vmul.f32 %v4833_v13, %v4833_v13 }
 0x50d   : > { %v2261_v19 = vadd.f32 %v2257_v59, %v2253_v61 }
 0x50f   : > { %v4841_v17 = vpop.f32.mrf.mxu0 }
 0x510   : > { %v2262_v22 = vmul.f32 %v4841_v17, %v4841_v17 }
 0x512   : > { %v2266_v43 = vadd.f32 %v2262_v22, %v2258_v12  ;;  %v4847_v21 = vpop.f32.mrf.mxu1 }
 0x513   : > { %v2263_v49 = vmul.f32 %v4847_v21, %v4847_v21 }
 0x514   : > { %3184 = vrsqrt.f32 %v2266_v43  ;;  %vm2277_vm2 = vcmp.eq.f32.partialorder %v2266_v43, inf  ;;  %v2280_v55 = vand.u32 2147483648, %v2266_v43  ;;  %vm2279_vm10 = vcmp.eq.f32.partialorder %v2266_v43, 0.0 }
 0x515   : > { %v4853_v37 = vadd.f32 %v2263_v49, %v2259_v18 }
 0x517   : > { %3186 = vrsqrt.f32 %v4853_v37  ;;  %v4860_v15 = vpop.f32.mrf.mxu0  ;;  %vm2289_vm13 = vcmp.eq.f32.partialorder %v4853_v37, inf  ;;  %v2292_v10 = vand.u32 2147483648, %v4853_v37  ;;  %vm2291_vm15 = vcmp.eq.f32.partialorder %v4853_v37, 0.0 }
 0x518   : > { %v2264_v26 = vmul.f32 %v4860_v15, %v4860_v15 }
 0x51a   : > { %v3185_v51 = vpop.eup %3184  ;;  %v2268_v20 = vadd.f32 %v2264_v26, %v2260_v30  ;;  %v4866_v4 = vpop.f32.mrf.mxu1 }
 0x51b   : > { %v2265_v16 = vmul.f32 %v4866_v4, %v4866_v4  ;;  %v2271_v52 = vmul.f32 %v3185_v51, %v2266_v43 }
 0x51c   : > { %3188 = vrsqrt.f32 %v2268_v20  ;;  %vm2301_vm5 = vcmp.eq.f32.partialorder %v2268_v20, inf  ;;  %v2304_v48 = vand.u32 2147483648, %v2268_v20  ;;  %vm2303_vm7 = vcmp.eq.f32.partialorder %v2268_v20, 0.0 }
 0x51d   : > { %v3187_v3 = vpop.eup %3186  ;;  %v2269_v28 = vadd.f32 %v2265_v16, %v2261_v19  ;;  %v2272_v56 = vmul.f32 %v3185_v51, %v2271_v52  ;;  %v2334_v16 = vld [vmem:[%s4993_s6 + $0x1a8] sm:$0xff] }
 0x51e   : > { %v2283_v38 = vmul.f32 %v3187_v3, %v4853_v37 }
 0x51f   : > { %3190 = vrsqrt.f32 %v2269_v28  ;;  %v2273_v58 = vmul.f32 0.5, %v2272_v56  ;;  %vm2313_vm12 = vcmp.eq.f32.partialorder %v2269_v28, inf  ;;  %v2316_v19 = vand.u32 2147483648, %v2269_v28 }
 0x520   : > { %v2284_v63 = vmul.f32 %v3187_v3, %v2283_v38  ;;  %vm2315_vm0 = vcmp.eq.f32.partialorder %v2269_v28, 0.0 }
 0x521   : > { %v2274_v11 = vsub.f32 1.5, %v2273_v58 }
 0x522   : > { %v3189_v62 = vpop.eup %3188  ;;  %v2285_v6 = vmul.f32 0.5, %v2284_v63  ;;  %v5220_v63 = vld [vmem:[#allocation22_spill] sm:$0xff] }
 0x523   : > { %v2275_v29 = vmul.f32 %v3185_v51, %v2274_v11  ;;  %v2295_v50 = vmul.f32 %v3189_v62, %v2268_v20  ;;  %v5222_v11 = vld [vmem:[#allocation23_spill] sm:$0xff] }
 0x524   : > { %v2286_v34 = vsub.f32 1.5, %v2285_v6  ;;  %v2323_v6 = vld [vmem:[%s4993_s6 + $0x198] sm:$0xff] }
 0x525   : > { %v3191_v5 = vpop.eup %3190  ;;  %v2296_v24 = vmul.f32 %v3189_v62, %v2295_v50  ;;  %v2276_v42 = vmul.f32 %v2275_v29, %v2266_v43 }
 0x526   : > { %v2287_v44 = vmul.f32 %v3187_v3, %v2286_v34  ;;  %v2307_v40 = vmul.f32 %v3191_v5, %v2269_v28  ;;  %v5227_v34 = vld [vmem:[#allocation14_spill] sm:$0xff] }
 0x527   : > { %v2297_v53 = vmul.f32 0.5, %v2296_v24  ;;  %v2278_v25 = vsel %vm2277_vm2, %v2266_v43, %v2276_v42  ;;  %v2333_v43 = vld [vmem:[%s4993_s6 + $0x1a0] sm:$0xff] }
 0x528   : > { %v2308_v57 = vmul.f32 %v3191_v5, %v2307_v40  ;;  %v2288_v36 = vmul.f32 %v2287_v44, %v4853_v37  ;;  %v2281_v22 = vsel %vm2279_vm10, %v2280_v55, %v2278_v25  ;;  %v2335_v38 = vpack.c.bf16 %v2334_v16, %v2333_v43  ;;  %v2410_v40 = vpop.permute.xlu0 %2409 }
 0x529   : > { %v2298_v23 = vsub.f32 1.5, %v2297_v53  ;;  %v2318_v26 = vadd.f32 1e-08, %v2281_v22 }
 0x52a   : > { %v2309_v27 = vmul.f32 0.5, %v2308_v57  ;;  %v2290_v18 = vsel %vm2289_vm13, %v4853_v37, %v2288_v36  ;;  %v2469_v57 = vld [vmem:[%s4993_s6 + $0x1d8] sm:$0xff] }
 0x52b   : > { %v2299_v9 = vmul.f32 %v3189_v62, %v2298_v23  ;;  %v2293_v51 = vsel %vm2291_vm15, %v2292_v10, %v2290_v18  ;;  %v2322_v62 = vld [vmem:[%s4993_s6 + $0x190] sm:$0xff]  ;;  %v2470_v55 = vpack.c.bf16 %v2469_v57, %v2469_v57  ;;  %v2477_v18 = vpop.permute.xlu1 %2476 }
 0x52c   : > { %v2310_v45 = vsub.f32 1.5, %v2309_v27  ;;  %v2319_v56 = vadd.f32 1e-08, %v2293_v51  ;;  %v5230_v27 = vld [vmem:[#allocation13_spill] sm:$0xff] }
 0x52d   : > { %v2300_v12 = vmul.f32 %v2299_v9, %v2268_v20 }
 0x52e   : > { %v2311_v49 = vmul.f32 %v3191_v5, %v2310_v45 }
 0x52f   : > { %v2302_v41 = vsel %vm2301_vm5, %v2268_v20, %v2300_v12  ;;  %v5231_v12 = vld [vmem:[#allocation15_spill] sm:$0xff] }
 0x530   : > { %v2305_v59 = vsel %vm2303_vm7, %v2304_v48, %v2302_v41  ;;  %v2312_v30 = vmul.f32 %v2311_v49, %v2269_v28 }
 0x531   : > { %v2320_v61 = vadd.f32 1e-08, %v2305_v59 }
 0x532   : > { %v2314_v20 = vsel %vm2313_vm12, %v2269_v28, %v2312_v30  ;;  %v2425_v28 = vpack.c.bf16 %v4860_v15, %v4841_v17 }
 0x533   : > { %v2336_v52 = vpack.c.bf16 %v2320_v61, %v2318_v26  ;;  %v2317_v3 = vsel %vm2315_vm0, %v2316_v19, %v2314_v20 }
 0x534   : > { %v2321_v37 = vadd.f32 1e-08, %v2317_v3 }
 0x535   : > { %2348 = vmatpush.bf16.msrb.mxu2 %v2336_v52 }
 0x536   : > { %v2337_v58 = vpack.c.bf16 %v2321_v37, %v2319_v56 }
 0x538   : > { %2362 = vmatpush.bf16.msrb.mxu3 %v2337_v58  ;;  %3008 = vmatmul.msk.bf16.vlgmr.msrb.gmra.mxu2 %vm5221_vm3, %v2335_v38 }
 0x539   : > { %2376 = vmatpush.bf16.msra.mxu2 %v5220_v63 }
 0x53b   : > { %3009 = vmatmul.msk.bf16.vlgmr.msrb.gmra.mxu3 %vm5223_vm9, %v2335_v38 }
 0x53c   : > { %2390 = vmatpush.bf16.msra.mxu3 %v5222_v11 }
 0x53d   : > { %2377 = vmatpush.bf16.msra.mxu2 %v4678_v60  ;;  %v2426_v60 = vpack.c.bf16 %v4866_v4, %v4847_v21  ;;  %v5226_v4 = vld [vmem:[#allocation12_spill] sm:$0xff] }
 0x540   : > { %2391 = vmatpush.bf16.msra.mxu3 %v4687_v46  ;;  %v2324_v46 = vpack.c.bf16 %v2323_v6, %v2322_v62 }
 0x541   : > { %2378 = vmatpush.bf16.msra.mxu2 %v4712_v39  ;;  %v2423_v39 = vpack.c.bf16 %v4831_v1, %v4827_v33  ;;  %v2416_v33 = vld [vmem:[%s4993_s6 + $0x1c0] sm:$0xff] }
 0x544   : > { %2392 = vmatpush.bf16.msra.mxu3 %v4718_v47  ;;  %v2424_v47 = vpack.c.bf16 %v4833_v13, %v4829_v31  ;;  %v2417_v31 = vld [vmem:[%s4993_s6 + $0x1c8] sm:$0xff] }
 0x545   : > { %2379 = vmatpush.bf16.msra.mxu2 %v4724_v8  ;;  %v2419_v1 = vpack.c.bf16 %v2417_v31, %v2416_v33 }
 0x548   : > { %2393 = vmatpush.bf16.msra.mxu3 %v4735_v7  ;;  %3010 = vmatmul.msk.bf16.vlgmr.msra.gmra.mxu2 %vm2042_vm1, %v2324_v46 }
 0x549   : > { %2438 = vmatpush.bf16.msrb.mxu2 %v2425_v28 }
 0x54b   : > { %3011 = vmatmul.msk.bf16.vlgmr.msra.gmra.mxu3 %vm2042_vm1, %v2324_v46  ;;  %vm5224_vm1 = vmmov %vm5215_vm4 }
 0x54c   : > { %2456 = vmatpush.bf16.msrb.mxu3 %v2426_v60  ;;  %vm5225_vm4 = vmmov %vm5224_vm1 }
 0x54d   : > { %2439 = vmatpush.bf16.msrb.mxu2 %v2423_v39  ;;  %vm5228_vm14 = vmmov %vm5224_vm1 }
 0x54e   : > { %vm5229_vm11 = vmmov %vm5224_vm1 }
 0x550   : > { %2457 = vmatpush.bf16.msrb.mxu3 %v2424_v47 }
 0x551   : > { %2440 = vmatpush.bf16.msrb.mxu2 %v2421_v54  ;;  %v2418_v54 = vld [vmem:[%s4993_s6 + $0x1d0] sm:$0xff] }
 0x552   : > { %v2420_v15 = vpack.c.bf16 %v2418_v54, %v2418_v54 }
 0x554   : > { %2458 = vmatpush.bf16.msrb.mxu3 %v2422_v0 }
 0x558   : > { %3012 = vmatmul.msk.bf16.vlgmr.msrb.gmra.mxu2 %vm5224_vm1, %v2419_v1 }
 0x55b   : > { %3014 = vmatmul.msk.bf16.vlgmr.msrb.gmra.mxu3 %vm5225_vm4, %v2419_v1 }
 0x568   : > { %3013 = vmatmul.msk.bf16.gmra.mxu2 %vm5228_vm14, %v2420_v15 }
 0x56b   : > { %3015 = vmatmul.msk.bf16.gmra.mxu3 %vm5229_vm11, %v2420_v15  ;;  %v5234_v15 = vld [vmem:[#allocation8_spill] sm:$0xff] }
 0x5bb   : > { %v2350_v8 = vpop.f32.mrf.mxu2 }
 0x5be   : > { %v2364_v7 = vpop.f32.mrf.mxu3 }
 0x5c3   : > { %v2352_v13 = vpop.f32.mrf.mxu2 }
 0x5c6   : > { %v2366_v2 = vpop.f32.mrf.mxu3 }
 0x5cb   : > { %v2381_v35 = vpop.f32.mrf.mxu2 }
 0x5cc   : > { %v2382_v14 = vadd.f32 %v2381_v35, %v2350_v8 }
 0x5ce   : > { %v2412_v0 = vadd.f32 %v2405_v32, %v2382_v14  ;;  %v2395_v17 = vpop.f32.mrf.mxu3 }
 0x5cf   : > { %v2396_v21 = vadd.f32 %v2395_v17, %v2364_v7 }
 0x5d0   : > { %v2552_v29 = vadd.f32 %v2412_v0, %v5226_v4 }
 0x5d1   : > { %v2413_v50 = vadd.f32 %v2405_v32, %v2396_v21 }
 0x5d2   : > { %2556 = vst [vmem:[%s4994_s7] sm:$0xff] %v2552_v29 }
 0x5d3   : > { %v2553_v5 = vadd.f32 %v2413_v50, %v5227_v34  ;;  %v2383_v24 = vpop.f32.mrf.mxu2 }
 0x5d4   : > { %v2384_v44 = vadd.f32 %v2383_v24, %v2352_v13 }
 0x5d5   : > { %2557 = vst [vmem:[%s4994_s7 + $0x8] sm:$0xff] %v2553_v5  ;;  %v5236_v5 = vld [vmem:[#allocation6_spill] sm:$0xff] }
 0x5d6   : > { %v2414_v42 = vadd.f32 %v2410_v40, %v2384_v44  ;;  %v2397_v53 = vpop.f32.mrf.mxu3 }
 0x5d7   : > { %v2398_v23 = vadd.f32 %v2397_v53, %v2366_v2  ;;  %v5237_v53 = vld [vmem:[#allocation10_spill] sm:$0xff] }
 0x5d8   : > { %v2471_v36 = vpack.c.bf16 %v2414_v42, %v2412_v0  ;;  %v2554_v25 = vadd.f32 %v2414_v42, %v5230_v27  ;;  %v5239_v27 = vld [vmem:[#allocation7_spill] sm:$0xff] }
 0x5d9   : > { %v2415_v9 = vadd.f32 %v2410_v40, %v2398_v23  ;;  %v5238_v23 = vld [vmem:[#allocation11_spill] sm:$0xff] }
 0x5da   : > { %2558 = vst [vmem:[%s4994_s7 + $0x10] sm:$0xff] %v2554_v25  ;;  %2489 = vmatpush.bf16.msrb.mxu0 %v2471_v36 }
 0x5db   : > { %v2472_v45 = vpack.c.bf16 %v2415_v9, %v2413_v50  ;;  %v2555_v22 = vadd.f32 %v2415_v9, %v5231_v12  ;;  %v2442_v48 = vpop.f32.mrf.mxu2  ;;  %v5235_v50 = vld [vmem:[#allocation9_spill] sm:$0xff] }
 0x5dd   : > { %2559 = vst [vmem:[%s4994_s7 + $0x18] sm:$0xff] %v2555_v22  ;;  %2502 = vmatpush.bf16.msrb.mxu1 %v2472_v45  ;;  %3016 = vmatmul.msk.bf16.vlgmr.msrb.gmra.mxu0 %vm5232_vm8, %v2470_v55 }
 0x5de   : > { %v2460_v30 = vpop.f32.mrf.mxu3 }
 0x5e0   : > { %3017 = vmatmul.msk.bf16.vlgmr.msrb.gmra.mxu1 %vm5233_vm6, %v2470_v55 }
 0x5e3   : > { %v2444_v61 = vpop.f32.mrf.mxu2 }
 0x5e6   : > { %v2462_v16 = vpop.f32.mrf.mxu3 }
 0x5eb   : > { %v2447_v56 = vpop.f32.mrf.mxu2 }
 0x5ee   : > { %v2465_v38 = vpop.f32.mrf.mxu3 }
 0x5f3   : > { %v2449_v11 = vpop.f32.mrf.mxu2 }
 0x5f6   : > { %v2467_v33 = vpop.f32.mrf.mxu3 }
 0x65a   : > { %v2491_v49 = vpop.f32.mrf.mxu0 }
 0x65b   : > { %v2492_v41 = vadd.f32 %v2491_v49, %v2477_v18 }
 0x65d   : > { %v3018_v10 = vmul.f32 -1.442695, %v2492_v41  ;;  %v2504_v59 = vpop.f32.mrf.mxu1 }
 0x65e   : > { %v2505_v43 = vadd.f32 %v2504_v59, %v2477_v18 }
 0x65f   : > { %3192 = vpow2.f32 %v3018_v10 }
 0x660   : > { %v3019_v26 = vmul.f32 -1.442695, %v2505_v43 }
 0x662   : > { %3194 = vpow2.f32 %v3019_v26  ;;  %v2493_v51 = vpop.f32.mrf.mxu0 }
 0x665   : > { %v3193_v19 = vpop.eup %3192  ;;  %v2506_v20 = vpop.f32.mrf.mxu1 }
 0x666   : > { %v2514_v52 = vadd.f32 1.0, %v3193_v19 }
 0x668   : > { %v3195_v3 = vpop.eup %3194  ;;  %3196 = vrcp.f32 %v2514_v52  ;;  %v2527_v6 = vand.u32 2147483648, %v2514_v52  ;;  %v2525_v39 = vand.u32 2147483647, %v2514_v52  ;;  %vm2521_vm10 = vweird.f32 %v2514_v52 }
 0x669   : > { %v2515_v37 = vadd.f32 1.0, %v3195_v3 }
 0x66a   : > { %v2528_v31 = vor.u32 1.1754944e-38, %v2527_v6  ;;  %vm2526_vm7 = vcmp.eq.f32.partialorder %v2525_v39, 8.507059e+37 }
 0x66b   : > { %3198 = vrcp.f32 %v2515_v37  ;;  %v2542_v7 = vand.u32 2147483648, %v2515_v37  ;;  %v2540_v13 = vand.u32 2147483647, %v2515_v37  ;;  %vm2536_vm15 = vweird.f32 %v2515_v37 }
 0x66d   : > { %v2543_v32 = vor.u32 1.1754944e-38, %v2542_v7  ;;  %vm2541_vm0 = vcmp.eq.f32.partialorder %v2540_v13, 8.507059e+37 }
 0x66e   : > { %v3197_v58 = vpop.eup %3196 }
 0x66f   : > { %v2517_v63 = vmul.f32 %v3197_v58, %v2514_v52  ;;  %vm2522_vm2 = vweird.f32 %v3197_v58 }
 0x670   : > { %vm2523_vm5 = vmor %vm2521_vm10, %vm2522_vm2 }
 0x671   : > { %v3199_v28 = vpop.eup %3198  ;;  %v2518_v62 = vsub.f32 1.0, %v2517_v63 }
 0x672   : > { %v2532_v60 = vmul.f32 %v3199_v28, %v2515_v37  ;;  %vm2537_vm13 = vweird.f32 %v3199_v28 }
 0x673   : > { %v2519_v46 = vmul.f32 %v3197_v58, %v2518_v62  ;;  %vm2538_vm12 = vmor %vm2536_vm15, %vm2537_vm13 }
 0x674   : > { %v2533_v47 = vsub.f32 1.0, %v2532_v60 }
 0x675   : > { %v2520_v8 = vadd.f32 %v3197_v58, %v2519_v46 }
 0x676   : > { %v2534_v1 = vmul.f32 %v3199_v28, %v2533_v47 }
 0x677   : > { %v2524_v2 = vsel %vm2523_vm5, %v3197_v58, %v2520_v8 }
 0x678   : > { %v2529_v35 = vsel %vm2526_vm7, %v2528_v31, %v2524_v2  ;;  %v2535_v14 = vadd.f32 %v3199_v28, %v2534_v1 }
 0x679   : > { %v2546_v54 = vmul.f32 %v2529_v35, %v2442_v48  ;;  %v2548_v0 = vmul.f32 %v2529_v35, %v2444_v61  ;;  %v2550_v17 = vmul.f32 %v2529_v35, %v2447_v56 }
 0x67a   : > { %v2539_v21 = vsel %vm2538_vm12, %v3199_v28, %v2535_v14 }
 0x67b   : > { %v2560_v4 = vadd.f32 %v2546_v54, %v5234_v15  ;;  %v2544_v29 = vsel %vm2541_vm0, %v2543_v32, %v2539_v21  ;;  %v2562_v34 = vadd.f32 %v2548_v0, %v5235_v50  ;;  %v2564_v24 = vadd.f32 %v2550_v17, %v5236_v5 }
 0x67c   : > { %v2547_v44 = vmul.f32 %v2544_v29, %v2460_v30  ;;  %v2549_v40 = vmul.f32 %v2544_v29, %v2462_v16  ;;  %v2551_v42 = vmul.f32 %v2544_v29, %v2465_v38 }
 0x67d   : > { %2566 = vst [vmem:[%s4995_s8] sm:$0xff] %v2560_v4 }
 0x67e   : > { %v2561_v57 = vadd.f32 %v2547_v44, %v5237_v53  ;;  %2568 = vst [vmem:[%s4995_s8 + $0x10] sm:$0xff] %v2562_v34  ;;  %v2563_v36 = vadd.f32 %v2549_v40, %v5238_v23  ;;  %v2565_v25 = vadd.f32 %v2551_v42, %v5239_v27 }
 0x67f   : > { %2570 = vst [vmem:[%s4995_s8 + $0x20] sm:$0xff] %v2564_v24 }
 0x680   : > { %2567 = vst [vmem:[%s4995_s8 + $0x8] sm:$0xff] %v2561_v57 }
 0x681   : > { %2569 = vst [vmem:[%s4995_s8 + $0x18] sm:$0xff] %v2563_v36 }
 0x682   : > { %2571 = vst [vmem:[%s4995_s8 + $0x28] sm:$0xff] %v2565_v25 }
 0x683 PF: > { %s19_s9 = sadd.s32 1, %s3238_s9   ;;  %s5240_s27 = smov %s3226_s28 }
 0x684   : > { %p16_p12 = scmp.ge.s32.totalorder %s19_s9, 5   ;;  %s5241_s28 = smov %s3330_s14 }
 0x685   : > { %s5242_s29 = smov %s3234_s30  ;;  %s5243_s30 = smov %s5245_s10 }
 0x686   :  { %18 = sbr.rel (!%p16_p12) target bundleno = 3 (0x3), region = 169 }

</bundles_post_ra>
